<compile_context>
chip_gen: v5e
topology: v5e:2x2
jax: 0.10.0
libtpu: 0.0.40
codegen_flags: <defaults>
</compile_context>

<pallas_src>
import functools
import math

import jax
import jax.numpy as jnp
from jax import lax
from jax.experimental import pallas as pl
from jax.experimental.pallas import tpu as pltpu

NUM_LAYERS = 3  # fixed by the PyTorch module (self.lstm_layer_num = 3)


def lstm_fused_kernel(x_ref,
                      wx0_ref, wh0_ref, b0_ref,
                      wx1_ref, wh1_ref, b1_ref,
                      wx2_ref, wh2_ref, b2_ref,
                      wout_ref, bout_ref,
                      y_ref,
                      gx_sc, h_all_sc,
                      *, batch, seq_len):
    """Whole sequence: 3-layer LSTM + output projection in one invocation."""
    B = batch
    T = seq_len
    G = gx_sc.shape[-1]          # 4H
    H = G // 4

    # ---- Prologue (time-parallel, off the recurrent critical path) --------
    # Layer-0 input projection for ALL timesteps in one MXU push:
    #   [T*B, E] @ [E, 4H] + b0  ->  gx_sc
    gx_sc[...] = (jnp.dot(x_ref[...], wx0_ref[...],
                          preferred_element_type=jnp.float32)
                  + b0_ref[...])

    # Hoist weight loads and bias broadcasts out of the recurrent loop.
    wh0 = wh0_ref[...]
    wx1 = wx1_ref[...]
    wh1 = wh1_ref[...]
    wx2 = wx2_ref[...]
    wh2 = wh2_ref[...]
    b1 = jnp.broadcast_to(b1_ref[...], (B, G))
    b2 = jnp.broadcast_to(b2_ref[...], (B, G))

    def lstm_cell(gates, c_prev):
        # Full-width sigmoid + full-width tanh: 2 EUP pushes per [B, 4H] gate
        # vreg; gate groups are static lane slices (i, f, g, o order).
        sg = jax.nn.sigmoid(gates)
        tg = jnp.tanh(gates)
        i = sg[:, 0 * H:1 * H]
        f = sg[:, 1 * H:2 * H]
        g = tg[:, 2 * H:3 * H]
        o = sg[:, 3 * H:4 * H]
        c_new = f * c_prev + i * g
        h_new = o * jnp.tanh(c_new)
        return h_new, c_new

    def step(t, state):
        h0, c0, h1, c1, h2, c2 = state
        off = pl.multiple_of(t * B, B)
        # Layer 0: x @ W_x0 + b0 was precomputed in the prologue.
        g0 = gx_sc[pl.ds(off, B), :] + jnp.dot(
            h0, wh0, preferred_element_type=jnp.float32)
        h0, c0 = lstm_cell(g0, c0)
        # Layer 1
        g1 = (jnp.dot(h0, wx1, preferred_element_type=jnp.float32)
              + jnp.dot(h1, wh1, preferred_element_type=jnp.float32) + b1)
        h1, c1 = lstm_cell(g1, c1)
        # Layer 2
        g2 = (jnp.dot(h1, wx2, preferred_element_type=jnp.float32)
              + jnp.dot(h2, wh2, preferred_element_type=jnp.float32) + b2)
        h2, c2 = lstm_cell(g2, c2)
        # Stash the top-layer hidden state; projected in the batched epilogue.
        h_all_sc[pl.ds(off, B), :] = h2
        return (h0, c0, h1, c1, h2, c2)

    z = jnp.zeros((B, H), jnp.float32)        # h_0 = c_0 = 0, as in the module
    lax.fori_loop(0, T, step, (z, z, z, z, z, z), unroll=True)

    # ---- Epilogue: batched output projection -------------------------------
    # One [T*B, H] @ [H, V] matmul and one lane-dense [T*B, V] store.
    y_ref[...] = (jnp.dot(h_all_sc[...], wout_ref[...],
                          preferred_element_type=jnp.float32)
                  + bout_ref[...]).astype(y_ref.dtype)


def rnn_torch_lstm_forward(sentence, params):
    """Pallas implementation of RNN_torch_lstm.forward.

    sentence: [B, T] int32 token ids
    returns:  [B, V, T] float32 logits (matches output.permute(1, 2, 0))
    """
    emb_table = params["embedding"]                    # [V, E]
    V, E = emb_table.shape
    H = params["W_h0"].shape[0]
    B, T = sentence.shape
    G = 4 * H

    # Embedding lookup (gather) + permute(1, 0, 2) -> time-major, flattened to
    # [T*B, E] so the in-kernel layer-0 projection is one big matmul.
    # TODO(synk): the data-dependent row gather stays in plain JAX; it could
    # move in-kernel with scalar prefetch + pl.Element for large vocab tables.
    x = jnp.take(emb_table, sentence, axis=0)                       # [B, T, E]
    x = jnp.transpose(x, (1, 0, 2)).reshape(T * B, E).astype(jnp.float32)

    def full(shape):
        zeros = (0,) * len(shape)
        return pl.BlockSpec(shape, lambda i: zeros)

    grid_spec = pltpu.PrefetchScalarGridSpec(
        num_scalar_prefetch=0,
        grid=(1,),                     # single invocation; time loop in-kernel
        in_specs=[
            full((T * B, E)),
            full((E, G)), full((H, G)), full((1, G)),
            full((H, G)), full((H, G)), full((1, G)),
            full((H, G)), full((H, G)), full((1, G)),
            full((H, V)), full((1, V)),
        ],
        out_specs=full((T * B, V)),
        scratch_shapes=[
            pltpu.VMEM((T * B, G), jnp.float32),   # precomputed layer-0 gates
            pltpu.VMEM((T * B, H), jnp.float32),   # top-layer hidden history
        ],
    )

    kernel = functools.partial(lstm_fused_kernel, batch=B, seq_len=T)
    y = pl.pallas_call(
        kernel,
        out_shape=jax.ShapeDtypeStruct((T * B, V), jnp.float32),
        grid_spec=grid_spec,
        compiler_params=pltpu.CompilerParams(
            dimension_semantics=("arbitrary",)),   # recurrence is sequential
    )(x,
      params["W_x0"], params["W_h0"], params["b0"],
      params["W_x1"], params["W_h1"], params["b1"],
      params["W_x2"], params["W_h2"], params["b2"],
      params["W_out"], params["b_out"])

    # output.permute(1, 2, 0): [T, B, V] -> [B, V, T]
    return jnp.transpose(y.reshape(T, B, V), (1, 2, 0))


def init_params(key, vocab_len, embedding_size, hidden_size):
    """Packed-gate parameters, uniform(-1/sqrt(H), 1/sqrt(H)) like nn.LSTM."""
    H = hidden_size
    bound = 1.0 / math.sqrt(H)
    keys = iter(jax.random.split(key, 1 + 3 * NUM_LAYERS + 2))

    def uni(k, shape):
        return jax.random.uniform(k, shape, minval=-bound, maxval=bound,
                                  dtype=jnp.float32)

    params = {
        "embedding": jax.random.normal(
            next(keys), (vocab_len, embedding_size), dtype=jnp.float32),
    }
    in_sizes = [embedding_size, H, H]
    for l in range(NUM_LAYERS):
        params[f"W_x{l}"] = uni(next(keys), (in_sizes[l], 4 * H))
        params[f"W_h{l}"] = uni(next(keys), (H, 4 * H))
        params[f"b{l}"] = uni(next(keys), (1, 4 * H))     # b_ih + b_hh fused
    params["W_out"] = uni(next(keys), (H, vocab_len))
    params["b_out"] = uni(next(keys), (1, vocab_len))
    return params


def reference_forward(sentence, params):
    """Pure-JAX reference of the PyTorch forward semantics."""
    emb = params["embedding"]
    H = params["W_h0"].shape[0]
    x = jnp.transpose(jnp.take(emb, sentence, axis=0), (1, 0, 2))  # [T, B, E]
    T, B, _ = x.shape
    hs = [jnp.zeros((B, H), jnp.float32) for _ in range(NUM_LAYERS)]
    cs = [jnp.zeros((B, H), jnp.float32) for _ in range(NUM_LAYERS)]
    outs = []
    for t in range(T):
        inp = x[t]
        for l in range(NUM_LAYERS):
            gates = (inp @ params[f"W_x{l}"] + hs[l] @ params[f"W_h{l}"]
                     + params[f"b{l}"])
            i = jax.nn.sigmoid(gates[:, 0 * H:1 * H])
            f = jax.nn.sigmoid(gates[:, 1 * H:2 * H])
            g = jnp.tanh(gates[:, 2 * H:3 * H])
            o = jax.nn.sigmoid(gates[:, 3 * H:4 * H])
            cs[l] = f * cs[l] + i * g
            hs[l] = o * jnp.tanh(cs[l])
            inp = hs[l]
        outs.append(inp @ params["W_out"] + params["b_out"])
    y = jnp.stack(outs, axis=0)            # [T, B, V]
    return jnp.transpose(y, (1, 2, 0))     # [B, V, T]


if __name__ == "__main__":
    B, T = 2, 8
    VOCAB, EMB, HID = 128, 16, 32          # 4*HID = 128 -> lane-dense gates

    key = jax.random.PRNGKey(0)
    k_param, k_tok = jax.random.split(key)
    params = init_params(k_param, VOCAB, EMB, HID)
    sentence = jax.random.randint(k_tok, (B, T), 0, VOCAB, dtype=jnp.int32)

    out = rnn_torch_lstm_forward(sentence, params)
    jax.block_until_ready(out)
    assert out.shape == (B, VOCAB, T), out.shape

    ref = reference_forward(sentence, params)
    err = float(jnp.max(jnp.abs(out - ref)))
    assert jnp.allclose(out, ref, atol=1e-4, rtol=1e-4), f"max abs err={err}"

    print("KERNEL_OK")
</pallas_src>

<mosaic_0001>
module attributes {stable_mosaic.version = 11 : i64} {
  func.func @lstm_fused_kernel(%arg0: i32, %arg1: memref<16x16xf32, #tpu.memory_space<vmem>>, %arg2: memref<16x128xf32, #tpu.memory_space<vmem>>, %arg3: memref<32x128xf32, #tpu.memory_space<vmem>>, %arg4: memref<1x128xf32, #tpu.memory_space<vmem>>, %arg5: memref<32x128xf32, #tpu.memory_space<vmem>>, %arg6: memref<32x128xf32, #tpu.memory_space<vmem>>, %arg7: memref<1x128xf32, #tpu.memory_space<vmem>>, %arg8: memref<32x128xf32, #tpu.memory_space<vmem>>, %arg9: memref<32x128xf32, #tpu.memory_space<vmem>>, %arg10: memref<1x128xf32, #tpu.memory_space<vmem>>, %arg11: memref<32x128xf32, #tpu.memory_space<vmem>>, %arg12: memref<1x128xf32, #tpu.memory_space<vmem>>, %arg13: memref<16x128xf32, #tpu.memory_space<vmem>>, %arg14: memref<16x128xf32, #tpu.memory_space<vmem>>, %arg15: memref<16x32xf32, #tpu.memory_space<vmem>>) attributes {dimension_semantics = [#tpu.dimension_semantics<arbitrary>], iteration_bounds = array<i64: 1>, scalar_prefetch = 0 : i64, scratch_operands = 2 : i64, tpu.core_type = #tpu.core_type<tc>, window_params = [{pipeline_mode = #tpu.pipeline_mode<synchronous>, transform_indices = @transform_0, window_bounds = array<i64: 16, 16>}, {pipeline_mode = #tpu.pipeline_mode<synchronous>, transform_indices = @transform_1, window_bounds = array<i64: 16, 128>}, {pipeline_mode = #tpu.pipeline_mode<synchronous>, transform_indices = @transform_2, window_bounds = array<i64: 32, 128>}, {pipeline_mode = #tpu.pipeline_mode<synchronous>, transform_indices = @transform_3, window_bounds = array<i64: 1, 128>}, {pipeline_mode = #tpu.pipeline_mode<synchronous>, transform_indices = @transform_4, window_bounds = array<i64: 32, 128>}, {pipeline_mode = #tpu.pipeline_mode<synchronous>, transform_indices = @transform_5, window_bounds = array<i64: 32, 128>}, {pipeline_mode = #tpu.pipeline_mode<synchronous>, transform_indices = @transform_6, window_bounds = array<i64: 1, 128>}, {pipeline_mode = #tpu.pipeline_mode<synchronous>, transform_indices = @transform_7, window_bounds = array<i64: 32, 128>}, {pipeline_mode = #tpu.pipeline_mode<synchronous>, transform_indices = @transform_8, window_bounds = array<i64: 32, 128>}, {pipeline_mode = #tpu.pipeline_mode<synchronous>, transform_indices = @transform_9, window_bounds = array<i64: 1, 128>}, {pipeline_mode = #tpu.pipeline_mode<synchronous>, transform_indices = @transform_10, window_bounds = array<i64: 32, 128>}, {pipeline_mode = #tpu.pipeline_mode<synchronous>, transform_indices = @transform_11, window_bounds = array<i64: 1, 128>}, {pipeline_mode = #tpu.pipeline_mode<synchronous>, transform_indices = @transform_12, window_bounds = array<i64: 16, 128>}]} {
    %c0 = arith.constant 0 : index
    %c0_0 = arith.constant 0 : index
    %0 = vector.load %arg1[%c0, %c0_0] : memref<16x16xf32, #tpu.memory_space<vmem>>, vector<16x16xf32>
    %c0_1 = arith.constant 0 : index
    %c0_2 = arith.constant 0 : index
    %1 = vector.load %arg2[%c0_1, %c0_2] : memref<16x128xf32, #tpu.memory_space<vmem>>, vector<16x128xf32>
    %cst = arith.constant dense<0.000000e+00> : vector<16x128xf32>
    %2 = tpu.matmul %0, %1, %cst {dimension_numbers = #tpu.dot_dimension_numbers<[1], [0], [0], [1], [0, 0, 1, 1], [], []>} : vector<16x16xf32>, vector<16x128xf32>, vector<16x128xf32> -> vector<16x128xf32>
    %c0_3 = arith.constant 0 : index
    %c0_4 = arith.constant 0 : index
    %3 = vector.load %arg4[%c0_3, %c0_4] : memref<1x128xf32, #tpu.memory_space<vmem>>, vector<1x128xf32>
    %4 = vector.broadcast %3 : vector<1x128xf32> to vector<16x128xf32>
    %5 = arith.addf %2, %4 : vector<16x128xf32>
    %c0_5 = arith.constant 0 : index
    %c0_6 = arith.constant 0 : index
    %6 = vector.load %arg14[%c0_5, %c0_6] : memref<16x128xf32, #tpu.memory_space<vmem>>, vector<16x128xf32>
    tpu.vector_store %arg14[%c0_5, %c0_6], %5 {strides = array<i32>} : memref<16x128xf32, #tpu.memory_space<vmem>>, vector<16x128xf32>,
    %c0_7 = arith.constant 0 : index
    %c0_8 = arith.constant 0 : index
    %7 = vector.load %arg3[%c0_7, %c0_8] : memref<32x128xf32, #tpu.memory_space<vmem>>, vector<32x128xf32>
    %c0_9 = arith.constant 0 : index
    %c0_10 = arith.constant 0 : index
    %8 = vector.load %arg5[%c0_9, %c0_10] : memref<32x128xf32, #tpu.memory_space<vmem>>, vector<32x128xf32>
    %c0_11 = arith.constant 0 : index
    %c0_12 = arith.constant 0 : index
    %9 = vector.load %arg6[%c0_11, %c0_12] : memref<32x128xf32, #tpu.memory_space<vmem>>, vector<32x128xf32>
    %c0_13 = arith.constant 0 : index
    %c0_14 = arith.constant 0 : index
    %10 = vector.load %arg8[%c0_13, %c0_14] : memref<32x128xf32, #tpu.memory_space<vmem>>, vector<32x128xf32>
    %c0_15 = arith.constant 0 : index
    %c0_16 = arith.constant 0 : index
    %11 = vector.load %arg9[%c0_15, %c0_16] : memref<32x128xf32, #tpu.memory_space<vmem>>, vector<32x128xf32>
    %c0_17 = arith.constant 0 : index
    %c0_18 = arith.constant 0 : index
    %12 = vector.load %arg7[%c0_17, %c0_18] : memref<1x128xf32, #tpu.memory_space<vmem>>, vector<1x128xf32>
    %13 = vector.shape_cast %12 : vector<1x128xf32> to vector<1x128xf32>
    %14 = vector.broadcast %13 : vector<1x128xf32> to vector<2x128xf32>
    %c0_19 = arith.constant 0 : index
    %c0_20 = arith.constant 0 : index
    %15 = vector.load %arg10[%c0_19, %c0_20] : memref<1x128xf32, #tpu.memory_space<vmem>>, vector<1x128xf32>
    %16 = vector.shape_cast %15 : vector<1x128xf32> to vector<1x128xf32>
    %17 = vector.broadcast %16 : vector<1x128xf32> to vector<2x128xf32>
    %cst_21 = arith.constant 0.000000e+00 : f32
    %18 = vector.broadcast %cst_21 : f32 to vector<2x32xf32>
    %c0_i32 = arith.constant 0 : i32
    %c2_i32 = arith.constant 2 : i32
    %19 = arith.muli %c0_i32, %c2_i32 : i32
    %20 = tpu.assume_multiple %19, 2 : i32
    %21 = arith.index_cast %20 : i32 to index
    %c0_22 = arith.constant 0 : index
    %22 = vector.load %arg14[%21, %c0_22] : memref<16x128xf32, #tpu.memory_space<vmem>>, vector<2x128xf32>
    %cst_23 = arith.constant dense<0.000000e+00> : vector<2x128xf32>
    %23 = tpu.matmul %18, %7, %cst_23 {dimension_numbers = #tpu.dot_dimension_numbers<[1], [0], [0], [1], [0, 0, 1, 1], [], []>} : vector<2x32xf32>, vector<32x128xf32>, vector<2x128xf32> -> vector<2x128xf32>
    %24 = arith.addf %22, %23 : vector<2x128xf32>
    %25 = arith.negf %24 : vector<2x128xf32>
    %26 = math.exp %25 : vector<2x128xf32>
    %cst_24 = arith.constant 1.000000e+00 : f32
    %27 = vector.broadcast %cst_24 : f32 to vector<2x128xf32>
    %28 = arith.addf %27, %26 : vector<2x128xf32>
    %29 = arith.divf %27, %28 : vector<2x128xf32>
    %30 = math.tanh %24 : vector<2x128xf32>
    %31 = vector.extract_strided_slice %29 {offsets = [0, 0], sizes = [2, 32], strides = [1, 1]} : vector<2x128xf32> to vector<2x32xf32>
    %32 = vector.extract_strided_slice %29 {offsets = [0, 32], sizes = [2, 32], strides = [1, 1]} : vector<2x128xf32> to vector<2x32xf32>
    %33 = vector.extract_strided_slice %30 {offsets = [0, 64], sizes = [2, 32], strides = [1, 1]} : vector<2x128xf32> to vector<2x32xf32>
    %34 = vector.extract_strided_slice %29 {offsets = [0, 96], sizes = [2, 32], strides = [1, 1]} : vector<2x128xf32> to vector<2x32xf32>
    %35 = arith.mulf %32, %18 : vector<2x32xf32>
    %36 = arith.mulf %31, %33 : vector<2x32xf32>
    %37 = arith.addf %35, %36 : vector<2x32xf32>
    %38 = math.tanh %37 : vector<2x32xf32>
    %39 = arith.mulf %34, %38 : vector<2x32xf32>
    %cst_25 = arith.constant dense<0.000000e+00> : vector<2x128xf32>
    %40 = tpu.matmul %39, %8, %cst_25 {dimension_numbers = #tpu.dot_dimension_numbers<[1], [0], [0], [1], [0, 0, 1, 1], [], []>} : vector<2x32xf32>, vector<32x128xf32>, vector<2x128xf32> -> vector<2x128xf32>
    %cst_26 = arith.constant dense<0.000000e+00> : vector<2x128xf32>
    %41 = tpu.matmul %18, %9, %cst_26 {dimension_numbers = #tpu.dot_dimension_numbers<[1], [0], [0], [1], [0, 0, 1, 1], [], []>} : vector<2x32xf32>, vector<32x128xf32>, vector<2x128xf32> -> vector<2x128xf32>
    %42 = arith.addf %40, %41 : vector<2x128xf32>
    %43 = arith.addf %42, %14 : vector<2x128xf32>
    %44 = arith.negf %43 : vector<2x128xf32>
    %45 = math.exp %44 : vector<2x128xf32>
    %cst_27 = arith.constant 1.000000e+00 : f32
    %46 = vector.broadcast %cst_27 : f32 to vector<2x128xf32>
    %47 = arith.addf %46, %45 : vector<2x128xf32>
    %48 = arith.divf %46, %47 : vector<2x128xf32>
    %49 = math.tanh %43 : vector<2x128xf32>
    %50 = vector.extract_strided_slice %48 {offsets = [0, 0], sizes = [2, 32], strides = [1, 1]} : vector<2x128xf32> to vector<2x32xf32>
    %51 = vector.extract_strided_slice %48 {offsets = [0, 32], sizes = [2, 32], strides = [1, 1]} : vector<2x128xf32> to vector<2x32xf32>
    %52 = vector.extract_strided_slice %49 {offsets = [0, 64], sizes = [2, 32], strides = [1, 1]} : vector<2x128xf32> to vector<2x32xf32>
    %53 = vector.extract_strided_slice %48 {offsets = [0, 96], sizes = [2, 32], strides = [1, 1]} : vector<2x128xf32> to vector<2x32xf32>
    %54 = arith.mulf %51, %18 : vector<2x32xf32>
    %55 = arith.mulf %50, %52 : vector<2x32xf32>
    %56 = arith.addf %54, %55 : vector<2x32xf32>
    %57 = math.tanh %56 : vector<2x32xf32>
    %58 = arith.mulf %53, %57 : vector<2x32xf32>
    %cst_28 = arith.constant dense<0.000000e+00> : vector<2x128xf32>
    %59 = tpu.matmul %58, %10, %cst_28 {dimension_numbers = #tpu.dot_dimension_numbers<[1], [0], [0], [1], [0, 0, 1, 1], [], []>} : vector<2x32xf32>, vector<32x128xf32>, vector<2x128xf32> -> vector<2x128xf32>
    %cst_29 = arith.constant dense<0.000000e+00> : vector<2x128xf32>
    %60 = tpu.matmul %18, %11, %cst_29 {dimension_numbers = #tpu.dot_dimension_numbers<[1], [0], [0], [1], [0, 0, 1, 1], [], []>} : vector<2x32xf32>, vector<32x128xf32>, vector<2x128xf32> -> vector<2x128xf32>
    %61 = arith.addf %59, %60 : vector<2x128xf32>
    %62 = arith.addf %61, %17 : vector<2x128xf32>
    %63 = arith.negf %62 : vector<2x128xf32>
    %64 = math.exp %63 : vector<2x128xf32>
    %cst_30 = arith.constant 1.000000e+00 : f32
    %65 = vector.broadcast %cst_30 : f32 to vector<2x128xf32>
    %66 = arith.addf %65, %64 : vector<2x128xf32>
    %67 = arith.divf %65, %66 : vector<2x128xf32>
    %68 = math.tanh %62 : vector<2x128xf32>
    %69 = vector.extract_strided_slice %67 {offsets = [0, 0], sizes = [2, 32], strides = [1, 1]} : vector<2x128xf32> to vector<2x32xf32>
    %70 = vector.extract_strided_slice %67 {offsets = [0, 32], sizes = [2, 32], strides = [1, 1]} : vector<2x128xf32> to vector<2x32xf32>
    %71 = vector.extract_strided_slice %68 {offsets = [0, 64], sizes = [2, 32], strides = [1, 1]} : vector<2x128xf32> to vector<2x32xf32>
    %72 = vector.extract_strided_slice %67 {offsets = [0, 96], sizes = [2, 32], strides = [1, 1]} : vector<2x128xf32> to vector<2x32xf32>
    %73 = arith.mulf %70, %18 : vector<2x32xf32>
    %74 = arith.mulf %69, %71 : vector<2x32xf32>
    %75 = arith.addf %73, %74 : vector<2x32xf32>
    %76 = math.tanh %75 : vector<2x32xf32>
    %77 = arith.mulf %72, %76 : vector<2x32xf32>
    %78 = arith.index_cast %20 : i32 to index
    %c0_31 = arith.constant 0 : index
    %79 = vector.load %arg15[%78, %c0_31] : memref<16x32xf32, #tpu.memory_space<vmem>>, vector<2x32xf32>
    tpu.vector_store %arg15[%78, %c0_31], %77 {strides = array<i32>} : memref<16x32xf32, #tpu.memory_space<vmem>>, vector<2x32xf32>,
    %c1_i32 = arith.constant 1 : i32
    %c2_i32_32 = arith.constant 2 : i32
    %80 = arith.muli %c1_i32, %c2_i32_32 : i32
    %81 = tpu.assume_multiple %80, 2 : i32
    %82 = arith.index_cast %81 : i32 to index
    %c0_33 = arith.constant 0 : index
    %83 = vector.load %arg14[%82, %c0_33] : memref<16x128xf32, #tpu.memory_space<vmem>>, vector<2x128xf32>
    %cst_34 = arith.constant dense<0.000000e+00> : vector<2x128xf32>
    %84 = tpu.matmul %39, %7, %cst_34 {dimension_numbers = #tpu.dot_dimension_numbers<[1], [0], [0], [1], [0, 0, 1, 1], [], []>} : vector<2x32xf32>, vector<32x128xf32>, vector<2x128xf32> -> vector<2x128xf32>
    %85 = arith.addf %83, %84 : vector<2x128xf32>
    %86 = arith.negf %85 : vector<2x128xf32>
    %87 = math.exp %86 : vector<2x128xf32>
    %cst_35 = arith.constant 1.000000e+00 : f32
    %88 = vector.broadcast %cst_35 : f32 to vector<2x128xf32>
    %89 = arith.addf %88, %87 : vector<2x128xf32>
    %90 = arith.divf %88, %89 : vector<2x128xf32>
    %91 = math.tanh %85 : vector<2x128xf32>
    %92 = vector.extract_strided_slice %90 {offsets = [0, 0], sizes = [2, 32], strides = [1, 1]} : vector<2x128xf32> to vector<2x32xf32>
    %93 = vector.extract_strided_slice %90 {offsets = [0, 32], sizes = [2, 32], strides = [1, 1]} : vector<2x128xf32> to vector<2x32xf32>
    %94 = vector.extract_strided_slice %91 {offsets = [0, 64], sizes = [2, 32], strides = [1, 1]} : vector<2x128xf32> to vector<2x32xf32>
    %95 = vector.extract_strided_slice %90 {offsets = [0, 96], sizes = [2, 32], strides = [1, 1]} : vector<2x128xf32> to vector<2x32xf32>
    %96 = arith.mulf %93, %37 : vector<2x32xf32>
    %97 = arith.mulf %92, %94 : vector<2x32xf32>
    %98 = arith.addf %96, %97 : vector<2x32xf32>
    %99 = math.tanh %98 : vector<2x32xf32>
    %100 = arith.mulf %95, %99 : vector<2x32xf32>
    %cst_36 = arith.constant dense<0.000000e+00> : vector<2x128xf32>
    %101 = tpu.matmul %100, %8, %cst_36 {dimension_numbers = #tpu.dot_dimension_numbers<[1], [0], [0], [1], [0, 0, 1, 1], [], []>} : vector<2x32xf32>, vector<32x128xf32>, vector<2x128xf32> -> vector<2x128xf32>
    %cst_37 = arith.constant dense<0.000000e+00> : vector<2x128xf32>
    %102 = tpu.matmul %58, %9, %cst_37 {dimension_numbers = #tpu.dot_dimension_numbers<[1], [0], [0], [1], [0, 0, 1, 1], [], []>} : vector<2x32xf32>, vector<32x128xf32>, vector<2x128xf32> -> vector<2x128xf32>
    %103 = arith.addf %101, %102 : vector<2x128xf32>
    %104 = arith.addf %103, %14 : vector<2x128xf32>
    %105 = arith.negf %104 : vector<2x128xf32>
    %106 = math.exp %105 : vector<2x128xf32>
    %cst_38 = arith.constant 1.000000e+00 : f32
    %107 = vector.broadcast %cst_38 : f32 to vector<2x128xf32>
    %108 = arith.addf %107, %106 : vector<2x128xf32>
    %109 = arith.divf %107, %108 : vector<2x128xf32>
    %110 = math.tanh %104 : vector<2x128xf32>
    %111 = vector.extract_strided_slice %109 {offsets = [0, 0], sizes = [2, 32], strides = [1, 1]} : vector<2x128xf32> to vector<2x32xf32>
    %112 = vector.extract_strided_slice %109 {offsets = [0, 32], sizes = [2, 32], strides = [1, 1]} : vector<2x128xf32> to vector<2x32xf32>
    %113 = vector.extract_strided_slice %110 {offsets = [0, 64], sizes = [2, 32], strides = [1, 1]} : vector<2x128xf32> to vector<2x32xf32>
    %114 = vector.extract_strided_slice %109 {offsets = [0, 96], sizes = [2, 32], strides = [1, 1]} : vector<2x128xf32> to vector<2x32xf32>
    %115 = arith.mulf %112, %56 : vector<2x32xf32>
    %116 = arith.mulf %111, %113 : vector<2x32xf32>
    %117 = arith.addf %115, %116 : vector<2x32xf32>
    %118 = math.tanh %117 : vector<2x32xf32>
    %119 = arith.mulf %114, %118 : vector<2x32xf32>
    %cst_39 = arith.constant dense<0.000000e+00> : vector<2x128xf32>
    %120 = tpu.matmul %119, %10, %cst_39 {dimension_numbers = #tpu.dot_dimension_numbers<[1], [0], [0], [1], [0, 0, 1, 1], [], []>} : vector<2x32xf32>, vector<32x128xf32>, vector<2x128xf32> -> vector<2x128xf32>
    %cst_40 = arith.constant dense<0.000000e+00> : vector<2x128xf32>
    %121 = tpu.matmul %77, %11, %cst_40 {dimension_numbers = #tpu.dot_dimension_numbers<[1], [0], [0], [1], [0, 0, 1, 1], [], []>} : vector<2x32xf32>, vector<32x128xf32>, vector<2x128xf32> -> vector<2x128xf32>
    %122 = arith.addf %120, %121 : vector<2x128xf32>
    %123 = arith.addf %122, %17 : vector<2x128xf32>
    %124 = arith.negf %123 : vector<2x128xf32>
    %125 = math.exp %124 : vector<2x128xf32>
    %cst_41 = arith.constant 1.000000e+00 : f32
    %126 = vector.broadcast %cst_41 : f32 to vector<2x128xf32>
    %127 = arith.addf %126, %125 : vector<2x128xf32>
    %128 = arith.divf %126, %127 : vector<2x128xf32>
    %129 = math.tanh %123 : vector<2x128xf32>
    %130 = vector.extract_strided_slice %128 {offsets = [0, 0], sizes = [2, 32], strides = [1, 1]} : vector<2x128xf32> to vector<2x32xf32>
    %131 = vector.extract_strided_slice %128 {offsets = [0, 32], sizes = [2, 32], strides = [1, 1]} : vector<2x128xf32> to vector<2x32xf32>
    %132 = vector.extract_strided_slice %129 {offsets = [0, 64], sizes = [2, 32], strides = [1, 1]} : vector<2x128xf32> to vector<2x32xf32>
    %133 = vector.extract_strided_slice %128 {offsets = [0, 96], sizes = [2, 32], strides = [1, 1]} : vector<2x128xf32> to vector<2x32xf32>
    %134 = arith.mulf %131, %75 : vector<2x32xf32>
    %135 = arith.mulf %130, %132 : vector<2x32xf32>
    %136 = arith.addf %134, %135 : vector<2x32xf32>
    %137 = math.tanh %136 : vector<2x32xf32>
    %138 = arith.mulf %133, %137 : vector<2x32xf32>
    %139 = arith.index_cast %81 : i32 to index
    %c0_42 = arith.constant 0 : index
    %140 = vector.load %arg15[%139, %c0_42] : memref<16x32xf32, #tpu.memory_space<vmem>>, vector<2x32xf32>
    tpu.vector_store %arg15[%139, %c0_42], %138 {strides = array<i32>} : memref<16x32xf32, #tpu.memory_space<vmem>>, vector<2x32xf32>,
    %c2_i32_43 = arith.constant 2 : i32
    %c2_i32_44 = arith.constant 2 : i32
    %141 = arith.muli %c2_i32_43, %c2_i32_44 : i32
    %142 = tpu.assume_multiple %141, 2 : i32
    %143 = arith.index_cast %142 : i32 to index
    %c0_45 = arith.constant 0 : index
    %144 = vector.load %arg14[%143, %c0_45] : memref<16x128xf32, #tpu.memory_space<vmem>>, vector<2x128xf32>
    %cst_46 = arith.constant dense<0.000000e+00> : vector<2x128xf32>
    %145 = tpu.matmul %100, %7, %cst_46 {dimension_numbers = #tpu.dot_dimension_numbers<[1], [0], [0], [1], [0, 0, 1, 1], [], []>} : vector<2x32xf32>, vector<32x128xf32>, vector<2x128xf32> -> vector<2x128xf32>
    %146 = arith.addf %144, %145 : vector<2x128xf32>
    %147 = arith.negf %146 : vector<2x128xf32>
    %148 = math.exp %147 : vector<2x128xf32>
    %cst_47 = arith.constant 1.000000e+00 : f32
    %149 = vector.broadcast %cst_47 : f32 to vector<2x128xf32>
    %150 = arith.addf %149, %148 : vector<2x128xf32>
    %151 = arith.divf %149, %150 : vector<2x128xf32>
    %152 = math.tanh %146 : vector<2x128xf32>
    %153 = vector.extract_strided_slice %151 {offsets = [0, 0], sizes = [2, 32], strides = [1, 1]} : vector<2x128xf32> to vector<2x32xf32>
    %154 = vector.extract_strided_slice %151 {offsets = [0, 32], sizes = [2, 32], strides = [1, 1]} : vector<2x128xf32> to vector<2x32xf32>
    %155 = vector.extract_strided_slice %152 {offsets = [0, 64], sizes = [2, 32], strides = [1, 1]} : vector<2x128xf32> to vector<2x32xf32>
    %156 = vector.extract_strided_slice %151 {offsets = [0, 96], sizes = [2, 32], strides = [1, 1]} : vector<2x128xf32> to vector<2x32xf32>
    %157 = arith.mulf %154, %98 : vector<2x32xf32>
    %158 = arith.mulf %153, %155 : vector<2x32xf32>
    %159 = arith.addf %157, %158 : vector<2x32xf32>
    %160 = math.tanh %159 : vector<2x32xf32>
    %161 = arith.mulf %156, %160 : vector<2x32xf32>
    %cst_48 = arith.constant dense<0.000000e+00> : vector<2x128xf32>
    %162 = tpu.matmul %161, %8, %cst_48 {dimension_numbers = #tpu.dot_dimension_numbers<[1], [0], [0], [1], [0, 0, 1, 1], [], []>} : vector<2x32xf32>, vector<32x128xf32>, vector<2x128xf32> -> vector<2x128xf32>
    %cst_49 = arith.constant dense<0.000000e+00> : vector<2x128xf32>
    %163 = tpu.matmul %119, %9, %cst_49 {dimension_numbers = #tpu.dot_dimension_numbers<[1], [0], [0], [1], [0, 0, 1, 1], [], []>} : vector<2x32xf32>, vector<32x128xf32>, vector<2x128xf32> -> vector<2x128xf32>
    %164 = arith.addf %162, %163 : vector<2x128xf32>
    %165 = arith.addf %164, %14 : vector<2x128xf32>
    %166 = arith.negf %165 : vector<2x128xf32>
    %167 = math.exp %166 : vector<2x128xf32>
    %cst_50 = arith.constant 1.000000e+00 : f32
    %168 = vector.broadcast %cst_50 : f32 to vector<2x128xf32>
    %169 = arith.addf %168, %167 : vector<2x128xf32>
    %170 = arith.divf %168, %169 : vector<2x128xf32>
    %171 = math.tanh %165 : vector<2x128xf32>
    %172 = vector.extract_strided_slice %170 {offsets = [0, 0], sizes = [2, 32], strides = [1, 1]} : vector<2x128xf32> to vector<2x32xf32>
    %173 = vector.extract_strided_slice %170 {offsets = [0, 32], sizes = [2, 32], strides = [1, 1]} : vector<2x128xf32> to vector<2x32xf32>
    %174 = vector.extract_strided_slice %171 {offsets = [0, 64], sizes = [2, 32], strides = [1, 1]} : vector<2x128xf32> to vector<2x32xf32>
    %175 = vector.extract_strided_slice %170 {offsets = [0, 96], sizes = [2, 32], strides = [1, 1]} : vector<2x128xf32> to vector<2x32xf32>
    %176 = arith.mulf %173, %117 : vector<2x32xf32>
    %177 = arith.mulf %172, %174 : vector<2x32xf32>
    %178 = arith.addf %176, %177 : vector<2x32xf32>
    %179 = math.tanh %178 : vector<2x32xf32>
    %180 = arith.mulf %175, %179 : vector<2x32xf32>
    %cst_51 = arith.constant dense<0.000000e+00> : vector<2x128xf32>
    %181 = tpu.matmul %180, %10, %cst_51 {dimension_numbers = #tpu.dot_dimension_numbers<[1], [0], [0], [1], [0, 0, 1, 1], [], []>} : vector<2x32xf32>, vector<32x128xf32>, vector<2x128xf32> -> vector<2x128xf32>
    %cst_52 = arith.constant dense<0.000000e+00> : vector<2x128xf32>
    %182 = tpu.matmul %138, %11, %cst_52 {dimension_numbers = #tpu.dot_dimension_numbers<[1], [0], [0], [1], [0, 0, 1, 1], [], []>} : vector<2x32xf32>, vector<32x128xf32>, vector<2x128xf32> -> vector<2x128xf32>
    %183 = arith.addf %181, %182 : vector<2x128xf32>
    %184 = arith.addf %183, %17 : vector<2x128xf32>
    %185 = arith.negf %184 : vector<2x128xf32>
    %186 = math.exp %185 : vector<2x128xf32>
    %cst_53 = arith.constant 1.000000e+00 : f32
    %187 = vector.broadcast %cst_53 : f32 to vector<2x128xf32>
    %188 = arith.addf %187, %186 : vector<2x128xf32>
    %189 = arith.divf %187, %188 : vector<2x128xf32>
    %190 = math.tanh %184 : vector<2x128xf32>
    %191 = vector.extract_strided_slice %189 {offsets = [0, 0], sizes = [2, 32], strides = [1, 1]} : vector<2x128xf32> to vector<2x32xf32>
    %192 = vector.extract_strided_slice %189 {offsets = [0, 32], sizes = [2, 32], strides = [1, 1]} : vector<2x128xf32> to vector<2x32xf32>
    %193 = vector.extract_strided_slice %190 {offsets = [0, 64], sizes = [2, 32], strides = [1, 1]} : vector<2x128xf32> to vector<2x32xf32>
    %194 = vector.extract_strided_slice %189 {offsets = [0, 96], sizes = [2, 32], strides = [1, 1]} : vector<2x128xf32> to vector<2x32xf32>
    %195 = arith.mulf %192, %136 : vector<2x32xf32>
    %196 = arith.mulf %191, %193 : vector<2x32xf32>
    %197 = arith.addf %195, %196 : vector<2x32xf32>
    %198 = math.tanh %197 : vector<2x32xf32>
    %199 = arith.mulf %194, %198 : vector<2x32xf32>
    %200 = arith.index_cast %142 : i32 to index
    %c0_54 = arith.constant 0 : index
    %201 = vector.load %arg15[%200, %c0_54] : memref<16x32xf32, #tpu.memory_space<vmem>>, vector<2x32xf32>
    tpu.vector_store %arg15[%200, %c0_54], %199 {strides = array<i32>} : memref<16x32xf32, #tpu.memory_space<vmem>>, vector<2x32xf32>,
    %c3_i32 = arith.constant 3 : i32
    %c2_i32_55 = arith.constant 2 : i32
    %202 = arith.muli %c3_i32, %c2_i32_55 : i32
    %203 = tpu.assume_multiple %202, 2 : i32
    %204 = arith.index_cast %203 : i32 to index
    %c0_56 = arith.constant 0 : index
    %205 = vector.load %arg14[%204, %c0_56] : memref<16x128xf32, #tpu.memory_space<vmem>>, vector<2x128xf32>
    %cst_57 = arith.constant dense<0.000000e+00> : vector<2x128xf32>
    %206 = tpu.matmul %161, %7, %cst_57 {dimension_numbers = #tpu.dot_dimension_numbers<[1], [0], [0], [1], [0, 0, 1, 1], [], []>} : vector<2x32xf32>, vector<32x128xf32>, vector<2x128xf32> -> vector<2x128xf32>
    %207 = arith.addf %205, %206 : vector<2x128xf32>
    %208 = arith.negf %207 : vector<2x128xf32>
    %209 = math.exp %208 : vector<2x128xf32>
    %cst_58 = arith.constant 1.000000e+00 : f32
    %210 = vector.broadcast %cst_58 : f32 to vector<2x128xf32>
    %211 = arith.addf %210, %209 : vector<2x128xf32>
    %212 = arith.divf %210, %211 : vector<2x128xf32>
    %213 = math.tanh %207 : vector<2x128xf32>
    %214 = vector.extract_strided_slice %212 {offsets = [0, 0], sizes = [2, 32], strides = [1, 1]} : vector<2x128xf32> to vector<2x32xf32>
    %215 = vector.extract_strided_slice %212 {offsets = [0, 32], sizes = [2, 32], strides = [1, 1]} : vector<2x128xf32> to vector<2x32xf32>
    %216 = vector.extract_strided_slice %213 {offsets = [0, 64], sizes = [2, 32], strides = [1, 1]} : vector<2x128xf32> to vector<2x32xf32>
    %217 = vector.extract_strided_slice %212 {offsets = [0, 96], sizes = [2, 32], strides = [1, 1]} : vector<2x128xf32> to vector<2x32xf32>
    %218 = arith.mulf %215, %159 : vector<2x32xf32>
    %219 = arith.mulf %214, %216 : vector<2x32xf32>
    %220 = arith.addf %218, %219 : vector<2x32xf32>
    %221 = math.tanh %220 : vector<2x32xf32>
    %222 = arith.mulf %217, %221 : vector<2x32xf32>
    %cst_59 = arith.constant dense<0.000000e+00> : vector<2x128xf32>
    %223 = tpu.matmul %222, %8, %cst_59 {dimension_numbers = #tpu.dot_dimension_numbers<[1], [0], [0], [1], [0, 0, 1, 1], [], []>} : vector<2x32xf32>, vector<32x128xf32>, vector<2x128xf32> -> vector<2x128xf32>
    %cst_60 = arith.constant dense<0.000000e+00> : vector<2x128xf32>
    %224 = tpu.matmul %180, %9, %cst_60 {dimension_numbers = #tpu.dot_dimension_numbers<[1], [0], [0], [1], [0, 0, 1, 1], [], []>} : vector<2x32xf32>, vector<32x128xf32>, vector<2x128xf32> -> vector<2x128xf32>
    %225 = arith.addf %223, %224 : vector<2x128xf32>
    %226 = arith.addf %225, %14 : vector<2x128xf32>
    %227 = arith.negf %226 : vector<2x128xf32>
    %228 = math.exp %227 : vector<2x128xf32>
    %cst_61 = arith.constant 1.000000e+00 : f32
    %229 = vector.broadcast %cst_61 : f32 to vector<2x128xf32>
    %230 = arith.addf %229, %228 : vector<2x128xf32>
    %231 = arith.divf %229, %230 : vector<2x128xf32>
    %232 = math.tanh %226 : vector<2x128xf32>
    %233 = vector.extract_strided_slice %231 {offsets = [0, 0], sizes = [2, 32], strides = [1, 1]} : vector<2x128xf32> to vector<2x32xf32>
    %234 = vector.extract_strided_slice %231 {offsets = [0, 32], sizes = [2, 32], strides = [1, 1]} : vector<2x128xf32> to vector<2x32xf32>
    %235 = vector.extract_strided_slice %232 {offsets = [0, 64], sizes = [2, 32], strides = [1, 1]} : vector<2x128xf32> to vector<2x32xf32>
    %236 = vector.extract_strided_slice %231 {offsets = [0, 96], sizes = [2, 32], strides = [1, 1]} : vector<2x128xf32> to vector<2x32xf32>
    %237 = arith.mulf %234, %178 : vector<2x32xf32>
    %238 = arith.mulf %233, %235 : vector<2x32xf32>
    %239 = arith.addf %237, %238 : vector<2x32xf32>
    %240 = math.tanh %239 : vector<2x32xf32>
    %241 = arith.mulf %236, %240 : vector<2x32xf32>
    %cst_62 = arith.constant dense<0.000000e+00> : vector<2x128xf32>
    %242 = tpu.matmul %241, %10, %cst_62 {dimension_numbers = #tpu.dot_dimension_numbers<[1], [0], [0], [1], [0, 0, 1, 1], [], []>} : vector<2x32xf32>, vector<32x128xf32>, vector<2x128xf32> -> vector<2x128xf32>
    %cst_63 = arith.constant dense<0.000000e+00> : vector<2x128xf32>
    %243 = tpu.matmul %199, %11, %cst_63 {dimension_numbers = #tpu.dot_dimension_numbers<[1], [0], [0], [1], [0, 0, 1, 1], [], []>} : vector<2x32xf32>, vector<32x128xf32>, vector<2x128xf32> -> vector<2x128xf32>
    %244 = arith.addf %242, %243 : vector<2x128xf32>
    %245 = arith.addf %244, %17 : vector<2x128xf32>
    %246 = arith.negf %245 : vector<2x128xf32>
    %247 = math.exp %246 : vector<2x128xf32>
    %cst_64 = arith.constant 1.000000e+00 : f32
    %248 = vector.broadcast %cst_64 : f32 to vector<2x128xf32>
    %249 = arith.addf %248, %247 : vector<2x128xf32>
    %250 = arith.divf %248, %249 : vector<2x128xf32>
    %251 = math.tanh %245 : vector<2x128xf32>
    %252 = vector.extract_strided_slice %250 {offsets = [0, 0], sizes = [2, 32], strides = [1, 1]} : vector<2x128xf32> to vector<2x32xf32>
    %253 = vector.extract_strided_slice %250 {offsets = [0, 32], sizes = [2, 32], strides = [1, 1]} : vector<2x128xf32> to vector<2x32xf32>
    %254 = vector.extract_strided_slice %251 {offsets = [0, 64], sizes = [2, 32], strides = [1, 1]} : vector<2x128xf32> to vector<2x32xf32>
    %255 = vector.extract_strided_slice %250 {offsets = [0, 96], sizes = [2, 32], strides = [1, 1]} : vector<2x128xf32> to vector<2x32xf32>
    %256 = arith.mulf %253, %197 : vector<2x32xf32>
    %257 = arith.mulf %252, %254 : vector<2x32xf32>
    %258 = arith.addf %256, %257 : vector<2x32xf32>
    %259 = math.tanh %258 : vector<2x32xf32>
    %260 = arith.mulf %255, %259 : vector<2x32xf32>
    %261 = arith.index_cast %203 : i32 to index
    %c0_65 = arith.constant 0 : index
    %262 = vector.load %arg15[%261, %c0_65] : memref<16x32xf32, #tpu.memory_space<vmem>>, vector<2x32xf32>
    tpu.vector_store %arg15[%261, %c0_65], %260 {strides = array<i32>} : memref<16x32xf32, #tpu.memory_space<vmem>>, vector<2x32xf32>,
    %c4_i32 = arith.constant 4 : i32
    %c2_i32_66 = arith.constant 2 : i32
    %263 = arith.muli %c4_i32, %c2_i32_66 : i32
    %264 = tpu.assume_multiple %263, 2 : i32
    %265 = arith.index_cast %264 : i32 to index
    %c0_67 = arith.constant 0 : index
    %266 = vector.load %arg14[%265, %c0_67] : memref<16x128xf32, #tpu.memory_space<vmem>>, vector<2x128xf32>
    %cst_68 = arith.constant dense<0.000000e+00> : vector<2x128xf32>
    %267 = tpu.matmul %222, %7, %cst_68 {dimension_numbers = #tpu.dot_dimension_numbers<[1], [0], [0], [1], [0, 0, 1, 1], [], []>} : vector<2x32xf32>, vector<32x128xf32>, vector<2x128xf32> -> vector<2x128xf32>
    %268 = arith.addf %266, %267 : vector<2x128xf32>
    %269 = arith.negf %268 : vector<2x128xf32>
    %270 = math.exp %269 : vector<2x128xf32>
    %cst_69 = arith.constant 1.000000e+00 : f32
    %271 = vector.broadcast %cst_69 : f32 to vector<2x128xf32>
    %272 = arith.addf %271, %270 : vector<2x128xf32>
    %273 = arith.divf %271, %272 : vector<2x128xf32>
    %274 = math.tanh %268 : vector<2x128xf32>
    %275 = vector.extract_strided_slice %273 {offsets = [0, 0], sizes = [2, 32], strides = [1, 1]} : vector<2x128xf32> to vector<2x32xf32>
    %276 = vector.extract_strided_slice %273 {offsets = [0, 32], sizes = [2, 32], strides = [1, 1]} : vector<2x128xf32> to vector<2x32xf32>
    %277 = vector.extract_strided_slice %274 {offsets = [0, 64], sizes = [2, 32], strides = [1, 1]} : vector<2x128xf32> to vector<2x32xf32>
    %278 = vector.extract_strided_slice %273 {offsets = [0, 96], sizes = [2, 32], strides = [1, 1]} : vector<2x128xf32> to vector<2x32xf32>
    %279 = arith.mulf %276, %220 : vector<2x32xf32>
    %280 = arith.mulf %275, %277 : vector<2x32xf32>
    %281 = arith.addf %279, %280 : vector<2x32xf32>
    %282 = math.tanh %281 : vector<2x32xf32>
    %283 = arith.mulf %278, %282 : vector<2x32xf32>
    %cst_70 = arith.constant dense<0.000000e+00> : vector<2x128xf32>
    %284 = tpu.matmul %283, %8, %cst_70 {dimension_numbers = #tpu.dot_dimension_numbers<[1], [0], [0], [1], [0, 0, 1, 1], [], []>} : vector<2x32xf32>, vector<32x128xf32>, vector<2x128xf32> -> vector<2x128xf32>
    %cst_71 = arith.constant dense<0.000000e+00> : vector<2x128xf32>
    %285 = tpu.matmul %241, %9, %cst_71 {dimension_numbers = #tpu.dot_dimension_numbers<[1], [0], [0], [1], [0, 0, 1, 1], [], []>} : vector<2x32xf32>, vector<32x128xf32>, vector<2x128xf32> -> vector<2x128xf32>
    %286 = arith.addf %284, %285 : vector<2x128xf32>
    %287 = arith.addf %286, %14 : vector<2x128xf32>
    %288 = arith.negf %287 : vector<2x128xf32>
    %289 = math.exp %288 : vector<2x128xf32>
    %cst_72 = arith.constant 1.000000e+00 : f32
    %290 = vector.broadcast %cst_72 : f32 to vector<2x128xf32>
    %291 = arith.addf %290, %289 : vector<2x128xf32>
    %292 = arith.divf %290, %291 : vector<2x128xf32>
    %293 = math.tanh %287 : vector<2x128xf32>
    %294 = vector.extract_strided_slice %292 {offsets = [0, 0], sizes = [2, 32], strides = [1, 1]} : vector<2x128xf32> to vector<2x32xf32>
    %295 = vector.extract_strided_slice %292 {offsets = [0, 32], sizes = [2, 32], strides = [1, 1]} : vector<2x128xf32> to vector<2x32xf32>
    %296 = vector.extract_strided_slice %293 {offsets = [0, 64], sizes = [2, 32], strides = [1, 1]} : vector<2x128xf32> to vector<2x32xf32>
    %297 = vector.extract_strided_slice %292 {offsets = [0, 96], sizes = [2, 32], strides = [1, 1]} : vector<2x128xf32> to vector<2x32xf32>
    %298 = arith.mulf %295, %239 : vector<2x32xf32>
    %299 = arith.mulf %294, %296 : vector<2x32xf32>
    %300 = arith.addf %298, %299 : vector<2x32xf32>
    %301 = math.tanh %300 : vector<2x32xf32>
    %302 = arith.mulf %297, %301 : vector<2x32xf32>
    %cst_73 = arith.constant dense<0.000000e+00> : vector<2x128xf32>
    %303 = tpu.matmul %302, %10, %cst_73 {dimension_numbers = #tpu.dot_dimension_numbers<[1], [0], [0], [1], [0, 0, 1, 1], [], []>} : vector<2x32xf32>, vector<32x128xf32>, vector<2x128xf32> -> vector<2x128xf32>
    %cst_74 = arith.constant dense<0.000000e+00> : vector<2x128xf32>
    %304 = tpu.matmul %260, %11, %cst_74 {dimension_numbers = #tpu.dot_dimension_numbers<[1], [0], [0], [1], [0, 0, 1, 1], [], []>} : vector<2x32xf32>, vector<32x128xf32>, vector<2x128xf32> -> vector<2x128xf32>
    %305 = arith.addf %303, %304 : vector<2x128xf32>
    %306 = arith.addf %305, %17 : vector<2x128xf32>
    %307 = arith.negf %306 : vector<2x128xf32>
    %308 = math.exp %307 : vector<2x128xf32>
    %cst_75 = arith.constant 1.000000e+00 : f32
    %309 = vector.broadcast %cst_75 : f32 to vector<2x128xf32>
    %310 = arith.addf %309, %308 : vector<2x128xf32>
    %311 = arith.divf %309, %310 : vector<2x128xf32>
    %312 = math.tanh %306 : vector<2x128xf32>
    %313 = vector.extract_strided_slice %311 {offsets = [0, 0], sizes = [2, 32], strides = [1, 1]} : vector<2x128xf32> to vector<2x32xf32>
    %314 = vector.extract_strided_slice %311 {offsets = [0, 32], sizes = [2, 32], strides = [1, 1]} : vector<2x128xf32> to vector<2x32xf32>
    %315 = vector.extract_strided_slice %312 {offsets = [0, 64], sizes = [2, 32], strides = [1, 1]} : vector<2x128xf32> to vector<2x32xf32>
    %316 = vector.extract_strided_slice %311 {offsets = [0, 96], sizes = [2, 32], strides = [1, 1]} : vector<2x128xf32> to vector<2x32xf32>
    %317 = arith.mulf %314, %258 : vector<2x32xf32>
    %318 = arith.mulf %313, %315 : vector<2x32xf32>
    %319 = arith.addf %317, %318 : vector<2x32xf32>
    %320 = math.tanh %319 : vector<2x32xf32>
    %321 = arith.mulf %316, %320 : vector<2x32xf32>
    %322 = arith.index_cast %264 : i32 to index
    %c0_76 = arith.constant 0 : index
    %323 = vector.load %arg15[%322, %c0_76] : memref<16x32xf32, #tpu.memory_space<vmem>>, vector<2x32xf32>
    tpu.vector_store %arg15[%322, %c0_76], %321 {strides = array<i32>} : memref<16x32xf32, #tpu.memory_space<vmem>>, vector<2x32xf32>,
    %c5_i32 = arith.constant 5 : i32
    %c2_i32_77 = arith.constant 2 : i32
    %324 = arith.muli %c5_i32, %c2_i32_77 : i32
    %325 = tpu.assume_multiple %324, 2 : i32
    %326 = arith.index_cast %325 : i32 to index
    %c0_78 = arith.constant 0 : index
    %327 = vector.load %arg14[%326, %c0_78] : memref<16x128xf32, #tpu.memory_space<vmem>>, vector<2x128xf32>
    %cst_79 = arith.constant dense<0.000000e+00> : vector<2x128xf32>
    %328 = tpu.matmul %283, %7, %cst_79 {dimension_numbers = #tpu.dot_dimension_numbers<[1], [0], [0], [1], [0, 0, 1, 1], [], []>} : vector<2x32xf32>, vector<32x128xf32>, vector<2x128xf32> -> vector<2x128xf32>
    %329 = arith.addf %327, %328 : vector<2x128xf32>
    %330 = arith.negf %329 : vector<2x128xf32>
    %331 = math.exp %330 : vector<2x128xf32>
    %cst_80 = arith.constant 1.000000e+00 : f32
    %332 = vector.broadcast %cst_80 : f32 to vector<2x128xf32>
    %333 = arith.addf %332, %331 : vector<2x128xf32>
    %334 = arith.divf %332, %333 : vector<2x128xf32>
    %335 = math.tanh %329 : vector<2x128xf32>
    %336 = vector.extract_strided_slice %334 {offsets = [0, 0], sizes = [2, 32], strides = [1, 1]} : vector<2x128xf32> to vector<2x32xf32>
    %337 = vector.extract_strided_slice %334 {offsets = [0, 32], sizes = [2, 32], strides = [1, 1]} : vector<2x128xf32> to vector<2x32xf32>
    %338 = vector.extract_strided_slice %335 {offsets = [0, 64], sizes = [2, 32], strides = [1, 1]} : vector<2x128xf32> to vector<2x32xf32>
    %339 = vector.extract_strided_slice %334 {offsets = [0, 96], sizes = [2, 32], strides = [1, 1]} : vector<2x128xf32> to vector<2x32xf32>
    %340 = arith.mulf %337, %281 : vector<2x32xf32>
    %341 = arith.mulf %336, %338 : vector<2x32xf32>
    %342 = arith.addf %340, %341 : vector<2x32xf32>
    %343 = math.tanh %342 : vector<2x32xf32>
    %344 = arith.mulf %339, %343 : vector<2x32xf32>
    %cst_81 = arith.constant dense<0.000000e+00> : vector<2x128xf32>
    %345 = tpu.matmul %344, %8, %cst_81 {dimension_numbers = #tpu.dot_dimension_numbers<[1], [0], [0], [1], [0, 0, 1, 1], [], []>} : vector<2x32xf32>, vector<32x128xf32>, vector<2x128xf32> -> vector<2x128xf32>
    %cst_82 = arith.constant dense<0.000000e+00> : vector<2x128xf32>
    %346 = tpu.matmul %302, %9, %cst_82 {dimension_numbers = #tpu.dot_dimension_numbers<[1], [0], [0], [1], [0, 0, 1, 1], [], []>} : vector<2x32xf32>, vector<32x128xf32>, vector<2x128xf32> -> vector<2x128xf32>
    %347 = arith.addf %345, %346 : vector<2x128xf32>
    %348 = arith.addf %347, %14 : vector<2x128xf32>
    %349 = arith.negf %348 : vector<2x128xf32>
    %350 = math.exp %349 : vector<2x128xf32>
    %cst_83 = arith.constant 1.000000e+00 : f32
    %351 = vector.broadcast %cst_83 : f32 to vector<2x128xf32>
    %352 = arith.addf %351, %350 : vector<2x128xf32>
    %353 = arith.divf %351, %352 : vector<2x128xf32>
    %354 = math.tanh %348 : vector<2x128xf32>
    %355 = vector.extract_strided_slice %353 {offsets = [0, 0], sizes = [2, 32], strides = [1, 1]} : vector<2x128xf32> to vector<2x32xf32>
    %356 = vector.extract_strided_slice %353 {offsets = [0, 32], sizes = [2, 32], strides = [1, 1]} : vector<2x128xf32> to vector<2x32xf32>
    %357 = vector.extract_strided_slice %354 {offsets = [0, 64], sizes = [2, 32], strides = [1, 1]} : vector<2x128xf32> to vector<2x32xf32>
    %358 = vector.extract_strided_slice %353 {offsets = [0, 96], sizes = [2, 32], strides = [1, 1]} : vector<2x128xf32> to vector<2x32xf32>
    %359 = arith.mulf %356, %300 : vector<2x32xf32>
    %360 = arith.mulf %355, %357 : vector<2x32xf32>
    %361 = arith.addf %359, %360 : vector<2x32xf32>
    %362 = math.tanh %361 : vector<2x32xf32>
    %363 = arith.mulf %358, %362 : vector<2x32xf32>
    %cst_84 = arith.constant dense<0.000000e+00> : vector<2x128xf32>
    %364 = tpu.matmul %363, %10, %cst_84 {dimension_numbers = #tpu.dot_dimension_numbers<[1], [0], [0], [1], [0, 0, 1, 1], [], []>} : vector<2x32xf32>, vector<32x128xf32>, vector<2x128xf32> -> vector<2x128xf32>
    %cst_85 = arith.constant dense<0.000000e+00> : vector<2x128xf32>
    %365 = tpu.matmul %321, %11, %cst_85 {dimension_numbers = #tpu.dot_dimension_numbers<[1], [0], [0], [1], [0, 0, 1, 1], [], []>} : vector<2x32xf32>, vector<32x128xf32>, vector<2x128xf32> -> vector<2x128xf32>
    %366 = arith.addf %364, %365 : vector<2x128xf32>
    %367 = arith.addf %366, %17 : vector<2x128xf32>
    %368 = arith.negf %367 : vector<2x128xf32>
    %369 = math.exp %368 : vector<2x128xf32>
    %cst_86 = arith.constant 1.000000e+00 : f32
    %370 = vector.broadcast %cst_86 : f32 to vector<2x128xf32>
    %371 = arith.addf %370, %369 : vector<2x128xf32>
    %372 = arith.divf %370, %371 : vector<2x128xf32>
    %373 = math.tanh %367 : vector<2x128xf32>
    %374 = vector.extract_strided_slice %372 {offsets = [0, 0], sizes = [2, 32], strides = [1, 1]} : vector<2x128xf32> to vector<2x32xf32>
    %375 = vector.extract_strided_slice %372 {offsets = [0, 32], sizes = [2, 32], strides = [1, 1]} : vector<2x128xf32> to vector<2x32xf32>
    %376 = vector.extract_strided_slice %373 {offsets = [0, 64], sizes = [2, 32], strides = [1, 1]} : vector<2x128xf32> to vector<2x32xf32>
    %377 = vector.extract_strided_slice %372 {offsets = [0, 96], sizes = [2, 32], strides = [1, 1]} : vector<2x128xf32> to vector<2x32xf32>
    %378 = arith.mulf %375, %319 : vector<2x32xf32>
    %379 = arith.mulf %374, %376 : vector<2x32xf32>
    %380 = arith.addf %378, %379 : vector<2x32xf32>
    %381 = math.tanh %380 : vector<2x32xf32>
    %382 = arith.mulf %377, %381 : vector<2x32xf32>
    %383 = arith.index_cast %325 : i32 to index
    %c0_87 = arith.constant 0 : index
    %384 = vector.load %arg15[%383, %c0_87] : memref<16x32xf32, #tpu.memory_space<vmem>>, vector<2x32xf32>
    tpu.vector_store %arg15[%383, %c0_87], %382 {strides = array<i32>} : memref<16x32xf32, #tpu.memory_space<vmem>>, vector<2x32xf32>,
    %c6_i32 = arith.constant 6 : i32
    %c2_i32_88 = arith.constant 2 : i32
    %385 = arith.muli %c6_i32, %c2_i32_88 : i32
    %386 = tpu.assume_multiple %385, 2 : i32
    %387 = arith.index_cast %386 : i32 to index
    %c0_89 = arith.constant 0 : index
    %388 = vector.load %arg14[%387, %c0_89] : memref<16x128xf32, #tpu.memory_space<vmem>>, vector<2x128xf32>
    %cst_90 = arith.constant dense<0.000000e+00> : vector<2x128xf32>
    %389 = tpu.matmul %344, %7, %cst_90 {dimension_numbers = #tpu.dot_dimension_numbers<[1], [0], [0], [1], [0, 0, 1, 1], [], []>} : vector<2x32xf32>, vector<32x128xf32>, vector<2x128xf32> -> vector<2x128xf32>
    %390 = arith.addf %388, %389 : vector<2x128xf32>
    %391 = arith.negf %390 : vector<2x128xf32>
    %392 = math.exp %391 : vector<2x128xf32>
    %cst_91 = arith.constant 1.000000e+00 : f32
    %393 = vector.broadcast %cst_91 : f32 to vector<2x128xf32>
    %394 = arith.addf %393, %392 : vector<2x128xf32>
    %395 = arith.divf %393, %394 : vector<2x128xf32>
    %396 = math.tanh %390 : vector<2x128xf32>
    %397 = vector.extract_strided_slice %395 {offsets = [0, 0], sizes = [2, 32], strides = [1, 1]} : vector<2x128xf32> to vector<2x32xf32>
    %398 = vector.extract_strided_slice %395 {offsets = [0, 32], sizes = [2, 32], strides = [1, 1]} : vector<2x128xf32> to vector<2x32xf32>
    %399 = vector.extract_strided_slice %396 {offsets = [0, 64], sizes = [2, 32], strides = [1, 1]} : vector<2x128xf32> to vector<2x32xf32>
    %400 = vector.extract_strided_slice %395 {offsets = [0, 96], sizes = [2, 32], strides = [1, 1]} : vector<2x128xf32> to vector<2x32xf32>
    %401 = arith.mulf %398, %342 : vector<2x32xf32>
    %402 = arith.mulf %397, %399 : vector<2x32xf32>
    %403 = arith.addf %401, %402 : vector<2x32xf32>
    %404 = math.tanh %403 : vector<2x32xf32>
    %405 = arith.mulf %400, %404 : vector<2x32xf32>
    %cst_92 = arith.constant dense<0.000000e+00> : vector<2x128xf32>
    %406 = tpu.matmul %405, %8, %cst_92 {dimension_numbers = #tpu.dot_dimension_numbers<[1], [0], [0], [1], [0, 0, 1, 1], [], []>} : vector<2x32xf32>, vector<32x128xf32>, vector<2x128xf32> -> vector<2x128xf32>
    %cst_93 = arith.constant dense<0.000000e+00> : vector<2x128xf32>
    %407 = tpu.matmul %363, %9, %cst_93 {dimension_numbers = #tpu.dot_dimension_numbers<[1], [0], [0], [1], [0, 0, 1, 1], [], []>} : vector<2x32xf32>, vector<32x128xf32>, vector<2x128xf32> -> vector<2x128xf32>
    %408 = arith.addf %406, %407 : vector<2x128xf32>
    %409 = arith.addf %408, %14 : vector<2x128xf32>
    %410 = arith.negf %409 : vector<2x128xf32>
    %411 = math.exp %410 : vector<2x128xf32>
    %cst_94 = arith.constant 1.000000e+00 : f32
    %412 = vector.broadcast %cst_94 : f32 to vector<2x128xf32>
    %413 = arith.addf %412, %411 : vector<2x128xf32>
    %414 = arith.divf %412, %413 : vector<2x128xf32>
    %415 = math.tanh %409 : vector<2x128xf32>
    %416 = vector.extract_strided_slice %414 {offsets = [0, 0], sizes = [2, 32], strides = [1, 1]} : vector<2x128xf32> to vector<2x32xf32>
    %417 = vector.extract_strided_slice %414 {offsets = [0, 32], sizes = [2, 32], strides = [1, 1]} : vector<2x128xf32> to vector<2x32xf32>
    %418 = vector.extract_strided_slice %415 {offsets = [0, 64], sizes = [2, 32], strides = [1, 1]} : vector<2x128xf32> to vector<2x32xf32>
    %419 = vector.extract_strided_slice %414 {offsets = [0, 96], sizes = [2, 32], strides = [1, 1]} : vector<2x128xf32> to vector<2x32xf32>
    %420 = arith.mulf %417, %361 : vector<2x32xf32>
    %421 = arith.mulf %416, %418 : vector<2x32xf32>
    %422 = arith.addf %420, %421 : vector<2x32xf32>
    %423 = math.tanh %422 : vector<2x32xf32>
    %424 = arith.mulf %419, %423 : vector<2x32xf32>
    %cst_95 = arith.constant dense<0.000000e+00> : vector<2x128xf32>
    %425 = tpu.matmul %424, %10, %cst_95 {dimension_numbers = #tpu.dot_dimension_numbers<[1], [0], [0], [1], [0, 0, 1, 1], [], []>} : vector<2x32xf32>, vector<32x128xf32>, vector<2x128xf32> -> vector<2x128xf32>
    %cst_96 = arith.constant dense<0.000000e+00> : vector<2x128xf32>
    %426 = tpu.matmul %382, %11, %cst_96 {dimension_numbers = #tpu.dot_dimension_numbers<[1], [0], [0], [1], [0, 0, 1, 1], [], []>} : vector<2x32xf32>, vector<32x128xf32>, vector<2x128xf32> -> vector<2x128xf32>
    %427 = arith.addf %425, %426 : vector<2x128xf32>
    %428 = arith.addf %427, %17 : vector<2x128xf32>
    %429 = arith.negf %428 : vector<2x128xf32>
    %430 = math.exp %429 : vector<2x128xf32>
    %cst_97 = arith.constant 1.000000e+00 : f32
    %431 = vector.broadcast %cst_97 : f32 to vector<2x128xf32>
    %432 = arith.addf %431, %430 : vector<2x128xf32>
    %433 = arith.divf %431, %432 : vector<2x128xf32>
    %434 = math.tanh %428 : vector<2x128xf32>
    %435 = vector.extract_strided_slice %433 {offsets = [0, 0], sizes = [2, 32], strides = [1, 1]} : vector<2x128xf32> to vector<2x32xf32>
    %436 = vector.extract_strided_slice %433 {offsets = [0, 32], sizes = [2, 32], strides = [1, 1]} : vector<2x128xf32> to vector<2x32xf32>
    %437 = vector.extract_strided_slice %434 {offsets = [0, 64], sizes = [2, 32], strides = [1, 1]} : vector<2x128xf32> to vector<2x32xf32>
    %438 = vector.extract_strided_slice %433 {offsets = [0, 96], sizes = [2, 32], strides = [1, 1]} : vector<2x128xf32> to vector<2x32xf32>
    %439 = arith.mulf %436, %380 : vector<2x32xf32>
    %440 = arith.mulf %435, %437 : vector<2x32xf32>
    %441 = arith.addf %439, %440 : vector<2x32xf32>
    %442 = math.tanh %441 : vector<2x32xf32>
    %443 = arith.mulf %438, %442 : vector<2x32xf32>
    %444 = arith.index_cast %386 : i32 to index
    %c0_98 = arith.constant 0 : index
    %445 = vector.load %arg15[%444, %c0_98] : memref<16x32xf32, #tpu.memory_space<vmem>>, vector<2x32xf32>
    tpu.vector_store %arg15[%444, %c0_98], %443 {strides = array<i32>} : memref<16x32xf32, #tpu.memory_space<vmem>>, vector<2x32xf32>,
    %c7_i32 = arith.constant 7 : i32
    %c2_i32_99 = arith.constant 2 : i32
    %446 = arith.muli %c7_i32, %c2_i32_99 : i32
    %447 = tpu.assume_multiple %446, 2 : i32
    %448 = arith.index_cast %447 : i32 to index
    %c0_100 = arith.constant 0 : index
    %449 = vector.load %arg14[%448, %c0_100] : memref<16x128xf32, #tpu.memory_space<vmem>>, vector<2x128xf32>
    %cst_101 = arith.constant dense<0.000000e+00> : vector<2x128xf32>
    %450 = tpu.matmul %405, %7, %cst_101 {dimension_numbers = #tpu.dot_dimension_numbers<[1], [0], [0], [1], [0, 0, 1, 1], [], []>} : vector<2x32xf32>, vector<32x128xf32>, vector<2x128xf32> -> vector<2x128xf32>
    %451 = arith.addf %449, %450 : vector<2x128xf32>
    %452 = arith.negf %451 : vector<2x128xf32>
    %453 = math.exp %452 : vector<2x128xf32>
    %cst_102 = arith.constant 1.000000e+00 : f32
    %454 = vector.broadcast %cst_102 : f32 to vector<2x128xf32>
    %455 = arith.addf %454, %453 : vector<2x128xf32>
    %456 = arith.divf %454, %455 : vector<2x128xf32>
    %457 = math.tanh %451 : vector<2x128xf32>
    %458 = vector.extract_strided_slice %456 {offsets = [0, 0], sizes = [2, 32], strides = [1, 1]} : vector<2x128xf32> to vector<2x32xf32>
    %459 = vector.extract_strided_slice %456 {offsets = [0, 32], sizes = [2, 32], strides = [1, 1]} : vector<2x128xf32> to vector<2x32xf32>
    %460 = vector.extract_strided_slice %457 {offsets = [0, 64], sizes = [2, 32], strides = [1, 1]} : vector<2x128xf32> to vector<2x32xf32>
    %461 = vector.extract_strided_slice %456 {offsets = [0, 96], sizes = [2, 32], strides = [1, 1]} : vector<2x128xf32> to vector<2x32xf32>
    %462 = arith.mulf %459, %403 : vector<2x32xf32>
    %463 = arith.mulf %458, %460 : vector<2x32xf32>
    %464 = arith.addf %462, %463 : vector<2x32xf32>
    %465 = math.tanh %464 : vector<2x32xf32>
    %466 = arith.mulf %461, %465 : vector<2x32xf32>
    %cst_103 = arith.constant dense<0.000000e+00> : vector<2x128xf32>
    %467 = tpu.matmul %466, %8, %cst_103 {dimension_numbers = #tpu.dot_dimension_numbers<[1], [0], [0], [1], [0, 0, 1, 1], [], []>} : vector<2x32xf32>, vector<32x128xf32>, vector<2x128xf32> -> vector<2x128xf32>
    %cst_104 = arith.constant dense<0.000000e+00> : vector<2x128xf32>
    %468 = tpu.matmul %424, %9, %cst_104 {dimension_numbers = #tpu.dot_dimension_numbers<[1], [0], [0], [1], [0, 0, 1, 1], [], []>} : vector<2x32xf32>, vector<32x128xf32>, vector<2x128xf32> -> vector<2x128xf32>
    %469 = arith.addf %467, %468 : vector<2x128xf32>
    %470 = arith.addf %469, %14 : vector<2x128xf32>
    %471 = arith.negf %470 : vector<2x128xf32>
    %472 = math.exp %471 : vector<2x128xf32>
    %cst_105 = arith.constant 1.000000e+00 : f32
    %473 = vector.broadcast %cst_105 : f32 to vector<2x128xf32>
    %474 = arith.addf %473, %472 : vector<2x128xf32>
    %475 = arith.divf %473, %474 : vector<2x128xf32>
    %476 = math.tanh %470 : vector<2x128xf32>
    %477 = vector.extract_strided_slice %475 {offsets = [0, 0], sizes = [2, 32], strides = [1, 1]} : vector<2x128xf32> to vector<2x32xf32>
    %478 = vector.extract_strided_slice %475 {offsets = [0, 32], sizes = [2, 32], strides = [1, 1]} : vector<2x128xf32> to vector<2x32xf32>
    %479 = vector.extract_strided_slice %476 {offsets = [0, 64], sizes = [2, 32], strides = [1, 1]} : vector<2x128xf32> to vector<2x32xf32>
    %480 = vector.extract_strided_slice %475 {offsets = [0, 96], sizes = [2, 32], strides = [1, 1]} : vector<2x128xf32> to vector<2x32xf32>
    %481 = arith.mulf %478, %422 : vector<2x32xf32>
    %482 = arith.mulf %477, %479 : vector<2x32xf32>
    %483 = arith.addf %481, %482 : vector<2x32xf32>
    %484 = math.tanh %483 : vector<2x32xf32>
    %485 = arith.mulf %480, %484 : vector<2x32xf32>
    %cst_106 = arith.constant dense<0.000000e+00> : vector<2x128xf32>
    %486 = tpu.matmul %485, %10, %cst_106 {dimension_numbers = #tpu.dot_dimension_numbers<[1], [0], [0], [1], [0, 0, 1, 1], [], []>} : vector<2x32xf32>, vector<32x128xf32>, vector<2x128xf32> -> vector<2x128xf32>
    %cst_107 = arith.constant dense<0.000000e+00> : vector<2x128xf32>
    %487 = tpu.matmul %443, %11, %cst_107 {dimension_numbers = #tpu.dot_dimension_numbers<[1], [0], [0], [1], [0, 0, 1, 1], [], []>} : vector<2x32xf32>, vector<32x128xf32>, vector<2x128xf32> -> vector<2x128xf32>
    %488 = arith.addf %486, %487 : vector<2x128xf32>
    %489 = arith.addf %488, %17 : vector<2x128xf32>
    %490 = arith.negf %489 : vector<2x128xf32>
    %491 = math.exp %490 : vector<2x128xf32>
    %cst_108 = arith.constant 1.000000e+00 : f32
    %492 = vector.broadcast %cst_108 : f32 to vector<2x128xf32>
    %493 = arith.addf %492, %491 : vector<2x128xf32>
    %494 = arith.divf %492, %493 : vector<2x128xf32>
    %495 = math.tanh %489 : vector<2x128xf32>
    %496 = vector.extract_strided_slice %494 {offsets = [0, 0], sizes = [2, 32], strides = [1, 1]} : vector<2x128xf32> to vector<2x32xf32>
    %497 = vector.extract_strided_slice %494 {offsets = [0, 32], sizes = [2, 32], strides = [1, 1]} : vector<2x128xf32> to vector<2x32xf32>
    %498 = vector.extract_strided_slice %495 {offsets = [0, 64], sizes = [2, 32], strides = [1, 1]} : vector<2x128xf32> to vector<2x32xf32>
    %499 = vector.extract_strided_slice %494 {offsets = [0, 96], sizes = [2, 32], strides = [1, 1]} : vector<2x128xf32> to vector<2x32xf32>
    %500 = arith.mulf %497, %441 : vector<2x32xf32>
    %501 = arith.mulf %496, %498 : vector<2x32xf32>
    %502 = arith.addf %500, %501 : vector<2x32xf32>
    %503 = math.tanh %502 : vector<2x32xf32>
    %504 = arith.mulf %499, %503 : vector<2x32xf32>
    %505 = arith.index_cast %447 : i32 to index
    %c0_109 = arith.constant 0 : index
    %506 = vector.load %arg15[%505, %c0_109] : memref<16x32xf32, #tpu.memory_space<vmem>>, vector<2x32xf32>
    tpu.vector_store %arg15[%505, %c0_109], %504 {strides = array<i32>} : memref<16x32xf32, #tpu.memory_space<vmem>>, vector<2x32xf32>,
    %c8_i32 = arith.constant 8 : i32
    %c0_110 = arith.constant 0 : index
    %c0_111 = arith.constant 0 : index
    %507 = vector.load %arg15[%c0_110, %c0_111] : memref<16x32xf32, #tpu.memory_space<vmem>>, vector<16x32xf32>
    %c0_112 = arith.constant 0 : index
    %c0_113 = arith.constant 0 : index
    %508 = vector.load %arg11[%c0_112, %c0_113] : memref<32x128xf32, #tpu.memory_space<vmem>>, vector<32x128xf32>
    %cst_114 = arith.constant dense<0.000000e+00> : vector<16x128xf32>
    %509 = tpu.matmul %507, %508, %cst_114 {dimension_numbers = #tpu.dot_dimension_numbers<[1], [0], [0], [1], [0, 0, 1, 1], [], []>} : vector<16x32xf32>, vector<32x128xf32>, vector<16x128xf32> -> vector<16x128xf32>
    %c0_115 = arith.constant 0 : index
    %c0_116 = arith.constant 0 : index
    %510 = vector.load %arg12[%c0_115, %c0_116] : memref<1x128xf32, #tpu.memory_space<vmem>>, vector<1x128xf32>
    %511 = vector.broadcast %510 : vector<1x128xf32> to vector<16x128xf32>
    %512 = arith.addf %509, %511 : vector<16x128xf32>
    %c0_117 = arith.constant 0 : index
    %c0_118 = arith.constant 0 : index
    %513 = vector.load %arg13[%c0_117, %c0_118] : memref<16x128xf32, #tpu.memory_space<vmem>>, vector<16x128xf32>
    tpu.vector_store %arg13[%c0_117, %c0_118], %512 {strides = array<i32>} : memref<16x128xf32, #tpu.memory_space<vmem>>, vector<16x128xf32>,
    return
  }
  func.func @transform_0(%arg0: i32) -> (i32, i32) {
    %c0_i32 = arith.constant 0 : i32
    %c0_i32_0 = arith.constant 0 : i32
    %c0_i32_1 = arith.constant 0 : i32
    return %c0_i32, %c0_i32_0 : i32, i32
  }
  func.func @transform_1(%arg0: i32) -> (i32, i32) {
    %c0_i32 = arith.constant 0 : i32
    %c0_i32_0 = arith.constant 0 : i32
    %c0_i32_1 = arith.constant 0 : i32
    return %c0_i32, %c0_i32_0 : i32, i32
  }
  func.func @transform_2(%arg0: i32) -> (i32, i32) {
    %c0_i32 = arith.constant 0 : i32
    %c0_i32_0 = arith.constant 0 : i32
    %c0_i32_1 = arith.constant 0 : i32
    return %c0_i32, %c0_i32_0 : i32, i32
  }
  func.func @transform_3(%arg0: i32) -> (i32, i32) {
    %c0_i32 = arith.constant 0 : i32
    %c0_i32_0 = arith.constant 0 : i32
    %c0_i32_1 = arith.constant 0 : i32
    return %c0_i32, %c0_i32_0 : i32, i32
  }
  func.func @transform_4(%arg0: i32) -> (i32, i32) {
    %c0_i32 = arith.constant 0 : i32
    %c0_i32_0 = arith.constant 0 : i32
    %c0_i32_1 = arith.constant 0 : i32
    return %c0_i32, %c0_i32_0 : i32, i32
  }
  func.func @transform_5(%arg0: i32) -> (i32, i32) {
    %c0_i32 = arith.constant 0 : i32
    %c0_i32_0 = arith.constant 0 : i32
    %c0_i32_1 = arith.constant 0 : i32
    return %c0_i32, %c0_i32_0 : i32, i32
  }
  func.func @transform_6(%arg0: i32) -> (i32, i32) {
    %c0_i32 = arith.constant 0 : i32
    %c0_i32_0 = arith.constant 0 : i32
    %c0_i32_1 = arith.constant 0 : i32
    return %c0_i32, %c0_i32_0 : i32, i32
  }
  func.func @transform_7(%arg0: i32) -> (i32, i32) {
    %c0_i32 = arith.constant 0 : i32
    %c0_i32_0 = arith.constant 0 : i32
    %c0_i32_1 = arith.constant 0 : i32
    return %c0_i32, %c0_i32_0 : i32, i32
  }
  func.func @transform_8(%arg0: i32) -> (i32, i32) {
    %c0_i32 = arith.constant 0 : i32
    %c0_i32_0 = arith.constant 0 : i32
    %c0_i32_1 = arith.constant 0 : i32
    return %c0_i32, %c0_i32_0 : i32, i32
  }
  func.func @transform_9(%arg0: i32) -> (i32, i32) {
    %c0_i32 = arith.constant 0 : i32
    %c0_i32_0 = arith.constant 0 : i32
    %c0_i32_1 = arith.constant 0 : i32
    return %c0_i32, %c0_i32_0 : i32, i32
  }
  func.func @transform_10(%arg0: i32) -> (i32, i32) {
    %c0_i32 = arith.constant 0 : i32
    %c0_i32_0 = arith.constant 0 : i32
    %c0_i32_1 = arith.constant 0 : i32
    return %c0_i32, %c0_i32_0 : i32, i32
  }
  func.func @transform_11(%arg0: i32) -> (i32, i32) {
    %c0_i32 = arith.constant 0 : i32
    %c0_i32_0 = arith.constant 0 : i32
    %c0_i32_1 = arith.constant 0 : i32
    return %c0_i32, %c0_i32_0 : i32, i32
  }
  func.func @transform_12(%arg0: i32) -> (i32, i32) {
    %c0_i32 = arith.constant 0 : i32
    %c0_i32_0 = arith.constant 0 : i32
    %c0_i32_1 = arith.constant 0 : i32
    return %c0_i32, %c0_i32_0 : i32, i32
  }
}

</mosaic_0001>

<bundles_post_ra>
// kernel: tpu_custom_call.1
= control target key start
LH: loop header
LB: loop body
LE: loop exit
PB: predicated region body
PF: predicated region fallthrough
CT: control target
= control target key end

     0   :  { %17 = vsyncpa [#allocation5], 0  ;;  %s3336_s0 = inlined_call_operand.hbm [shape: f32[16,16], index: 0, kind: input, shape index: {}]   ;;  %s3337_s1 = inlined_call_operand.hbm [shape: f32[16,128], index: 1, kind: input, shape index: {}]   ;;  %s3338_s2 = inlined_call_operand.hbm [shape: f32[32,128], index: 2, kind: input, shape index: {}]   ;;  %s3339_s3 = inlined_call_operand.vmem [shape: f32[1,128], index: 3, kind: input, shape index: {}]   ;;  %s3340_s4 = inlined_call_operand.hbm [shape: f32[32,128], index: 4, kind: input, shape index: {}]   ;;  %s3341_s5 = inlined_call_operand.hbm [shape: f32[32,128], index: 5, kind: input, shape index: {}]   ;;  %s3342_s6 = inlined_call_operand.vmem [shape: f32[1,128], index: 6, kind: input, shape index: {}]   ;;  %s3343_s7 = inlined_call_operand.hbm [shape: f32[32,128], index: 7, kind: input, shape index: {}]   ;;  %s3344_s8 = inlined_call_operand.hbm [shape: f32[32,128], index: 8, kind: input, shape index: {}]   ;;  %s3345_s9 = inlined_call_operand.vmem [shape: f32[1,128], index: 9, kind: input, shape index: {}]   ;;  %s3346_s10 = inlined_call_operand.hbm [shape: f32[32,128], index: 10, kind: input, shape index: {}]   ;;  %s3347_s11 = inlined_call_operand.vmem [shape: f32[1,128], index: 11, kind: input, shape index: {}]   ;;  %s3348_s12 = inlined_call_operand.hbm [shape: f32[16,128], index: 12, kind: output, shape index: {}]  }
   0x1   :  { %18 = vsyncpa [#allocation8], 0 }
   0x2   :  { %19 = vsyncpa [#allocation11], 0 }
   0x3   :  { %20 = vsyncpa [#allocation14], 0 }
   0x4   :  { %21 = vsyncpa [#allocation17], 0 }
   0x5   :  { %22 = vsyncpa [#allocation6], 0  ;;  %s40_s23 = sshll.u32 %s3337_s1, 4  ;;  %s2697_s24 = smov [#allocation7]   ;;  %s41_s23 = int_to_ptr.hbm [resolvable:$true] %s40_s23 }
   0x6   :  { %s42_s25 = sshll.u32 %s2697_s24, 4  ;;  %s68_s28 = sshll.u32 %s3340_s4, 4  ;;  %s43_s25 = int_to_ptr.vmem [resolvable:$true] %s42_s25  ;;  %s69_s28 = int_to_ptr.hbm [resolvable:$true] %s68_s28 }
   0x7   :  { %s2698_s29 = smov 128   ;;  %s2699_s30 = smov 8  }
   0x8   :  { %48 = dma.hbm_to_vmem [thread:$0]  %s41_s23, 256, %s43_s25, [#allocation8], %s2698_s29, %s2698_s29, %s2699_s30  }
   0x9   :  { %s2700_s13 = smov [#allocation10]   ;;  %s96_s1 = sshll.u32 %s3343_s7, 4  ;;  %s97_s1 = int_to_ptr.hbm [resolvable:$true] %s96_s1 }
   0xa   :  { %s70_s14 = sshll.u32 %s2700_s13, 4  ;;  %s27_s18 = sshll.u32 %s3336_s0, 4  ;;  %s71_s14 = int_to_ptr.vmem [resolvable:$true] %s70_s14  ;;  %s28_s18 = int_to_ptr.hbm [resolvable:$true] %s27_s18 }
   0xb   :  { %76 = dma.hbm_to_vmem [thread:$0]  %s69_s28, 512, %s71_s14, [#allocation11], %s2698_s29, %s2698_s29, %s2699_s30  }
   0xc   :  { %s2701_s19 = smov [#allocation13]   ;;  %s2702_s21 = smov [#allocation4]  }
   0xd   :  { %s98_s20 = sshll.u32 %s2701_s19, 4  ;;  %s29_s7 = sshll.u32 %s2702_s21, 4  ;;  %s99_s20 = int_to_ptr.vmem [resolvable:$true] %s98_s20  ;;  %s30_s7 = int_to_ptr.vmem [resolvable:$true] %s29_s7 }
   0xe   :  { %104 = dma.hbm_to_vmem [thread:$0]  %s97_s1, 512, %s99_s20, [#allocation14], %s2698_s29, %s2698_s29, %s2699_s30  }
   0xf   :  { %s53_s24 = sshll.u32 %s3338_s2, 4  ;;  %s81_s26 = sshll.u32 %s3341_s5, 4  ;;  %s54_s24 = int_to_ptr.hbm [resolvable:$true] %s53_s24  ;;  %s82_s26 = int_to_ptr.hbm [resolvable:$true] %s81_s26 }
  0x10   :  { %35 = dma.hbm_to_vmem [thread:$0]  %s28_s18, 256, %s30_s7, [#allocation5], %s2698_s29, %s2698_s29, %s2699_s30  }
  0x11   :  { %s2703_s27 = smov [#allocation9]   ;;  %s2704_s13 = smov [#allocation12]  }
  0x12   :  { %s55_s28 = sshll.u32 %s2703_s27, 4  ;;  %s83_s2 = sshll.u32 %s2704_s13, 4  ;;  %s56_s28 = int_to_ptr.vmem [resolvable:$true] %s55_s28  ;;  %s84_s2 = int_to_ptr.vmem [resolvable:$true] %s83_s2 }
  0x13   :  { %61 = dma.hbm_to_vmem [thread:$0]  %s54_s24, 512, %s56_s28, [#allocation8], %s2698_s29, %s2698_s29, %s2699_s30  }
  0x14   :  { %s109_s16 = sshll.u32 %s3344_s8, 4  ;;  %s124_s4 = sshll.u32 %s3346_s10, 4  ;;  %s110_s16 = int_to_ptr.hbm [resolvable:$true] %s109_s16  ;;  %s125_s4 = int_to_ptr.hbm [resolvable:$true] %s124_s4 }
  0x15   :  { %89 = dma.hbm_to_vmem [thread:$0]  %s82_s26, 512, %s84_s2, [#allocation11], %s2698_s29, %s2698_s29, %s2699_s30  }
  0x16   :  { %s2705_s17 = smov [#allocation15]   ;;  %s2706_s19 = smov [#allocation16]  }
  0x17   :  { %s111_s18 = sshll.u32 %s2705_s17, 4  ;;  %s126_s8 = sshll.u32 %s2706_s19, 4  ;;  %s112_s18 = int_to_ptr.vmem [resolvable:$true] %s111_s18  ;;  %s127_s8 = int_to_ptr.vmem [resolvable:$true] %s126_s8 }
  0x18   :  { %117 = dma.hbm_to_vmem [thread:$0]  %s110_s16, 512, %s112_s18, [#allocation14], %s2698_s29, %s2698_s29, %s2699_s30  }
  0x19   :  { %132 = dma.hbm_to_vmem [thread:$0]  %s125_s4, 512, %s127_s8, [#allocation17], %s2698_s29, %s2698_s29, %s2699_s30  }
  0x1a   :  { %2685 = dma.done.wait [#allocation5], 256  }
  0x1b   :  { %2686 = vsyncadd [#allocation5], 4294967040 }
  0x1c   :  { %2687 = dma.done.wait [#allocation8], 768  }
  0x1d   :  { %2688 = vsyncadd [#allocation8], 4294966528 }
  0x1e   :  { %2689 = dma.done.wait [#allocation11], 1024  }
  0x1f   :  { %2690 = vsyncadd [#allocation11], 4294966272 }
  0x20   :  { %2691 = dma.done.wait [#allocation14], 1024  }
  0x21   :  { %2692 = vsyncadd [#allocation14], 4294966272 }
  0x22   :  { %2693 = dma.done.wait [#allocation17], 512  }
  0x23   :  { %2694 = vsyncadd [#allocation17], 4294966784  ;;  %v170_v0 = vld [vmem:[#allocation7 + $0x8] sm:$0xff]  ;;  %v169_v1 = vld [vmem:[#allocation7] sm:$0xff]  ;;  %vm175_vm0 = vcmask 130048   ;;  %v2707_v7 = vmov 0.0  }
  0x24   :  { %196 = vmatpush.msra.mxu0 %v170_v0  ;;  %v167_v2 = vld [vmem:[#allocation4] sm:$0xff]  ;;  %v2824_v3 = vld [vmem:[#allocation9 + $0x18] sm:$0xff]  ;;  %v2826_v4 = vld [vmem:[#allocation9 + $0x10] sm:$0xff]  ;;  %s2708_s21 = smov 64   ;;  %vm236_vm5 = vcmask 261120   ;;  %s2155_s14 = sshll.u32 %s3348_s12, 4  ;;  %s2156_s14 = int_to_ptr.hbm [resolvable:$true] %s2155_s14 }
  0x25   :  { %252 = vmatpush.msra.mxu1 %v2824_v3  ;;  %v2829_v5 = vld [vmem:[#allocation9 + $0x8] sm:$0xff]  ;;  %v2833_v6 = vld [vmem:[#allocation9] sm:$0xff]  ;;  %v2850_v34 = vld [vmem:[#allocation12 + $0x18] sm:$0xff] }
  0x26   :  { %197 = vmatpush.msra.mxu0 %v169_v1  ;;  %v2841_v8 = vld [vmem:[%s3339_s3] ss:$0 sm:$0xff]  ;;  %s2709_s3 = smov 32   ;;  %v2852_v35 = vld [vmem:[#allocation12 + $0x10] sm:$0xff]  ;;  %310 = vmatpush.msra.mxu3 %v2850_v34  ;;  %v2856_v36 = vld [vmem:[#allocation12 + $0x8] sm:$0xff] }
  0x27   :  { %2172 = vmatmul.msk.f32.vlgmr.msra.gmra.mxu0 %vm175_vm0, %v167_v2  ;;  %253 = vmatpush.msra.mxu1 %v2826_v4  ;;  %v2860_v37 = vld [vmem:[#allocation12] sm:$0xff]  ;;  %v2864_v38 = vld [vmem:[#allocation10 + $0x18] sm:$0xff]  ;;  %v2869_v39 = vld [vmem:[#allocation10 + $0x10] sm:$0xff] }
  0x28   :  { %542 = vmatpush.msrb.mxu0 %v2850_v34  ;;  %311 = vmatpush.msra.mxu3 %v2852_v35  ;;  %v2873_v40 = vld [vmem:[#allocation10 + $0x8] sm:$0xff]  ;;  %v2877_v41 = vld [vmem:[#allocation10] sm:$0xff] }
  0x29   :  { %254 = vmatpush.msra.mxu1 %v2829_v5  ;;  %v2893_v46 = vld [vmem:[%s3342_s6] ss:$0 sm:$0xff] }
  0x2a   :  { %543 = vmatpush.msrb.mxu0 %v2852_v35  ;;  %312 = vmatpush.msra.mxu3 %v2856_v36 }
  0x2b   :  { %255 = vmatpush.msra.mxu1 %v2833_v6 }
  0x2c   :  { %256 = vmatmul.f32.vlgmr.msra.gmra.mxu1 %v2707_v7  ;;  %544 = vmatpush.msrb.mxu0 %v2856_v36 }
  0x2d   :  { %313 = vmatpush.msra.mxu3 %v2860_v37 }
  0x2e   :  { %545 = vmatpush.msrb.mxu0 %v2860_v37  ;;  %314 = vmatmul.f32.vlgmr.msra.gmra.mxu3 %v2707_v7 }
  0x2f   :  { %335 = vmatpush.msrb.mxu3 %v2864_v38 }
  0x30   :  { %718 = vmatpush.msra.mxu0 %v2824_v3 }
  0x31   :  { %336 = vmatpush.msrb.mxu3 %v2869_v39 }
  0x32   :  { %719 = vmatpush.msra.mxu0 %v2826_v4 }
  0x33   :  { %337 = vmatpush.msrb.mxu3 %v2873_v40 }
  0x34   :  { %720 = vmatpush.msra.mxu0 %v2829_v5 }
  0x35   :  { %338 = vmatpush.msrb.mxu3 %v2877_v41 }
  0x36   :  { %721 = vmatpush.msra.mxu0 %v2833_v6 }
  0x37   :  { %484 = vmatpush.msra.mxu3 %v2824_v3 }
  0x39   :  { %485 = vmatpush.msra.mxu3 %v2826_v4 }
  0x3b   :  { %486 = vmatpush.msra.mxu3 %v2829_v5 }
  0x3d   :  { %487 = vmatpush.msra.mxu3 %v2833_v6 }
  0xa4   :  { %v199_v9 = vpop.f32.mrf.mxu0 }
  0xa5   :  { %v200_v10 = vadd.f32 %v2841_v8, %v199_v9 }
  0xa7   :  { %205 = vst [vmem:[#allocation2] sm:$0xff] %v200_v10 }
  0xa9   :  { %v257_v11 = vpop.f32.mrf.mxu1 }
  0xae   :  { %v235_v12 = vld [vmem:[#allocation2] sm:$0x3]  ;;  %v471_v50 = vld [vmem:[#allocation2 + $0x2] sm:$0x3] }
  0xaf   :  { %v260_v13 = vadd.f32 %v257_v11, %v235_v12 }
  0xb1   :  { %2255 = vtanh.f32 %v260_v13  ;;  %v2174_v15 = vmul.f32 -1.442695, %v260_v13  ;;  %v315_v45 = vpop.f32.mrf.mxu3 }
  0xb3   :  { %2257 = vpow2.f32 %v2174_v15 }
  0xb7   :  { %v2256_v14 = vpop.eup %2255 }
  0xb8   :  { %283 = vrot.lane.b32.xlu0 %v2256_v14, %s2708_s21 }
  0xb9   :  { %v2258_v16 = vpop.eup %2257 }
  0xba   :  { %v264_v17 = vadd.f32 1.0, %v2258_v16 }
  0xbc   :  { %2259 = vrcp.f32 %v264_v17  ;;  %v276_v23 = vand.u32 2147483648, %v264_v17  ;;  %vm270_vm2 = vweird.f32 %v264_v17  ;;  %v274_v24 = vand.u32 2147483647, %v264_v17 }
  0xbe   :  { %v277_v26 = vor.u32 1.1754944e-38, %v276_v23  ;;  %vm275_vm4 = vcmp.eq.f32.partialorder %v274_v24, 8.507059e+37 }
  0xc2   :  { %v2260_v18 = vpop.eup %2259 }
  0xc3   :  { %v266_v19 = vmul.f32 %v2260_v18, %v264_v17  ;;  %vm271_vm1 = vweird.f32 %v2260_v18 }
  0xc4   :  { %vm272_vm3 = vmor %vm270_vm2, %vm271_vm1 }
  0xc5   :  { %v267_v20 = vsub.f32 1.0, %v266_v19 }
  0xc7   :  { %v268_v21 = vmul.f32 %v2260_v18, %v267_v20 }
  0xc9   :  { %v269_v22 = vadd.f32 %v2260_v18, %v268_v21 }
  0xcb   :  { %v273_v25 = vsel %vm272_vm3, %v2260_v18, %v269_v22 }
  0xcc   :  { %v278_v28 = vsel %vm275_vm4, %v277_v26, %v273_v25 }
  0xcd   :  { %v281_v30 = vmul.f32 0.0, %v278_v28 }
 0x12a   :  { %v284_v27 = vpop.permute.xlu0 %283 }
 0x12b   :  { %v286_v29 = vmul.f32 %v284_v27, %v278_v28 }
 0x12d   :  { %288 = vrot.lane.b32.xlu0 %v286_v29, %s2709_s3 }
 0x19f   :  { %v289_v31 = vpop.permute.xlu0 %288 }
 0x1a0   :  { %v2846_v32 = vadd.f32 %v289_v31, %v281_v30 }
 0x1a2   :  { %2261 = vtanh.f32 %v2846_v32 }
 0x1a8   :  { %v2262_v33 = vpop.eup %2261 }
 0x1a9   :  { %294 = vrot.lane.b32.xlu1 %v2262_v33, %s2708_s21 }
 0x21b   :  { %v295_v42 = vpop.permute.xlu1 %294 }
 0x21c   :  { %v297_v43 = vmul.f32 %v295_v42, %v278_v28 }
 0x21e   :  { %319 = vrot.lane.b32.xlu1 %v297_v43, %s2709_s3 }
 0x290   :  { %v320_v44 = vpop.permute.xlu1 %319 }
 0x291   :  { %2175 = vmatmul.msk.f32.vlgmr.msrb.gmra.mxu3 %vm236_vm5, %v320_v44 }
 0x299   :  { %2179 = vmatmul.msk.f32.vlgmr.msra.gmra.mxu3 %vm236_vm5, %v320_v44 }
 0x314   :  { %v340_v47 = vpop.f32.mrf.mxu3 }
 0x315   :  { %v341_v48 = vadd.f32 %v340_v47, %v315_v45  ;;  %v168_v47 = vld [vmem:[#allocation4 + $0x8] sm:$0xff] }
 0x316   :  { %2173 = vmatmul.msk.f32.gmra.mxu0 %vm175_vm0, %v168_v47 }
 0x317   :  { %v343_v49 = vadd.f32 %v2893_v46, %v341_v48  ;;  %v2910_v48 = vld [vmem:[#allocation15 + $0x18] sm:$0xff] }
 0x318   :  { %393 = vmatpush.msrb.mxu1 %v2910_v48 }
 0x319   :  { %2263 = vtanh.f32 %v343_v49  ;;  %v2176_v55 = vmul.f32 -1.442695, %v343_v49  ;;  %v2912_v49 = vld [vmem:[#allocation13 + $0x18] sm:$0xff] }
 0x31a   :  { %418 = vmatpush.msra.mxu2 %v2912_v49  ;;  %652 = vmatpush.msrb.mxu3 %v2912_v49 }
 0x31c   :  { %v489_v51 = vpop.f32.mrf.mxu3 }
 0x31d   :  { %v492_v52 = vadd.f32 %v489_v51, %v471_v50  ;;  %v2918_v50 = vld [vmem:[#allocation13 + $0x10] sm:$0xff]  ;;  %v2921_v51 = vld [vmem:[#allocation15 + $0x8] sm:$0xff] }
 0x31e   :  { %419 = vmatpush.msra.mxu2 %v2918_v50  ;;  %653 = vmatpush.msrb.mxu3 %v2918_v50 }
 0x31f   :  { %v2264_v53 = vpop.eup %2263  ;;  %2265 = vtanh.f32 %v492_v52  ;;  %v2180_v56 = vmul.f32 -1.442695, %v492_v52  ;;  %v2925_v52 = vld [vmem:[#allocation13 + $0x8] sm:$0xff] }
 0x320   :  { %366 = vrot.lane.b32.xlu2 %v2264_v53, %s2708_s21  ;;  %2267 = vpow2.f32 %v2176_v55  ;;  %v2928_v53 = vld [vmem:[#allocation15] sm:$0xff]  ;;  %420 = vmatpush.msra.mxu2 %v2925_v52 }
 0x321   :  { %2269 = vpow2.f32 %v2180_v56  ;;  %654 = vmatpush.msrb.mxu3 %v2925_v52 }
 0x325   :  { %v2266_v54 = vpop.eup %2265 }
 0x326   :  { %v2268_v57 = vpop.eup %2267 }
 0x327   :  { %v347_v58 = vadd.f32 1.0, %v2268_v57  ;;  %v2270_v59 = vpop.eup %2269 }
 0x328   :  { %515 = vrot.lane.b32.xlu2 %v2266_v54, %s2708_s21  ;;  %v496_v60 = vadd.f32 1.0, %v2270_v59  ;;  %v2932_v54 = vld [vmem:[#allocation13] sm:$0xff] }
 0x329   :  { %2271 = vrcp.f32 %v347_v58  ;;  %v359_v11 = vand.u32 2147483648, %v347_v58  ;;  %vm353_vm7 = vweird.f32 %v347_v58  ;;  %v357_v12 = vand.u32 2147483647, %v347_v58  ;;  %421 = vmatpush.msra.mxu2 %v2932_v54  ;;  %655 = vmatpush.msrb.mxu3 %v2932_v54 }
 0x32a   :  { %2273 = vrcp.f32 %v496_v60  ;;  %v508_v20 = vand.u32 2147483648, %v496_v60  ;;  %vm502_vm11 = vweird.f32 %v496_v60  ;;  %v506_v21 = vand.u32 2147483647, %v496_v60 }
 0x32b   :  { %v360_v15 = vor.u32 1.1754944e-38, %v359_v11  ;;  %vm358_vm9 = vcmp.eq.f32.partialorder %v357_v12, 8.507059e+37  ;;  %627 = vmatpush.msrb.mxu2 %v2910_v48  ;;  %861 = vmatpush.msra.mxu3 %v2910_v48 }
 0x32c   :  { %v509_v23 = vor.u32 1.1754944e-38, %v508_v20  ;;  %vm507_vm13 = vcmp.eq.f32.partialorder %v506_v21, 8.507059e+37 }
 0x32f   :  { %v2272_v61 = vpop.eup %2271 }
 0x330   :  { %v349_v62 = vmul.f32 %v2272_v61, %v347_v58  ;;  %v2274_v0 = vpop.eup %2273  ;;  %vm354_vm6 = vweird.f32 %v2272_v61 }
 0x331   :  { %v498_v2 = vmul.f32 %v2274_v0, %v496_v60  ;;  %vm355_vm8 = vmor %vm353_vm7, %vm354_vm6  ;;  %vm503_vm10 = vweird.f32 %v2274_v0 }
 0x332   :  { %v350_v63 = vsub.f32 1.0, %v349_v62  ;;  %vm504_vm12 = vmor %vm502_vm11, %vm503_vm10  ;;  %v2981_v62 = vld [vmem:[%s3345_s9] ss:$0 sm:$0xff]  ;;  %vm468_vm11 = vcmask 254976  }
 0x333   :  { %v499_v10 = vsub.f32 1.0, %v498_v2 }
 0x334   :  { %v351_v1 = vmul.f32 %v2272_v61, %v350_v63 }
 0x335   :  { %v500_v14 = vmul.f32 %v2274_v0, %v499_v10 }
 0x336   :  { %v352_v9 = vadd.f32 %v2272_v61, %v351_v1 }
 0x337   :  { %v501_v19 = vadd.f32 %v2274_v0, %v500_v14 }
 0x338   :  { %v356_v13 = vsel %vm355_vm8, %v2272_v61, %v352_v9 }
 0x339   :  { %v361_v17 = vsel %vm358_vm9, %v360_v15, %v356_v13  ;;  %v505_v22 = vsel %vm504_vm12, %v2274_v0, %v501_v19 }
 0x33a   :  { %v510_v24 = vsel %vm507_vm13, %v509_v23, %v505_v22  ;;  %v364_v27 = vmul.f32 0.0, %v361_v17 }
 0x33b   :  { %v513_v30 = vmul.f32 %v510_v24, %v2846_v32  ;;  %v2916_v32 = vld [vmem:[#allocation15 + $0x10] sm:$0xff] }
 0x33c   :  { %394 = vmatpush.msrb.mxu1 %v2916_v32  ;;  %628 = vmatpush.msrb.mxu2 %v2916_v32 }
 0x33d   :  { %862 = vmatpush.msra.mxu3 %v2916_v32 }
 0x33e   :  { %395 = vmatpush.msrb.mxu1 %v2921_v51  ;;  %629 = vmatpush.msrb.mxu2 %v2921_v51 }
 0x33f   :  { %863 = vmatpush.msra.mxu3 %v2921_v51 }
 0x340   :  { %396 = vmatpush.msrb.mxu1 %v2928_v53  ;;  %630 = vmatpush.msrb.mxu2 %v2928_v53 }
 0x341   :  { %397 = vmatmul.f32.vlgmr.msrb.gmra.mxu1 %v2707_v7  ;;  %864 = vmatpush.msra.mxu3 %v2928_v53 }
 0x342   :  { %567 = vmatpush.msra.mxu1 %v2864_v38 }
 0x344   :  { %568 = vmatpush.msra.mxu1 %v2869_v39 }
 0x346   :  { %569 = vmatpush.msra.mxu1 %v2873_v40 }
 0x348   :  { %570 = vmatpush.msra.mxu1 %v2877_v41 }
 0x34a   :  { %776 = vmatpush.msrb.mxu1 %v2850_v34 }
 0x34c   :  { %777 = vmatpush.msrb.mxu1 %v2852_v35 }
 0x34e   :  { %778 = vmatpush.msrb.mxu1 %v2856_v36 }
 0x350   :  { %779 = vmatpush.msrb.mxu1 %v2860_v37 }
 0x37a   :  { %v367_v16 = vpop.permute.xlu2 %366 }
 0x37b   :  { %v369_v18 = vmul.f32 %v367_v16, %v361_v17 }
 0x37d   :  { %371 = vrot.lane.b32.xlu0 %v369_v18, %s2709_s3 }
 0x382   :  { %v516_v25 = vpop.permute.xlu2 %515 }
 0x383   :  { %v518_v26 = vmul.f32 %v516_v25, %v510_v24 }
 0x385   :  { %520 = vrot.lane.b32.xlu1 %v518_v26, %s2709_s3 }
 0x393   :  { %v202_v58 = vpop.f32.mrf.mxu0 }
 0x394   :  { %v203_v59 = vadd.f32 %v2841_v8, %v202_v58  ;;  %v705_v8 = vld [vmem:[#allocation2 + $0x4] sm:$0x3] }
 0x396   :  { %206 = vst [vmem:[#allocation2 + $0x8] sm:$0xff] %v203_v59 }
 0x3be   :  { %v398_v60 = vpop.f32.mrf.mxu1 }
 0x3ef   :  { %v372_v28 = vpop.permute.xlu0 %371 }
 0x3f0   :  { %v2900_v29 = vadd.f32 %v372_v28, %v364_v27 }
 0x3f2   :  { %2275 = vtanh.f32 %v2900_v29 }
 0x3f7   :  { %v521_v31 = vpop.permute.xlu1 %520 }
 0x3f8   :  { %v2276_v33 = vpop.eup %2275  ;;  %v2904_v42 = vadd.f32 %v521_v31, %v513_v30 }
 0x3f9   :  { %377 = vrot.lane.b32.xlu2 %v2276_v33, %s2708_s21 }
 0x3fa   :  { %2277 = vtanh.f32 %v2904_v42 }
 0x400   :  { %v2278_v43 = vpop.eup %2277 }
 0x401   :  { %526 = vrot.lane.b32.xlu0 %v2278_v43, %s2708_s21 }
 0x453   :  { %v378_v44 = vpop.permute.xlu2 %377 }
 0x454   :  { %v380_v45 = vmul.f32 %v378_v44, %v361_v17 }
 0x456   :  { %402 = vrot.lane.b32.xlu1 %v380_v45, %s2709_s3 }
 0x473   :  { %v527_v7 = vpop.permute.xlu0 %526 }
 0x474   :  { %v529_v55 = vmul.f32 %v527_v7, %v510_v24 }
 0x476   :  { %551 = vrot.lane.b32.xlu2 %v529_v55, %s2709_s3 }
 0x4c8   :  { %v403_v56 = vpop.permute.xlu1 %402 }
 0x4c9   :  { %2177 = vmatmul.msk.f32.vlgmr.msra.gmra.mxu2 %vm236_vm5, %v403_v56  ;;  %2181 = vmatmul.msk.f32.vlgmr.msrb.gmra.mxu0 %vm236_vm5, %v403_v56 }
 0x4ca   :  { %801 = vmatpush.msra.mxu2 %v2864_v38  ;;  %886 = vmatpush.msrb.mxu0 %v2912_v49 }
 0x4cc   :  { %802 = vmatpush.msra.mxu2 %v2869_v39  ;;  %887 = vmatpush.msrb.mxu0 %v2918_v50 }
 0x4ce   :  { %803 = vmatpush.msra.mxu2 %v2873_v40  ;;  %888 = vmatpush.msrb.mxu0 %v2925_v52 }
 0x4d0   :  { %v552_v57 = vpop.permute.xlu2 %551  ;;  %804 = vmatpush.msra.mxu2 %v2877_v41  ;;  %889 = vmatpush.msrb.mxu0 %v2932_v54 }
 0x4d1   :  { %2182 = vmatmul.msk.f32.vlgmr.msra.gmra.mxu1 %vm236_vm5, %v552_v57  ;;  %2187 = vmatmul.msk.f32.vlgmr.msra.gmra.mxu0 %vm236_vm5, %v552_v57 }
 0x4d2   :  { %952 = vmatpush.msra.mxu1 %v2824_v3  ;;  %1095 = vmatpush.msra.mxu0 %v2910_v48 }
 0x4d4   :  { %953 = vmatpush.msra.mxu1 %v2826_v4  ;;  %1096 = vmatpush.msra.mxu0 %v2916_v32 }
 0x4d6   :  { %954 = vmatpush.msra.mxu1 %v2829_v5  ;;  %1097 = vmatpush.msra.mxu0 %v2921_v51 }
 0x4d8   :  { %955 = vmatpush.msra.mxu1 %v2833_v6  ;;  %1098 = vmatpush.msra.mxu0 %v2928_v53 }
 0x546   :  { %v547_v61 = vpop.f32.mrf.mxu0 }
 0x54c   :  { %v423_v63 = vpop.f32.mrf.mxu2 }
 0x54d   :  { %v424_v0 = vadd.f32 %v423_v63, %v398_v60 }
 0x54e   :  { %v572_v1 = vpop.f32.mrf.mxu1  ;;  %v723_v2 = vpop.f32.mrf.mxu0 }
 0x54f   :  { %v426_v9 = vadd.f32 %v2981_v62, %v424_v0  ;;  %v573_v10 = vadd.f32 %v572_v1, %v547_v61  ;;  %v726_v11 = vadd.f32 %v723_v2, %v705_v8 }
 0x551   :  { %2279 = vtanh.f32 %v426_v9  ;;  %v575_v12 = vadd.f32 %v2893_v46, %v573_v10  ;;  %v2188_v16 = vmul.f32 -1.442695, %v726_v11  ;;  %v2178_v20 = vmul.f32 -1.442695, %v426_v9 }
 0x552   :  { %2281 = vtanh.f32 %v726_v11 }
 0x553   :  { %2283 = vtanh.f32 %v575_v12  ;;  %v2183_v21 = vmul.f32 -1.442695, %v575_v12 }
 0x554   :  { %2285 = vpow2.f32 %v2188_v16 }
 0x557   :  { %v2280_v13 = vpop.eup %2279 }
 0x558   :  { %v2282_v14 = vpop.eup %2281  ;;  %449 = vrot.lane.b32.xlu0 %v2280_v13, %s2708_s21 }
 0x559   :  { %749 = vrot.lane.b32.xlu2 %v2282_v14, %s2708_s21  ;;  %v2284_v15 = vpop.eup %2283 }
 0x55a   :  { %598 = vrot.lane.b32.xlu1 %v2284_v15, %s2708_s21  ;;  %v2286_v17 = vpop.eup %2285 }
 0x55b   :  { %v730_v18 = vadd.f32 1.0, %v2286_v17 }
 0x55d   :  { %2287 = vrcp.f32 %v730_v18  ;;  %v742_v31 = vand.u32 2147483648, %v730_v18  ;;  %vm736_vm15 = vweird.f32 %v730_v18  ;;  %v740_v33 = vand.u32 2147483647, %v730_v18 }
 0x55e   :  { %2289 = vpow2.f32 %v2178_v20 }
 0x55f   :  { %2291 = vpow2.f32 %v2183_v21  ;;  %v743_v44 = vor.u32 1.1754944e-38, %v742_v31  ;;  %vm741_vm1 = vcmp.eq.f32.partialorder %v740_v33, 8.507059e+37 }
 0x563   :  { %v2288_v19 = vpop.eup %2287 }
 0x564   :  { %v732_v22 = vmul.f32 %v2288_v19, %v730_v18  ;;  %v2290_v24 = vpop.eup %2289  ;;  %vm737_vm14 = vweird.f32 %v2288_v19 }
 0x565   :  { %v2292_v26 = vpop.eup %2291  ;;  %v430_v27 = vadd.f32 1.0, %v2290_v24  ;;  %vm738_vm0 = vmor %vm736_vm15, %vm737_vm14 }
 0x566   :  { %v733_v23 = vsub.f32 1.0, %v732_v22  ;;  %v579_v30 = vadd.f32 1.0, %v2292_v26 }
 0x567   :  { %2293 = vrcp.f32 %v430_v27  ;;  %v442_v1 = vand.u32 2147483648, %v430_v27  ;;  %vm436_vm3 = vweird.f32 %v430_v27  ;;  %v440_v8 = vand.u32 2147483647, %v430_v27 }
 0x568   :  { %v734_v25 = vmul.f32 %v2288_v19, %v733_v23  ;;  %2295 = vrcp.f32 %v579_v30  ;;  %v591_v10 = vand.u32 2147483648, %v579_v30  ;;  %vm585_vm7 = vweird.f32 %v579_v30 }
 0x569   :  { %v443_v11 = vor.u32 1.1754944e-38, %v442_v1  ;;  %v589_v12 = vand.u32 2147483647, %v579_v30  ;;  %vm441_vm8 = vcmp.eq.f32.partialorder %v440_v8, 8.507059e+37 }
 0x56a   :  { %v735_v28 = vadd.f32 %v2288_v19, %v734_v25  ;;  %v592_v17 = vor.u32 1.1754944e-38, %v591_v10 }
 0x56b   :  { %vm590_vm10 = vcmp.eq.f32.partialorder %v589_v12, 8.507059e+37 }
 0x56c   :  { %v739_v43 = vsel %vm738_vm0, %v2288_v19, %v735_v28 }
 0x56d   :  { %v744_v47 = vsel %vm741_vm1, %v743_v44, %v739_v43  ;;  %v2294_v7 = vpop.eup %2293 }
 0x56e   :  { %v2296_v56 = vpop.eup %2295  ;;  %v432_v57 = vmul.f32 %v2294_v7, %v430_v27  ;;  %vm437_vm2 = vweird.f32 %v2294_v7  ;;  %v747_v21 = vmul.f32 %v744_v47, %v2904_v42 }
 0x56f   :  { %v581_v58 = vmul.f32 %v2296_v56, %v579_v30  ;;  %vm438_vm4 = vmor %vm436_vm3, %vm437_vm2  ;;  %vm586_vm6 = vweird.f32 %v2296_v56 }
 0x570   :  { %v433_v59 = vsub.f32 1.0, %v432_v57  ;;  %vm587_vm9 = vmor %vm585_vm7, %vm586_vm6 }
 0x571   :  { %v582_v60 = vsub.f32 1.0, %v581_v58 }
 0x572   :  { %v434_v61 = vmul.f32 %v2294_v7, %v433_v59 }
 0x573   :  { %v583_v63 = vmul.f32 %v2296_v56, %v582_v60 }
 0x574   :  { %v435_v0 = vadd.f32 %v2294_v7, %v434_v61 }
 0x575   :  { %v584_v2 = vadd.f32 %v2296_v56, %v583_v63  ;;  %v939_v63 = vld [vmem:[#allocation2 + $0x6] sm:$0x3] }
 0x576   :  { %v439_v9 = vsel %vm438_vm4, %v2294_v7, %v435_v0 }
 0x577   :  { %v444_v14 = vsel %vm441_vm8, %v443_v11, %v439_v9  ;;  %v588_v15 = vsel %vm587_vm9, %v2296_v56, %v584_v2 }
 0x578   :  { %v593_v19 = vsel %vm590_vm10, %v592_v17, %v588_v15  ;;  %v447_v25 = vmul.f32 0.0, %v444_v14 }
 0x579   :  { %v596_v28 = vmul.f32 %v593_v19, %v2900_v29 }
 0x5b3   :  { %v750_v45 = vpop.permute.xlu2 %749 }
 0x5b4   :  { %v752_v55 = vmul.f32 %v750_v45, %v744_v47 }
 0x5b6   :  { %754 = vrot.lane.b32.xlu2 %v752_v55, %s2709_s3 }
 0x5ca   :  { %v450_v13 = vpop.permute.xlu0 %449 }
 0x5cb   :  { %v452_v16 = vmul.f32 %v450_v13, %v444_v14 }
 0x5cc   :  { %v599_v18 = vpop.permute.xlu1 %598 }
 0x5cd   :  { %454 = vrot.lane.b32.xlu0 %v452_v16, %s2709_s3  ;;  %v601_v20 = vmul.f32 %v599_v18, %v593_v19 }
 0x5cf   :  { %603 = vrot.lane.b32.xlu1 %v601_v20, %s2709_s3 }
 0x610   :  { %v755_v22 = vpop.permute.xlu2 %754 }
 0x611   :  { %v2992_v23 = vadd.f32 %v755_v22, %v747_v21 }
 0x613   :  { %2297 = vtanh.f32 %v2992_v23 }
 0x619   :  { %v2298_v24 = vpop.eup %2297 }
 0x61a   :  { %760 = vrot.lane.b32.xlu2 %v2298_v24, %s2708_s21 }
 0x63f   :  { %v455_v26 = vpop.permute.xlu0 %454 }
 0x640   :  { %v2996_v27 = vadd.f32 %v455_v26, %v447_v25 }
 0x641   :  { %v604_v30 = vpop.permute.xlu1 %603 }
 0x642   :  { %2299 = vtanh.f32 %v2996_v27  ;;  %v3000_v31 = vadd.f32 %v604_v30, %v596_v28 }
 0x644   :  { %2301 = vtanh.f32 %v3000_v31 }
 0x648   :  { %v2300_v42 = vpop.eup %2299 }
 0x649   :  { %460 = vrot.lane.b32.xlu0 %v2300_v42, %s2708_s21 }
 0x64a   :  { %v2302_v33 = vpop.eup %2301 }
 0x64b   :  { %609 = vrot.lane.b32.xlu1 %v2302_v33, %s2708_s21 }
 0x674   :  { %v761_v43 = vpop.permute.xlu2 %760 }
 0x675   :  { %v763_v44 = vmul.f32 %v761_v43, %v744_v47 }
 0x677   :  { %785 = vrot.lane.b32.xlu2 %v763_v44, %s2709_s3 }
 0x6bb   :  { %v461_v45 = vpop.permute.xlu0 %460 }
 0x6bc   :  { %v463_v7 = vmul.f32 %v461_v45, %v444_v14 }
 0x6bd   :  { %v610_v29 = vpop.permute.xlu1 %609 }
 0x6be   :  { %465 = vrot.lane.b32.xlu0 %v463_v7, %s2709_s3  ;;  %v612_v55 = vmul.f32 %v610_v29, %v593_v19 }
 0x6c0   :  { %636 = vrot.lane.b32.xlu1 %v612_v55, %s2709_s3 }
 0x6d1   :  { %v786_v47 = vpop.permute.xlu2 %785 }
 0x730   :  { %v466_v56 = vpop.permute.xlu0 %465 }
 0x731   :  { %469 = vst.msk [vmem:[#allocation3] sm:$0x3] %vm468_vm11, %v466_v56  ;;  %2184 = vmatmul.msk.f32.vlgmr.msrb.gmra.mxu2 %vm236_vm5, %v466_v56 }
 0x732   :  { %1010 = vmatpush.msrb.mxu2 %v2850_v34  ;;  %v637_v57 = vpop.permute.xlu1 %636 }
 0x733   :  { %2185 = vmatmul.msk.f32.vlgmr.msrb.gmra.mxu3 %vm236_vm5, %v637_v57  ;;  %2189 = vmatmul.msk.f32.vlgmr.msrb.gmra.mxu1 %vm236_vm5, %v637_v57 }
 0x734   :  { %1035 = vmatpush.msrb.mxu3 %v2864_v38  ;;  %1011 = vmatpush.msrb.mxu2 %v2852_v35 }
 0x735   :  { %1120 = vmatpush.msrb.mxu1 %v2912_v49 }
 0x736   :  { %1036 = vmatpush.msrb.mxu3 %v2869_v39  ;;  %1012 = vmatpush.msrb.mxu2 %v2856_v36 }
 0x737   :  { %1121 = vmatpush.msrb.mxu1 %v2918_v50 }
 0x738   :  { %1037 = vmatpush.msrb.mxu3 %v2873_v40  ;;  %1013 = vmatpush.msrb.mxu2 %v2860_v37 }
 0x739   :  { %2190 = vmatmul.msk.f32.vlgmr.msra.gmra.mxu2 %vm236_vm5, %v786_v47  ;;  %1122 = vmatpush.msrb.mxu1 %v2925_v52 }
 0x73a   :  { %1038 = vmatpush.msrb.mxu3 %v2877_v41  ;;  %1186 = vmatpush.msra.mxu2 %v2824_v3 }
 0x73b   :  { %2195 = vmatmul.msk.f32.vlgmr.msra.gmra.mxu1 %vm236_vm5, %v786_v47 }
 0x73c   :  { %1187 = vmatpush.msra.mxu2 %v2826_v4  ;;  %1123 = vmatpush.msrb.mxu1 %v2932_v54 }
 0x73e   :  { %1329 = vmatpush.msra.mxu1 %v2910_v48  ;;  %1188 = vmatpush.msra.mxu2 %v2829_v5 }
 0x740   :  { %1330 = vmatpush.msra.mxu1 %v2916_v32  ;;  %1189 = vmatpush.msra.mxu2 %v2833_v6 }
 0x742   :  { %1331 = vmatpush.msra.mxu1 %v2921_v51 }
 0x744   :  { %1332 = vmatpush.msra.mxu1 %v2928_v53 }
 0x7b0   :  { %v781_v58 = vpop.f32.mrf.mxu1 }
 0x7b4   :  { %v632_v59 = vpop.f32.mrf.mxu2 }
 0x7b6   :  { %v657_v60 = vpop.f32.mrf.mxu3 }
 0x7b7   :  { %v658_v61 = vadd.f32 %v657_v60, %v632_v59 }
 0x7b8   :  { %v957_v0 = vpop.f32.mrf.mxu1 }
 0x7b9   :  { %v660_v1 = vadd.f32 %v2981_v62, %v658_v61  ;;  %v960_v8 = vadd.f32 %v957_v0, %v939_v63 }
 0x7bb   :  { %2303 = vtanh.f32 %v660_v1  ;;  %v2196_v14 = vmul.f32 -1.442695, %v960_v8  ;;  %v2186_v18 = vmul.f32 -1.442695, %v660_v1 }
 0x7bc   :  { %v806_v2 = vpop.f32.mrf.mxu2  ;;  %2305 = vtanh.f32 %v960_v8 }
 0x7bd   :  { %v807_v9 = vadd.f32 %v806_v2, %v781_v58 }
 0x7bf   :  { %v809_v10 = vadd.f32 %v2893_v46, %v807_v9 }
 0x7c1   :  { %2307 = vtanh.f32 %v809_v10  ;;  %v2304_v11 = vpop.eup %2303  ;;  %v2191_v20 = vmul.f32 -1.442695, %v809_v10 }
 0x7c2   :  { %v2306_v12 = vpop.eup %2305  ;;  %683 = vrot.lane.b32.xlu0 %v2304_v11, %s2708_s21  ;;  %2309 = vpow2.f32 %v2196_v14 }
 0x7c3   :  { %983 = vrot.lane.b32.xlu2 %v2306_v12, %s2708_s21 }
 0x7c7   :  { %v2308_v13 = vpop.eup %2307 }
 0x7c8   :  { %832 = vrot.lane.b32.xlu1 %v2308_v13, %s2708_s21  ;;  %v2310_v15 = vpop.eup %2309 }
 0x7c9   :  { %v964_v16 = vadd.f32 1.0, %v2310_v15 }
 0x7cb   :  { %2311 = vrcp.f32 %v964_v16  ;;  %v976_v30 = vand.u32 2147483648, %v964_v16  ;;  %vm970_vm13 = vweird.f32 %v964_v16  ;;  %v974_v42 = vand.u32 2147483647, %v964_v16 }
 0x7cc   :  { %2313 = vpow2.f32 %v2186_v18 }
 0x7cd   :  { %2315 = vpow2.f32 %v2191_v20  ;;  %v977_v44 = vor.u32 1.1754944e-38, %v976_v30  ;;  %vm975_vm15 = vcmp.eq.f32.partialorder %v974_v42, 8.507059e+37 }
 0x7d1   :  { %v2312_v17 = vpop.eup %2311 }
 0x7d2   :  { %v966_v19 = vmul.f32 %v2312_v17, %v964_v16  ;;  %v2314_v22 = vpop.eup %2313  ;;  %vm971_vm12 = vweird.f32 %v2312_v17 }
 0x7d3   :  { %v664_v25 = vadd.f32 1.0, %v2314_v22  ;;  %v2316_v26 = vpop.eup %2315  ;;  %vm972_vm14 = vmor %vm970_vm13, %vm971_vm12 }
 0x7d4   :  { %v967_v21 = vsub.f32 1.0, %v966_v19  ;;  %v813_v33 = vadd.f32 1.0, %v2316_v26 }
 0x7d5   :  { %2317 = vrcp.f32 %v664_v25  ;;  %v676_v63 = vand.u32 2147483648, %v664_v25  ;;  %vm670_vm1 = vweird.f32 %v664_v25  ;;  %v674_v1 = vand.u32 2147483647, %v664_v25 }
 0x7d6   :  { %v968_v24 = vmul.f32 %v2312_v17, %v967_v21  ;;  %2319 = vrcp.f32 %v813_v33  ;;  %v825_v10 = vand.u32 2147483648, %v813_v33  ;;  %vm819_vm6 = vweird.f32 %v813_v33 }
 0x7d7   :  { %v677_v2 = vor.u32 1.1754944e-38, %v676_v63  ;;  %vm675_vm4 = vcmp.eq.f32.partialorder %v674_v1, 8.507059e+37  ;;  %v823_v13 = vand.u32 2147483647, %v813_v33 }
 0x7d8   :  { %v969_v28 = vadd.f32 %v2312_v17, %v968_v24  ;;  %v826_v16 = vor.u32 1.1754944e-38, %v825_v10 }
 0x7d9   :  { %vm824_vm8 = vcmp.eq.f32.partialorder %v823_v13, 8.507059e+37 }
 0x7da   :  { %v973_v43 = vsel %vm972_vm14, %v2312_v17, %v969_v28 }
 0x7db   :  { %v978_v7 = vsel %vm975_vm15, %v977_v44, %v973_v43  ;;  %v2318_v29 = vpop.eup %2317 }
 0x7dc   :  { %v666_v56 = vmul.f32 %v2318_v29, %v664_v25  ;;  %v2320_v57 = vpop.eup %2319  ;;  %vm671_vm0 = vweird.f32 %v2318_v29  ;;  %v981_v20 = vmul.f32 %v978_v7, %v2992_v23 }
 0x7dd   :  { %v815_v58 = vmul.f32 %v2320_v57, %v813_v33  ;;  %vm672_vm2 = vmor %vm670_vm1, %vm671_vm0  ;;  %vm820_vm3 = vweird.f32 %v2320_v57 }
 0x7de   :  { %v667_v47 = vsub.f32 1.0, %v666_v56  ;;  %vm821_vm7 = vmor %vm819_vm6, %vm820_vm3 }
 0x7df   :  { %v816_v60 = vsub.f32 1.0, %v815_v58 }
 0x7e0   :  { %v668_v59 = vmul.f32 %v2318_v29, %v667_v47 }
 0x7e1   :  { %v817_v0 = vmul.f32 %v2320_v57, %v816_v60 }
 0x7e2   :  { %v669_v61 = vadd.f32 %v2318_v29, %v668_v59 }
 0x7e3   :  { %v818_v9 = vadd.f32 %v2320_v57, %v817_v0 }
 0x7e4   :  { %v673_v8 = vsel %vm672_vm2, %v2318_v29, %v669_v61 }
 0x7e5   :  { %v678_v12 = vsel %vm675_vm4, %v677_v2, %v673_v8  ;;  %v822_v15 = vsel %vm821_vm7, %v2320_v57, %v818_v9 }
 0x7e6   :  { %v827_v18 = vsel %vm824_vm8, %v826_v16, %v822_v15  ;;  %v681_v25 = vmul.f32 %v678_v12, %v2996_v27 }
 0x7e7   :  { %v830_v30 = vmul.f32 %v827_v18, %v3000_v31 }
 0x81d   :  { %v984_v45 = vpop.permute.xlu2 %983 }
 0x81e   :  { %v986_v55 = vmul.f32 %v984_v45, %v978_v7 }
 0x820   :  { %988 = vrot.lane.b32.xlu2 %v986_v55, %s2709_s3 }
 0x834   :  { %v684_v11 = vpop.permute.xlu0 %683 }
 0x835   :  { %v686_v14 = vmul.f32 %v684_v11, %v678_v12 }
 0x837   :  { %688 = vrot.lane.b32.xlu0 %v686_v14, %s2709_s3 }
 0x83a   :  { %v833_v17 = vpop.permute.xlu1 %832 }
 0x83b   :  { %v835_v19 = vmul.f32 %v833_v17, %v827_v18 }
 0x83d   :  { %837 = vrot.lane.b32.xlu1 %v835_v19, %s2709_s3 }
 0x87a   :  { %v989_v21 = vpop.permute.xlu2 %988 }
 0x87b   :  { %v3043_v22 = vadd.f32 %v989_v21, %v981_v20 }
 0x87d   :  { %2321 = vtanh.f32 %v3043_v22 }
 0x883   :  { %v2322_v24 = vpop.eup %2321 }
 0x884   :  { %994 = vrot.lane.b32.xlu2 %v2322_v24, %s2708_s21 }
 0x8a9   :  { %v689_v26 = vpop.permute.xlu0 %688 }
 0x8aa   :  { %v3048_v28 = vadd.f32 %v689_v26, %v681_v25 }
 0x8ac   :  { %2323 = vtanh.f32 %v3048_v28 }
 0x8af   :  { %v838_v42 = vpop.permute.xlu1 %837 }
 0x8b0   :  { %v3052_v33 = vadd.f32 %v838_v42, %v830_v30 }
 0x8b2   :  { %2325 = vtanh.f32 %v3052_v33  ;;  %v2324_v23 = vpop.eup %2323 }
 0x8b3   :  { %694 = vrot.lane.b32.xlu0 %v2324_v23, %s2708_s21 }
 0x8b8   :  { %v2326_v43 = vpop.eup %2325 }
 0x8b9   :  { %843 = vrot.lane.b32.xlu1 %v2326_v43, %s2708_s21 }
 0x8de   :  { %v995_v44 = vpop.permute.xlu2 %994 }
 0x8df   :  { %v997_v27 = vmul.f32 %v995_v44, %v978_v7 }
 0x8e1   :  { %1019 = vrot.lane.b32.xlu2 %v997_v27, %s2709_s3 }
 0x925   :  { %v695_v45 = vpop.permute.xlu0 %694 }
 0x926   :  { %v697_v29 = vmul.f32 %v695_v45, %v678_v12 }
 0x928   :  { %699 = vrot.lane.b32.xlu0 %v697_v29, %s2709_s3 }
 0x92b   :  { %v844_v31 = vpop.permute.xlu1 %843 }
 0x92c   :  { %v846_v55 = vmul.f32 %v844_v31, %v827_v18 }
 0x92e   :  { %870 = vrot.lane.b32.xlu1 %v846_v55, %s2709_s3 }
 0x93b   :  { %v1020_v57 = vpop.permute.xlu2 %1019 }
 0x99a   :  { %v700_v56 = vpop.permute.xlu0 %699 }
 0x99b   :  { %703 = vst.msk [vmem:[#allocation3 + $0x2] sm:$0x3] %vm468_vm11, %v700_v56  ;;  %2192 = vmatmul.msk.f32.vlgmr.msra.gmra.mxu3 %vm236_vm5, %v700_v56 }
 0x99c   :  { %1244 = vmatpush.msra.mxu3 %v2850_v34 }
 0x99e   :  { %1245 = vmatpush.msra.mxu3 %v2852_v35 }
 0x9a0   :  { %v871_v7 = vpop.permute.xlu1 %870  ;;  %1246 = vmatpush.msra.mxu3 %v2856_v36 }
 0x9a1   :  { %2193 = vmatmul.msk.f32.vlgmr.msrb.gmra.mxu0 %vm236_vm5, %v871_v7  ;;  %2197 = vmatmul.msk.f32.vlgmr.msrb.gmra.mxu2 %vm236_vm5, %v871_v7 }
 0x9a2   :  { %1269 = vmatpush.msrb.mxu0 %v2864_v38  ;;  %1354 = vmatpush.msrb.mxu2 %v2912_v49 }
 0x9a3   :  { %2198 = vmatmul.msk.f32.vlgmr.msrb.gmra.mxu3 %vm236_vm5, %v1020_v57 }
 0x9a4   :  { %1270 = vmatpush.msrb.mxu0 %v2869_v39  ;;  %1247 = vmatpush.msra.mxu3 %v2860_v37 }
 0x9a5   :  { %1355 = vmatpush.msrb.mxu2 %v2918_v50 }
 0x9a6   :  { %1271 = vmatpush.msrb.mxu0 %v2873_v40  ;;  %1420 = vmatpush.msrb.mxu3 %v2824_v3 }
 0x9a7   :  { %1356 = vmatpush.msrb.mxu2 %v2925_v52 }
 0x9a8   :  { %1272 = vmatpush.msrb.mxu0 %v2877_v41  ;;  %1421 = vmatpush.msrb.mxu3 %v2826_v4 }
 0x9a9   :  { %2203 = vmatmul.msk.f32.vlgmr.msra.gmra.mxu2 %vm236_vm5, %v1020_v57 }
 0x9aa   :  { %1422 = vmatpush.msrb.mxu3 %v2829_v5  ;;  %1357 = vmatpush.msrb.mxu2 %v2932_v54 }
 0x9ac   :  { %1563 = vmatpush.msra.mxu2 %v2910_v48  ;;  %1423 = vmatpush.msrb.mxu3 %v2833_v6  ;;  %v1173_v6 = vld [vmem:[#allocation2 + $0x8] sm:$0x3] }
 0x9ae   :  { %1564 = vmatpush.msra.mxu2 %v2916_v32 }
 0x9b0   :  { %1565 = vmatpush.msra.mxu2 %v2921_v51 }
 0x9b2   :  { %1566 = vmatpush.msra.mxu2 %v2928_v53 }
 0xa1e   :  { %v891_v3 = vpop.f32.mrf.mxu0  ;;  %v866_v34 = vpop.f32.mrf.mxu3 }
 0xa1f   :  { %v892_v35 = vadd.f32 %v891_v3, %v866_v34 }
 0xa21   :  { %v894_v4 = vadd.f32 %v2981_v62, %v892_v35 }
 0xa23   :  { %2327 = vtanh.f32 %v894_v4  ;;  %v2194_v61 = vmul.f32 -1.442695, %v894_v4 }
 0xa24   :  { %v1015_v36 = vpop.f32.mrf.mxu2 }
 0xa26   :  { %v1040_v5 = vpop.f32.mrf.mxu3 }
 0xa27   :  { %v1041_v37 = vadd.f32 %v1040_v5, %v1015_v36 }
 0xa29   :  { %v2328_v38 = vpop.eup %2327  ;;  %v1043_v39 = vadd.f32 %v2893_v46, %v1041_v37 }
 0xa2a   :  { %917 = vrot.lane.b32.xlu0 %v2328_v38, %s2708_s21 }
 0xa2b   :  { %2329 = vtanh.f32 %v1043_v39  ;;  %v2199_v46 = vmul.f32 -1.442695, %v1043_v39 }
 0xa2c   :  { %v1191_v40 = vpop.f32.mrf.mxu2 }
 0xa2d   :  { %v1194_v41 = vadd.f32 %v1191_v40, %v1173_v6 }
 0xa2f   :  { %2331 = vtanh.f32 %v1194_v41  ;;  %v2204_v59 = vmul.f32 -1.442695, %v1194_v41 }
 0xa31   :  { %v2330_v47 = vpop.eup %2329  ;;  %2333 = vpow2.f32 %v2204_v59 }
 0xa32   :  { %1066 = vrot.lane.b32.xlu1 %v2330_v47, %s2708_s21  ;;  %2335 = vpow2.f32 %v2194_v61 }
 0xa35   :  { %v2332_v58 = vpop.eup %2331 }
 0xa36   :  { %1217 = vrot.lane.b32.xlu2 %v2332_v58, %s2708_s21 }
 0xa37   :  { %v2334_v60 = vpop.eup %2333 }
 0xa38   :  { %v1198_v63 = vadd.f32 1.0, %v2334_v60  ;;  %v2336_v0 = vpop.eup %2335 }
 0xa39   :  { %v898_v8 = vadd.f32 1.0, %v2336_v0 }
 0xa3a   :  { %2337 = vrcp.f32 %v1198_v63  ;;  %v1210_v16 = vand.u32 2147483648, %v1198_v63  ;;  %vm1204_vm10 = vweird.f32 %v1198_v63  ;;  %v1208_v17 = vand.u32 2147483647, %v1198_v63 }
 0xa3b   :  { %2339 = vpow2.f32 %v2199_v46  ;;  %v910_v44 = vand.u32 2147483648, %v898_v8  ;;  %vm904_vm15 = vweird.f32 %v898_v8  ;;  %v908_v27 = vand.u32 2147483647, %v898_v8 }
 0xa3c   :  { %2341 = vrcp.f32 %v898_v8  ;;  %v1211_v21 = vor.u32 1.1754944e-38, %v1210_v16  ;;  %vm1209_vm13 = vcmp.eq.f32.partialorder %v1208_v17, 8.507059e+37  ;;  %v3132_v16 = vld [vmem:[#allocation9 + $0x18] sm:$0xff]  ;;  %v3136_v17 = vld [vmem:[#allocation10 + $0x10] sm:$0xff] }
 0xa3d   :  { %v911_v31 = vor.u32 1.1754944e-38, %v910_v44  ;;  %vm909_vm1 = vcmp.eq.f32.partialorder %v908_v27, 8.507059e+37 }
 0xa40   :  { %v2338_v1 = vpop.eup %2337 }
 0xa41   :  { %v1200_v2 = vmul.f32 %v2338_v1, %v1198_v63  ;;  %v2340_v9 = vpop.eup %2339  ;;  %vm1205_vm9 = vweird.f32 %v2338_v1 }
 0xa42   :  { %v1047_v11 = vadd.f32 1.0, %v2340_v9  ;;  %v2342_v13 = vpop.eup %2341  ;;  %vm1206_vm12 = vmor %vm1204_vm10, %vm1205_vm9  ;;  %v3114_v9 = vld [vmem:[#allocation12 + $0x18] sm:$0xff] }
 0xa43   :  { %v1201_v10 = vsub.f32 1.0, %v1200_v2  ;;  %v900_v15 = vmul.f32 %v2342_v13, %v898_v8  ;;  %vm905_vm14 = vweird.f32 %v2342_v13 }
 0xa44   :  { %2343 = vrcp.f32 %v1047_v11  ;;  %vm906_vm0 = vmor %vm904_vm15, %vm905_vm14  ;;  %v1059_v3 = vand.u32 2147483648, %v1047_v11  ;;  %vm1053_vm3 = vweird.f32 %v1047_v11  ;;  %v1057_v34 = vand.u32 2147483647, %v1047_v11 }
 0xa45   :  { %v1202_v12 = vmul.f32 %v2338_v1, %v1201_v10  ;;  %v901_v19 = vsub.f32 1.0, %v900_v15  ;;  %v3117_v10 = vld [vmem:[#allocation12 + $0x10] sm:$0xff]  ;;  %v3129_v15 = vld [vmem:[#allocation10 + $0x18] sm:$0xff] }
 0xa46   :  { %v1060_v4 = vor.u32 1.1754944e-38, %v1059_v3  ;;  %vm1058_vm6 = vcmp.eq.f32.partialorder %v1057_v34, 8.507059e+37 }
 0xa47   :  { %v1203_v14 = vadd.f32 %v2338_v1, %v1202_v12  ;;  %v902_v30 = vmul.f32 %v2342_v13, %v901_v19  ;;  %v3143_v19 = vld [vmem:[#allocation10 + $0x8] sm:$0xff] }
 0xa49   :  { %v1207_v18 = vsel %vm1206_vm12, %v2338_v1, %v1203_v14  ;;  %v903_v23 = vadd.f32 %v2342_v13, %v902_v30 }
 0xa4a   :  { %v2344_v20 = vpop.eup %2343  ;;  %v1212_v25 = vsel %vm1209_vm13, %v1211_v21, %v1207_v18  ;;  %v3139_v18 = vld [vmem:[#allocation9 + $0x10] sm:$0xff]  ;;  %v3154_v21 = vld [vmem:[#allocation9] sm:$0xff] }
 0xa4b   :  { %v1049_v42 = vmul.f32 %v2344_v20, %v1047_v11  ;;  %v907_v45 = vsel %vm906_vm0, %v2342_v13, %v903_v23  ;;  %vm1054_vm2 = vweird.f32 %v2344_v20  ;;  %v1215_v38 = vmul.f32 %v1212_v25, %v3043_v22  ;;  %v3120_v11 = vld [vmem:[#allocation12 + $0x8] sm:$0xff]  ;;  %v3123_v13 = vld [vmem:[#allocation12] sm:$0xff] }
 0xa4c   :  { %v912_v56 = vsel %vm909_vm1, %v911_v31, %v907_v45  ;;  %vm1055_vm4 = vmor %vm1053_vm3, %vm1054_vm2 }
 0xa4d   :  { %v1050_v43 = vsub.f32 1.0, %v1049_v42  ;;  %v915_v41 = vmul.f32 %v912_v56, %v3048_v28 }
 0xa4f   :  { %v1051_v29 = vmul.f32 %v2344_v20, %v1050_v43 }
 0xa51   :  { %v1052_v57 = vadd.f32 %v2344_v20, %v1051_v29 }
 0xa53   :  { %v1056_v35 = vsel %vm1055_vm4, %v2344_v20, %v1052_v57  ;;  %v3146_v20 = vld [vmem:[#allocation9 + $0x8] sm:$0xff] }
 0xa54   :  { %v1061_v5 = vsel %vm1058_vm6, %v1060_v4, %v1056_v35 }
 0xa55   :  { %v1064_v59 = vmul.f32 %v1061_v5, %v3052_v33 }
 0xa90   :  { %v1218_v24 = vpop.permute.xlu2 %1217 }
 0xa91   :  { %v1220_v26 = vmul.f32 %v1218_v24, %v1212_v25 }
 0xa93   :  { %1222 = vrot.lane.b32.xlu2 %v1220_v26, %s2709_s3 }
 0xa9c   :  { %v918_v55 = vpop.permute.xlu0 %917 }
 0xa9d   :  { %v920_v7 = vmul.f32 %v918_v55, %v912_v56 }
 0xa9f   :  { %922 = vrot.lane.b32.xlu0 %v920_v7, %s2709_s3 }
 0xaa4   :  { %v1067_v36 = vpop.permute.xlu1 %1066 }
 0xaa5   :  { %v1069_v37 = vmul.f32 %v1067_v36, %v1061_v5 }
 0xaa7   :  { %1071 = vrot.lane.b32.xlu1 %v1069_v37, %s2709_s3 }
 0xaed   :  { %v1223_v39 = vpop.permute.xlu2 %1222 }
 0xaee   :  { %v3095_v6 = vadd.f32 %v1223_v39, %v1215_v38 }
 0xaf0   :  { %2345 = vtanh.f32 %v3095_v6 }
 0xaf6   :  { %v2346_v40 = vpop.eup %2345 }
 0xaf7   :  { %1228 = vrot.lane.b32.xlu2 %v2346_v40, %s2708_s21 }
 0xb11   :  { %v923_v47 = vpop.permute.xlu0 %922 }
 0xb12   :  { %v3100_v58 = vadd.f32 %v923_v47, %v915_v41 }
 0xb14   :  { %2347 = vtanh.f32 %v3100_v58 }
 0xb19   :  { %v1072_v60 = vpop.permute.xlu1 %1071 }
 0xb1a   :  { %v2348_v61 = vpop.eup %2347  ;;  %v3104_v22 = vadd.f32 %v1072_v60, %v1064_v59 }
 0xb1b   :  { %928 = vrot.lane.b32.xlu0 %v2348_v61, %s2708_s21 }
 0xb1c   :  { %2349 = vtanh.f32 %v3104_v22 }
 0xb22   :  { %v2350_v63 = vpop.eup %2349 }
 0xb23   :  { %1077 = vrot.lane.b32.xlu1 %v2350_v63, %s2708_s21 }
 0xb51   :  { %v1229_v46 = vpop.permute.xlu2 %1228 }
 0xb52   :  { %v1231_v28 = vmul.f32 %v1229_v46, %v1212_v25 }
 0xb54   :  { %1253 = vrot.lane.b32.xlu2 %v1231_v28, %s2709_s3 }
 0xb8d   :  { %v929_v0 = vpop.permute.xlu0 %928 }
 0xb8e   :  { %v931_v1 = vmul.f32 %v929_v0, %v912_v56 }
 0xb90   :  { %933 = vrot.lane.b32.xlu0 %v931_v1, %s2709_s3 }
 0xb95   :  { %v1078_v33 = vpop.permute.xlu1 %1077 }
 0xb96   :  { %v1080_v8 = vmul.f32 %v1078_v33, %v1061_v5 }
 0xb98   :  { %1104 = vrot.lane.b32.xlu1 %v1080_v8, %s2709_s3 }
 0xbae   :  { %v1254_v14 = vpop.permute.xlu2 %1253 }
 0xc02   :  { %v934_v2 = vpop.permute.xlu0 %933 }
 0xc03   :  { %937 = vst.msk [vmem:[#allocation3 + $0x4] sm:$0x3] %vm468_vm11, %v934_v2  ;;  %2200 = vmatmul.msk.f32.vlgmr.msra.gmra.mxu0 %vm236_vm5, %v934_v2 }
 0xc04   :  { %1478 = vmatpush.msra.mxu0 %v3114_v9 }
 0xc06   :  { %1479 = vmatpush.msra.mxu0 %v3117_v10 }
 0xc08   :  { %1480 = vmatpush.msra.mxu0 %v3120_v11 }
 0xc0a   :  { %v1105_v12 = vpop.permute.xlu1 %1104  ;;  %1481 = vmatpush.msra.mxu0 %v3123_v13 }
 0xc0b   :  { %2201 = vmatmul.msk.f32.vlgmr.msrb.gmra.mxu1 %vm236_vm5, %v1105_v12  ;;  %2205 = vmatmul.msk.f32.vlgmr.msra.gmra.mxu3 %vm236_vm5, %v1105_v12 }
 0xc0c   :  { %2206 = vmatmul.msk.f32.vlgmr.msrb.gmra.mxu0 %vm236_vm5, %v1254_v14  ;;  %1503 = vmatpush.msrb.mxu1 %v3129_v15 }
 0xc0d   :  { %1654 = vmatpush.msrb.mxu0 %v3132_v16  ;;  %1588 = vmatpush.msra.mxu3 %v2912_v49  ;;  %v3150_v49 = vld [vmem:[#allocation10] sm:$0xff] }
 0xc0e   :  { %1504 = vmatpush.msrb.mxu1 %v3136_v17 }
 0xc0f   :  { %1655 = vmatpush.msrb.mxu0 %v3139_v18  ;;  %1589 = vmatpush.msra.mxu3 %v2918_v50 }
 0xc10   :  { %1505 = vmatpush.msrb.mxu1 %v3143_v19 }
 0xc11   :  { %1656 = vmatpush.msrb.mxu0 %v3146_v20  ;;  %1590 = vmatpush.msra.mxu3 %v2925_v52 }
 0xc12   :  { %1506 = vmatpush.msrb.mxu1 %v3150_v49 }
 0xc13   :  { %2211 = vmatmul.msk.f32.vlgmr.msrb.gmra.mxu3 %vm236_vm5, %v1254_v14  ;;  %1657 = vmatpush.msrb.mxu0 %v3154_v21 }
 0xc14   :  { %1591 = vmatpush.msra.mxu3 %v2932_v54  ;;  %v3166_v54 = vld [vmem:[%s3342_s6] ss:$0 sm:$0xff] }
 0xc16   :  { %1797 = vmatpush.msrb.mxu3 %v2910_v48 }
 0xc18   :  { %1798 = vmatpush.msrb.mxu3 %v2916_v32 }
 0xc1a   :  { %1799 = vmatpush.msrb.mxu3 %v2921_v51  ;;  %v1407_v51 = vld [vmem:[#allocation2 + $0xa] sm:$0x3] }
 0xc1c   :  { %1800 = vmatpush.msrb.mxu3 %v2928_v53 }
 0xc80   :  { %v1100_v50 = vpop.f32.mrf.mxu0 }
 0xc88   :  { %v1125_v52 = vpop.f32.mrf.mxu1 }
 0xc89   :  { %v1126_v24 = vadd.f32 %v1125_v52, %v1100_v50  ;;  %v1274_v26 = vpop.f32.mrf.mxu0 }
 0xc8b   :  { %v1128_v25 = vadd.f32 %v2981_v62, %v1126_v24 }
 0xc8d   :  { %2351 = vtanh.f32 %v1128_v25  ;;  %v2202_v45 = vmul.f32 -1.442695, %v1128_v25 }
 0xc8e   :  { %v1249_v30 = vpop.f32.mrf.mxu3 }
 0xc8f   :  { %v1275_v42 = vadd.f32 %v1274_v26, %v1249_v30 }
 0xc91   :  { %v1277_v48 = vadd.f32 %v3166_v54, %v1275_v42 }
 0xc93   :  { %v2352_v32 = vpop.eup %2351  ;;  %2353 = vtanh.f32 %v1277_v48  ;;  %v2207_v31 = vmul.f32 -1.442695, %v1277_v48 }
 0xc94   :  { %1151 = vrot.lane.b32.xlu0 %v2352_v32, %s2708_s21 }
 0xc96   :  { %v1425_v53 = vpop.f32.mrf.mxu3 }
 0xc97   :  { %v1428_v23 = vadd.f32 %v1425_v53, %v1407_v51 }
 0xc99   :  { %v2354_v43 = vpop.eup %2353  ;;  %2355 = vtanh.f32 %v1428_v23  ;;  %v2212_v44 = vmul.f32 -1.442695, %v1428_v23 }
 0xc9a   :  { %1300 = vrot.lane.b32.xlu1 %v2354_v43, %s2708_s21 }
 0xc9b   :  { %2357 = vpow2.f32 %v2212_v44 }
 0xc9c   :  { %2359 = vpow2.f32 %v2202_v45 }
 0xc9f   :  { %v2356_v62 = vpop.eup %2355 }
 0xca0   :  { %1451 = vrot.lane.b32.xlu2 %v2356_v62, %s2708_s21 }
 0xca1   :  { %v2358_v27 = vpop.eup %2357 }
 0xca2   :  { %v1432_v29 = vadd.f32 1.0, %v2358_v27  ;;  %v2360_v55 = vpop.eup %2359 }
 0xca3   :  { %v1132_v7 = vadd.f32 1.0, %v2360_v55 }
 0xca4   :  { %2361 = vrcp.f32 %v1432_v29  ;;  %v1444_v38 = vand.u32 2147483648, %v1432_v29  ;;  %vm1438_vm8 = vweird.f32 %v1432_v29  ;;  %v1442_v39 = vand.u32 2147483647, %v1432_v29 }
 0xca5   :  { %2363 = vpow2.f32 %v2207_v31  ;;  %v1144_v33 = vand.u32 2147483648, %v1132_v7  ;;  %vm1138_vm13 = vweird.f32 %v1132_v7  ;;  %v1142_v8 = vand.u32 2147483647, %v1132_v7 }
 0xca6   :  { %2365 = vrcp.f32 %v1132_v7  ;;  %v1445_v59 = vor.u32 1.1754944e-38, %v1444_v38  ;;  %vm1443_vm10 = vcmp.eq.f32.partialorder %v1442_v39, 8.507059e+37  ;;  %v3208_v38 = vld [vmem:[#allocation13 + $0x10] sm:$0xff]  ;;  %v3213_v39 = vld [vmem:[#allocation13 + $0x8] sm:$0xff] }
 0xca7   :  { %v1145_v14 = vor.u32 1.1754944e-38, %v1144_v33  ;;  %vm1143_vm15 = vcmp.eq.f32.partialorder %v1142_v8, 8.507059e+37 }
 0xcaa   :  { %v2362_v56 = vpop.eup %2361 }
 0xcab   :  { %v1434_v57 = vmul.f32 %v2362_v56, %v1432_v29  ;;  %v2364_v3 = vpop.eup %2363  ;;  %vm1439_vm7 = vweird.f32 %v2362_v56 }
 0xcac   :  { %v1281_v35 = vadd.f32 1.0, %v2364_v3  ;;  %v2366_v36 = vpop.eup %2365  ;;  %vm1440_vm9 = vmor %vm1438_vm8, %vm1439_vm7 }
 0xcad   :  { %v1435_v34 = vsub.f32 1.0, %v1434_v57  ;;  %v1134_v37 = vmul.f32 %v2366_v36, %v1132_v7  ;;  %vm1139_vm12 = vweird.f32 %v2366_v36 }
 0xcae   :  { %2367 = vrcp.f32 %v1281_v35  ;;  %vm1140_vm14 = vmor %vm1138_vm13, %vm1139_vm12  ;;  %v1293_v25 = vand.u32 2147483648, %v1281_v35  ;;  %vm1287_vm1 = vweird.f32 %v1281_v35  ;;  %v1291_v30 = vand.u32 2147483647, %v1281_v35 }
 0xcaf   :  { %v1436_v4 = vmul.f32 %v2362_v56, %v1435_v34  ;;  %v1135_v47 = vsub.f32 1.0, %v1134_v37  ;;  %v3203_v37 = vld [vmem:[#allocation13 + $0x18] sm:$0xff] }
 0xcb0   :  { %v1294_v48 = vor.u32 1.1754944e-38, %v1293_v25  ;;  %vm1292_vm3 = vcmp.eq.f32.partialorder %v1291_v30, 8.507059e+37 }
 0xcb1   :  { %v1437_v5 = vadd.f32 %v2362_v56, %v1436_v4  ;;  %v1136_v28 = vmul.f32 %v2366_v36, %v1135_v47  ;;  %v2467_v47 = vld [vmem:[#allocation15] sm:$0xff] }
 0xcb3   :  { %v1441_v41 = vsel %vm1440_vm9, %v2362_v56, %v1437_v5  ;;  %v1137_v1 = vadd.f32 %v2366_v36, %v1136_v28  ;;  %v1641_v28 = vld [vmem:[#allocation2 + $0xc] sm:$0x3] }
 0xcb4   :  { %v2368_v40 = vpop.eup %2367  ;;  %v1446_v63 = vsel %vm1443_vm10, %v1445_v59, %v1441_v41  ;;  %v2466_v41 = vld [vmem:[#allocation15 + $0x8] sm:$0xff] }
 0xcb5   :  { %v1283_v60 = vmul.f32 %v2368_v40, %v1281_v35  ;;  %v1141_v12 = vsel %vm1140_vm14, %v2366_v36, %v1137_v1  ;;  %vm1288_vm0 = vweird.f32 %v2368_v40  ;;  %v1449_v23 = vmul.f32 %v1446_v63, %v3095_v6  ;;  %v3227_v1 = vld [vmem:[%s3345_s9] ss:$0 sm:$0xff] }
 0xcb6   :  { %v1146_v24 = vsel %vm1143_vm15, %v1145_v14, %v1141_v12  ;;  %vm1289_vm2 = vmor %vm1287_vm1, %vm1288_vm0 }
 0xcb7   :  { %v1284_v0 = vsub.f32 1.0, %v1283_v60  ;;  %v1149_v27 = vmul.f32 %v1146_v24, %v3100_v58 }
 0xcb9   :  { %v1285_v2 = vmul.f32 %v2368_v40, %v1284_v0 }
 0xcbb   :  { %v1286_v50 = vadd.f32 %v2368_v40, %v1285_v2 }
 0xcbd   :  { %v1290_v42 = vsel %vm1289_vm2, %v2368_v40, %v1286_v50  ;;  %v2464_v40 = vld [vmem:[#allocation15 + $0x18] sm:$0xff] }
 0xcbe   :  { %v1295_v51 = vsel %vm1292_vm3, %v1294_v48, %v1290_v42 }
 0xcbf   :  { %v1298_v31 = vmul.f32 %v1295_v51, %v3104_v22 }
 0xcfa   :  { %v1452_v61 = vpop.permute.xlu2 %1451 }
 0xcfb   :  { %v1454_v46 = vmul.f32 %v1452_v61, %v1446_v63 }
 0xcfd   :  { %1456 = vrot.lane.b32.xlu2 %v1454_v46, %s2709_s3 }
 0xd06   :  { %v1152_v52 = vpop.permute.xlu0 %1151 }
 0xd07   :  { %v1154_v26 = vmul.f32 %v1152_v52, %v1146_v24 }
 0xd09   :  { %1156 = vrot.lane.b32.xlu0 %v1154_v26, %s2709_s3 }
 0xd0c   :  { %v1301_v32 = vpop.permute.xlu1 %1300 }
 0xd0d   :  { %v1303_v53 = vmul.f32 %v1301_v32, %v1295_v51 }
 0xd0f   :  { %1305 = vrot.lane.b32.xlu1 %v1303_v53, %s2709_s3 }
 0xd57   :  { %v1457_v43 = vpop.permute.xlu2 %1456 }
 0xd58   :  { %v3176_v62 = vadd.f32 %v1457_v43, %v1449_v23 }
 0xd5a   :  { %2369 = vtanh.f32 %v3176_v62 }
 0xd60   :  { %v2370_v44 = vpop.eup %2369 }
 0xd61   :  { %1462 = vrot.lane.b32.xlu2 %v2370_v44, %s2708_s21 }
 0xd7b   :  { %v1157_v45 = vpop.permute.xlu0 %1156 }
 0xd7c   :  { %v3181_v29 = vadd.f32 %v1157_v45, %v1149_v27 }
 0xd7e   :  { %2371 = vtanh.f32 %v3181_v29 }
 0xd81   :  { %v1306_v55 = vpop.permute.xlu1 %1305 }
 0xd82   :  { %v3185_v56 = vadd.f32 %v1306_v55, %v1298_v31 }
 0xd84   :  { %v2372_v6 = vpop.eup %2371  ;;  %2373 = vtanh.f32 %v3185_v56 }
 0xd85   :  { %1162 = vrot.lane.b32.xlu0 %v2372_v6, %s2708_s21 }
 0xd8a   :  { %v2374_v7 = vpop.eup %2373 }
 0xd8b   :  { %1311 = vrot.lane.b32.xlu1 %v2374_v7, %s2708_s21 }
 0xdbb   :  { %v1463_v57 = vpop.permute.xlu2 %1462 }
 0xdbc   :  { %v1465_v58 = vmul.f32 %v1463_v57, %v1446_v63 }
 0xdbe   :  { %1487 = vrot.lane.b32.xlu2 %v1465_v58, %s2709_s3 }
 0xdf7   :  { %v1163_v3 = vpop.permute.xlu0 %1162 }
 0xdf8   :  { %v1165_v34 = vmul.f32 %v1163_v3, %v1146_v24 }
 0xdfa   :  { %1167 = vrot.lane.b32.xlu0 %v1165_v34, %s2709_s3 }
 0xdfd   :  { %v1312_v22 = vpop.permute.xlu1 %1311 }
 0xdfe   :  { %v1314_v35 = vmul.f32 %v1312_v22, %v1295_v51 }
 0xe00   :  { %1338 = vrot.lane.b32.xlu1 %v1314_v35, %s2709_s3 }
 0xe18   :  { %v1488_v5 = vpop.permute.xlu2 %1487 }
 0xe6c   :  { %v1168_v4 = vpop.permute.xlu0 %1167 }
 0xe6d   :  { %1171 = vst.msk [vmem:[#allocation3 + $0x6] sm:$0x3] %vm468_vm11, %v1168_v4  ;;  %2208 = vmatmul.msk.f32.vlgmr.msra.gmra.mxu1 %vm236_vm5, %v1168_v4 }
 0xe6e   :  { %1712 = vmatpush.msra.mxu1 %v3114_v9 }
 0xe70   :  { %1713 = vmatpush.msra.mxu1 %v3117_v10 }
 0xe72   :  { %v1339_v36 = vpop.permute.xlu1 %1338  ;;  %1714 = vmatpush.msra.mxu1 %v3120_v11 }
 0xe73   :  { %2209 = vmatmul.msk.f32.vlgmr.msrb.gmra.mxu2 %vm236_vm5, %v1339_v36  ;;  %2213 = vmatmul.msk.f32.vlgmr.msra.gmra.mxu0 %vm236_vm5, %v1339_v36 }
 0xe74   :  { %1715 = vmatpush.msra.mxu1 %v3123_v13  ;;  %1737 = vmatpush.msrb.mxu2 %v3129_v15 }
 0xe75   :  { %2214 = vmatmul.msk.f32.vlgmr.msrb.gmra.mxu1 %vm236_vm5, %v1488_v5  ;;  %1822 = vmatpush.msra.mxu0 %v3203_v37 }
 0xe76   :  { %1888 = vmatpush.msrb.mxu1 %v3132_v16  ;;  %1738 = vmatpush.msrb.mxu2 %v3136_v17  ;;  %v3220_v16 = vld [vmem:[#allocation13] sm:$0xff] }
 0xe77   :  { %1823 = vmatpush.msra.mxu0 %v3208_v38 }
 0xe78   :  { %1889 = vmatpush.msrb.mxu1 %v3139_v18  ;;  %1739 = vmatpush.msrb.mxu2 %v3143_v19  ;;  %v2465_v18 = vld [vmem:[#allocation15 + $0x10] sm:$0xff] }
 0xe79   :  { %1824 = vmatpush.msra.mxu0 %v3213_v39 }
 0xe7a   :  { %1890 = vmatpush.msrb.mxu1 %v3146_v20  ;;  %1740 = vmatpush.msrb.mxu2 %v3150_v49 }
 0xe7b   :  { %2219 = vmatmul.msk.f32.vlgmr.msrb.gmra.mxu0 %vm236_vm5, %v1488_v5 }
 0xe7c   :  { %1891 = vmatpush.msrb.mxu1 %v3154_v21  ;;  %1825 = vmatpush.msra.mxu0 %v3220_v16 }
 0xe7e   :  { %2031 = vmatpush.msrb.mxu0 %v2464_v40 }
 0xe80   :  { %2032 = vmatpush.msrb.mxu0 %v2465_v18 }
 0xe82   :  { %2033 = vmatpush.msrb.mxu0 %v2466_v41 }
 0xe84   :  { %2034 = vmatpush.msrb.mxu0 %v2467_v47 }
 0xeea   :  { %v1334_v59 = vpop.f32.mrf.mxu1 }
 0xef0   :  { %v1483_v20 = vpop.f32.mrf.mxu0 }
 0xef2   :  { %v1508_v60 = vpop.f32.mrf.mxu1 }
 0xef3   :  { %v1509_v61 = vadd.f32 %v1508_v60, %v1483_v20 }
 0xef5   :  { %v1511_v63 = vadd.f32 %v3166_v54, %v1509_v61 }
 0xef6   :  { %v1359_v46 = vpop.f32.mrf.mxu2 }
 0xef7   :  { %2375 = vtanh.f32 %v1511_v63  ;;  %v1360_v21 = vadd.f32 %v1359_v46, %v1334_v59  ;;  %v2215_v25 = vmul.f32 -1.442695, %v1511_v63 }
 0xef8   :  { %v1659_v0 = vpop.f32.mrf.mxu0 }
 0xef9   :  { %v1362_v33 = vadd.f32 %v3227_v1, %v1360_v21  ;;  %v1662_v8 = vadd.f32 %v1659_v0, %v1641_v28 }
 0xefb   :  { %2377 = vtanh.f32 %v1362_v33  ;;  %v2220_v50 = vmul.f32 -1.442695, %v1662_v8  ;;  %v2210_v30 = vmul.f32 -1.442695, %v1362_v33 }
 0xefc   :  { %2379 = vtanh.f32 %v1662_v8 }
 0xefd   :  { %v2376_v2 = vpop.eup %2375  ;;  %2381 = vpow2.f32 %v2220_v50 }
 0xefe   :  { %1534 = vrot.lane.b32.xlu1 %v2376_v2, %s2708_s21 }
 0xf01   :  { %v2378_v12 = vpop.eup %2377 }
 0xf02   :  { %v2380_v14 = vpop.eup %2379  ;;  %1385 = vrot.lane.b32.xlu0 %v2378_v12, %s2708_s21 }
 0xf03   :  { %1685 = vrot.lane.b32.xlu2 %v2380_v14, %s2708_s21  ;;  %v2382_v52 = vpop.eup %2381 }
 0xf04   :  { %v1666_v24 = vadd.f32 1.0, %v2382_v52 }
 0xf06   :  { %2383 = vrcp.f32 %v1666_v24  ;;  %v1678_v27 = vand.u32 2147483648, %v1666_v24  ;;  %vm1672_vm6 = vweird.f32 %v1666_v24  ;;  %v1676_v45 = vand.u32 2147483647, %v1666_v24 }
 0xf07   :  { %2385 = vpow2.f32 %v2215_v25 }
 0xf08   :  { %2387 = vpow2.f32 %v2210_v30  ;;  %v1679_v6 = vor.u32 1.1754944e-38, %v1678_v27  ;;  %vm1677_vm8 = vcmp.eq.f32.partialorder %v1676_v45, 8.507059e+37 }
 0xf0c   :  { %v2384_v26 = vpop.eup %2383 }
 0xf0d   :  { %v1668_v42 = vmul.f32 %v2384_v26, %v1666_v24  ;;  %v2386_v48 = vpop.eup %2385  ;;  %vm1673_vm4 = vweird.f32 %v2384_v26 }
 0xf0e   :  { %v1515_v51 = vadd.f32 1.0, %v2386_v48  ;;  %v2388_v53 = vpop.eup %2387  ;;  %vm1674_vm7 = vmor %vm1672_vm6, %vm1673_vm4 }
 0xf0f   :  { %v1669_v32 = vsub.f32 1.0, %v1668_v42  ;;  %v1366_v43 = vadd.f32 1.0, %v2388_v53 }
 0xf10   :  { %2389 = vrcp.f32 %v1515_v51  ;;  %v1527_v18 = vand.u32 2147483648, %v1515_v51  ;;  %vm1521_vm10 = vweird.f32 %v1515_v51  ;;  %v1525_v41 = vand.u32 2147483647, %v1515_v51 }
 0xf11   :  { %v1670_v23 = vmul.f32 %v2384_v26, %v1669_v32  ;;  %2391 = vrcp.f32 %v1366_v43  ;;  %v1378_v60 = vand.u32 2147483648, %v1366_v43  ;;  %vm1372_vm15 = vweird.f32 %v1366_v43 }
 0xf12   :  { %v1528_v20 = vor.u32 1.1754944e-38, %v1527_v18  ;;  %vm1526_vm14 = vcmp.eq.f32.partialorder %v1525_v41, 8.507059e+37  ;;  %v1376_v61 = vand.u32 2147483647, %v1366_v43 }
 0xf13   :  { %v1671_v44 = vadd.f32 %v2384_v26, %v1670_v23  ;;  %v1379_v0 = vor.u32 1.1754944e-38, %v1378_v60 }
 0xf14   :  { %vm1377_vm1 = vcmp.eq.f32.partialorder %v1376_v61, 8.507059e+37 }
 0xf15   :  { %v1675_v55 = vsel %vm1674_vm7, %v2384_v26, %v1671_v44 }
 0xf16   :  { %v2390_v31 = vpop.eup %2389  ;;  %v1680_v57 = vsel %vm1677_vm8, %v1679_v6, %v1675_v55 }
 0xf17   :  { %v1517_v58 = vmul.f32 %v2390_v31, %v1515_v51  ;;  %v2392_v3 = vpop.eup %2391  ;;  %vm1522_vm9 = vweird.f32 %v2390_v31  ;;  %v1683_v12 = vmul.f32 %v1680_v57, %v3176_v62 }
 0xf18   :  { %v1368_v35 = vmul.f32 %v2392_v3, %v1366_v43  ;;  %vm1523_vm12 = vmor %vm1521_vm10, %vm1522_vm9  ;;  %vm1373_vm13 = vweird.f32 %v2392_v3 }
 0xf19   :  { %v1518_v22 = vsub.f32 1.0, %v1517_v58  ;;  %vm1374_vm0 = vmor %vm1372_vm15, %vm1373_vm13 }
 0xf1a   :  { %v1369_v36 = vsub.f32 1.0, %v1368_v35 }
 0xf1b   :  { %v1519_v4 = vmul.f32 %v2390_v31, %v1518_v22 }
 0xf1c   :  { %v1370_v40 = vmul.f32 %v2392_v3, %v1369_v36 }
 0xf1d   :  { %v1520_v5 = vadd.f32 %v2390_v31, %v1519_v4 }
 0xf1e   :  { %v1371_v59 = vadd.f32 %v2392_v3, %v1370_v40 }
 0xf1f   :  { %v1524_v47 = vsel %vm1523_vm12, %v2390_v31, %v1520_v5 }
 0xf20   :  { %v1529_v46 = vsel %vm1526_vm14, %v1528_v20, %v1524_v47  ;;  %v1375_v28 = vsel %vm1374_vm0, %v2392_v3, %v1371_v59 }
 0xf21   :  { %v1380_v8 = vsel %vm1377_vm1, %v1379_v0, %v1375_v28  ;;  %v1532_v24 = vmul.f32 %v1529_v46, %v3185_v56 }
 0xf22   :  { %v1383_v30 = vmul.f32 %v1380_v8, %v3181_v29 }
 0xf5d   :  { %v1686_v7 = vpop.permute.xlu2 %1685 }
 0xf5e   :  { %v1688_v34 = vmul.f32 %v1686_v7, %v1680_v57 }
 0xf60   :  { %1690 = vrot.lane.b32.xlu2 %v1688_v34, %s2709_s3 }
 0xf70   :  { %v1535_v63 = vpop.permute.xlu1 %1534 }
 0xf71   :  { %v1537_v21 = vmul.f32 %v1535_v63, %v1529_v46 }
 0xf73   :  { %1539 = vrot.lane.b32.xlu1 %v1537_v21, %s2709_s3 }
 0xf74   :  { %v1386_v33 = vpop.permute.xlu0 %1385 }
 0xf75   :  { %v1388_v2 = vmul.f32 %v1386_v33, %v1380_v8 }
 0xf77   :  { %1390 = vrot.lane.b32.xlu0 %v1388_v2, %s2709_s3 }
 0xfba   :  { %v1691_v14 = vpop.permute.xlu2 %1690 }
 0xfbb   :  { %v3237_v50 = vadd.f32 %v1691_v14, %v1683_v12 }
 0xfbd   :  { %2393 = vtanh.f32 %v3237_v50 }
 0xfc3   :  { %v2394_v52 = vpop.eup %2393 }
 0xfc4   :  { %1696 = vrot.lane.b32.xlu2 %v2394_v52, %s2708_s21 }
 0xfe5   :  { %v1540_v25 = vpop.permute.xlu1 %1539 }
 0xfe6   :  { %v3242_v26 = vadd.f32 %v1540_v25, %v1532_v24 }
 0xfe8   :  { %2395 = vtanh.f32 %v3242_v26 }
 0xfe9   :  { %v1391_v42 = vpop.permute.xlu0 %1390 }
 0xfea   :  { %v3246_v48 = vadd.f32 %v1391_v42, %v1383_v30 }
 0xfec   :  { %2397 = vtanh.f32 %v3246_v48 }
 0xfee   :  { %v2396_v62 = vpop.eup %2395 }
 0xfef   :  { %1545 = vrot.lane.b32.xlu1 %v2396_v62, %s2708_s21 }
 0xff2   :  { %v2398_v32 = vpop.eup %2397 }
 0xff3   :  { %1396 = vrot.lane.b32.xlu0 %v2398_v32, %s2708_s21 }
0x101e   :  { %v1697_v51 = vpop.permute.xlu2 %1696 }
0x101f   :  { %v1699_v56 = vmul.f32 %v1697_v51, %v1680_v57 }
0x1021   :  { %1721 = vrot.lane.b32.xlu2 %v1699_v56, %s2709_s3 }
0x1061   :  { %v1546_v53 = vpop.permute.xlu1 %1545 }
0x1062   :  { %v1548_v23 = vmul.f32 %v1546_v53, %v1529_v46 }
0x1064   :  { %1572 = vrot.lane.b32.xlu1 %v1548_v23, %s2709_s3 }
0x1065   :  { %v1397_v29 = vpop.permute.xlu0 %1396 }
0x1066   :  { %v1399_v43 = vmul.f32 %v1397_v29, %v1380_v8 }
0x1068   :  { %1401 = vrot.lane.b32.xlu0 %v1399_v43, %s2709_s3 }
0x107b   :  { %v1722_v45 = vpop.permute.xlu2 %1721 }
0x10d6   :  { %v1573_v44 = vpop.permute.xlu1 %1572 }
0x10d7   :  { %2217 = vmatmul.msk.f32.vlgmr.msra.gmra.mxu3 %vm236_vm5, %v1573_v44  ;;  %2221 = vmatmul.msk.f32.vlgmr.msra.gmra.mxu1 %vm236_vm5, %v1573_v44 }
0x10d8   :  { %1971 = vmatpush.msra.mxu3 %v3129_v15  ;;  %2056 = vmatpush.msra.mxu1 %v3203_v37  ;;  %v1875_v15 = vld [vmem:[#allocation2 + $0xe] sm:$0x3] }
0x10da   :  { %v1402_v27 = vpop.permute.xlu0 %1401  ;;  %1972 = vmatpush.msra.mxu3 %v3136_v17  ;;  %2057 = vmatpush.msra.mxu1 %v3208_v38 }
0x10db   :  { %1405 = vst.msk [vmem:[#allocation3 + $0x8] sm:$0x3] %vm468_vm11, %v1402_v27  ;;  %2216 = vmatmul.msk.f32.vlgmr.msra.gmra.mxu2 %vm236_vm5, %v1402_v27 }
0x10dc   :  { %1946 = vmatpush.msra.mxu2 %v3114_v9  ;;  %1973 = vmatpush.msra.mxu3 %v3143_v19 }
0x10dd   :  { %2058 = vmatpush.msra.mxu1 %v3213_v39 }
0x10de   :  { %1947 = vmatpush.msra.mxu2 %v3117_v10  ;;  %1974 = vmatpush.msra.mxu3 %v3150_v49 }
0x10df   :  { %2227 = vmatmul.msk.f32.vlgmr.msrb.gmra.mxu1 %vm236_vm5, %v1722_v45 }
0x10e0   :  { %1948 = vmatpush.msra.mxu2 %v3120_v11  ;;  %2059 = vmatpush.msra.mxu1 %v3220_v16 }
0x10e2   :  { %1949 = vmatpush.msra.mxu2 %v3123_v13 }
0x10e3   :  { %2222 = vmatmul.msk.f32.vlgmr.msrb.gmra.mxu2 %vm236_vm5, %v1722_v45 }
0x1154   :  { %v1717_v9 = vpop.f32.mrf.mxu1 }
0x115a   :  { %v1593_v37 = vpop.f32.mrf.mxu3 }
0x115c   :  { %v1893_v17 = vpop.f32.mrf.mxu1 }
0x115d   :  { %v1896_v19 = vadd.f32 %v1893_v17, %v1875_v15 }
0x115e   :  { %v1568_v38 = vpop.f32.mrf.mxu2 }
0x115f   :  { %2399 = vtanh.f32 %v1896_v19  ;;  %v1594_v10 = vadd.f32 %v1593_v37, %v1568_v38  ;;  %v2228_v6 = vmul.f32 -1.442695, %v1896_v19 }
0x1161   :  { %v1596_v49 = vadd.f32 %v3227_v1, %v1594_v10 }
0x1163   :  { %2401 = vtanh.f32 %v1596_v49  ;;  %v2218_v34 = vmul.f32 -1.442695, %v1596_v49 }
0x1165   :  { %v2400_v39 = vpop.eup %2399 }
0x1166   :  { %1919 = vrot.lane.b32.xlu2 %v2400_v39, %s2708_s21  ;;  %v1742_v11 = vpop.f32.mrf.mxu2 }
0x1167   :  { %v1743_v16 = vadd.f32 %v1742_v11, %v1717_v9 }
0x1169   :  { %v2402_v31 = vpop.eup %2401  ;;  %v1745_v13 = vadd.f32 %v3166_v54, %v1743_v16 }
0x116a   :  { %1619 = vrot.lane.b32.xlu0 %v2402_v31, %s2708_s21 }
0x116b   :  { %2403 = vtanh.f32 %v1745_v13  ;;  %v2223_v4 = vmul.f32 -1.442695, %v1745_v13 }
0x116c   :  { %2405 = vpow2.f32 %v2228_v6 }
0x1171   :  { %v2404_v55 = vpop.eup %2403 }
0x1172   :  { %1768 = vrot.lane.b32.xlu1 %v2404_v55, %s2708_s21  ;;  %v2406_v7 = vpop.eup %2405 }
0x1173   :  { %v1900_v57 = vadd.f32 1.0, %v2406_v7  ;;  %v2113_v7 = vld [vmem:[#allocation16 + $0x18] sm:$0xff] }
0x1174   :  { %2136 = vmatpush.msrb.mxu2 %v2113_v7 }
0x1175   :  { %2407 = vrcp.f32 %v1900_v57  ;;  %v1912_v40 = vand.u32 2147483648, %v1900_v57  ;;  %vm1906_vm3 = vweird.f32 %v1900_v57  ;;  %v1910_v18 = vand.u32 2147483647, %v1900_v57 }
0x1176   :  { %2409 = vpow2.f32 %v2218_v34 }
0x1177   :  { %2411 = vpow2.f32 %v2223_v4  ;;  %v1913_v59 = vor.u32 1.1754944e-38, %v1912_v40  ;;  %vm1911_vm6 = vcmp.eq.f32.partialorder %v1910_v18, 8.507059e+37  ;;  %v2108_v4 = vld [vmem:[#allocation3] sm:$0xff] }
0x117b   :  { %v2408_v58 = vpop.eup %2407 }
0x117c   :  { %v1902_v3 = vmul.f32 %v2408_v58, %v1900_v57  ;;  %v2410_v36 = vpop.eup %2409  ;;  %vm1907_vm2 = vweird.f32 %v2408_v58  ;;  %v2112_v57 = vld [vmem:[#allocation16 + $0x10] sm:$0xff] }
0x117d   :  { %v1600_v41 = vadd.f32 1.0, %v2410_v36  ;;  %vm1908_vm4 = vmor %vm1906_vm3, %vm1907_vm2  ;;  %v2412_v61 = vpop.eup %2411  ;;  %2137 = vmatpush.msrb.mxu2 %v2112_v57 }
0x117e   :  { %v1903_v22 = vsub.f32 1.0, %v1902_v3  ;;  %v1749_v46 = vadd.f32 1.0, %v2412_v61  ;;  %v2110_v3 = vld [vmem:[#allocation16] sm:$0xff] }
0x117f   :  { %2413 = vrcp.f32 %v1600_v41  ;;  %v1612_v52 = vand.u32 2147483648, %v1600_v41  ;;  %vm1606_vm8 = vweird.f32 %v1600_v41  ;;  %v1610_v24 = vand.u32 2147483647, %v1600_v41  ;;  %v3306_v61 = vld [vmem:[%s3347_s11] ss:$0 sm:$0xff]  ;;  %s2710_s11 = smov [#allocation18]  }
0x1180   :  { %v1904_v35 = vmul.f32 %v2408_v58, %v1903_v22  ;;  %2415 = vrcp.f32 %v1749_v46  ;;  %v1761_v53 = vand.u32 2147483648, %v1749_v46  ;;  %vm1755_vm13 = vweird.f32 %v1749_v46  ;;  %s2153_s28 = sshll.u32 %s2710_s11, 4  ;;  %s2154_s28 = int_to_ptr.vmem [resolvable:$true] %s2153_s28 }
0x1181   :  { %v1613_v42 = vor.u32 1.1754944e-38, %v1612_v52  ;;  %vm1611_vm10 = vcmp.eq.f32.partialorder %v1610_v24, 8.507059e+37  ;;  %v1759_v23 = vand.u32 2147483647, %v1749_v46 }
0x1182   :  { %v1905_v5 = vadd.f32 %v2408_v58, %v1904_v35  ;;  %v1762_v43 = vor.u32 1.1754944e-38, %v1761_v53 }
0x1183   :  { %vm1760_vm15 = vcmp.eq.f32.partialorder %v1759_v23, 8.507059e+37 }
0x1184   :  { %v1909_v47 = vsel %vm1908_vm4, %v2408_v58, %v1905_v5  ;;  %v2111_v58 = vld [vmem:[#allocation16 + $0x8] sm:$0xff] }
0x1185   :  { %v1914_v60 = vsel %vm1911_vm6, %v1913_v59, %v1909_v47  ;;  %v2414_v21 = vpop.eup %2413  ;;  %2138 = vmatpush.msrb.mxu2 %v2111_v58 }
0x1186   :  { %v1602_v28 = vmul.f32 %v2414_v21, %v1600_v41  ;;  %v2416_v33 = vpop.eup %2415  ;;  %vm1607_vm7 = vweird.f32 %v2414_v21  ;;  %v1917_v9 = vmul.f32 %v1914_v60, %v3237_v50 }
0x1187   :  { %v1751_v2 = vmul.f32 %v2416_v33, %v1749_v46  ;;  %vm1608_vm9 = vmor %vm1606_vm8, %vm1607_vm7  ;;  %vm1756_vm12 = vweird.f32 %v2416_v33  ;;  %2139 = vmatpush.msrb.mxu2 %v2110_v3 }
0x1188   :  { %v1603_v0 = vsub.f32 1.0, %v1602_v28  ;;  %vm1757_vm14 = vmor %vm1755_vm13, %vm1756_vm12 }
0x1189   :  { %v1752_v14 = vsub.f32 1.0, %v1751_v2 }
0x118a   :  { %v1604_v8 = vmul.f32 %v2414_v21, %v1603_v0 }
0x118b   :  { %v1753_v30 = vmul.f32 %v2416_v33, %v1752_v14 }
0x118c   :  { %v1605_v12 = vadd.f32 %v2414_v21, %v1604_v8 }
0x118d   :  { %v1754_v56 = vadd.f32 %v2416_v33, %v1753_v30 }
0x118e   :  { %v1609_v25 = vsel %vm1608_vm9, %v2414_v21, %v1605_v12 }
0x118f   :  { %v1614_v32 = vsel %vm1611_vm10, %v1613_v42, %v1609_v25  ;;  %v1758_v29 = vsel %vm1757_vm14, %v2416_v33, %v1754_v56 }
0x1190   :  { %v1763_v27 = vsel %vm1760_vm15, %v1762_v43, %v1758_v29  ;;  %v1617_v37 = vmul.f32 %v1614_v32, %v3246_v48 }
0x1191   :  { %v1766_v49 = vmul.f32 %v1763_v27, %v3242_v26 }
0x11c0   :  { %v1920_v20 = vpop.permute.xlu2 %1919 }
0x11c1   :  { %v1922_v63 = vmul.f32 %v1920_v20, %v1914_v60 }
0x11c3   :  { %1924 = vrot.lane.b32.xlu2 %v1922_v63, %s2709_s3 }
0x11dc   :  { %v1620_v62 = vpop.permute.xlu0 %1619 }
0x11dd   :  { %v1622_v51 = vmul.f32 %v1620_v62, %v1614_v32 }
0x11df   :  { %1624 = vrot.lane.b32.xlu0 %v1622_v51, %s2709_s3 }
0x11e4   :  { %v1769_v44 = vpop.permute.xlu1 %1768 }
0x11e5   :  { %v1771_v45 = vmul.f32 %v1769_v44, %v1763_v27 }
0x11e7   :  { %1773 = vrot.lane.b32.xlu1 %v1771_v45, %s2709_s3 }
0x121d   :  { %v1925_v15 = vpop.permute.xlu2 %1924 }
0x121e   :  { %v1927_v17 = vadd.f32 %v1925_v15, %v1917_v9 }
0x1220   :  { %2417 = vtanh.f32 %v1927_v17 }
0x1226   :  { %v2418_v19 = vpop.eup %2417 }
0x1227   :  { %1930 = vrot.lane.b32.xlu2 %v2418_v19, %s2708_s21 }
0x1251   :  { %v1625_v38 = vpop.permute.xlu0 %1624 }
0x1252   :  { %v3283_v10 = vadd.f32 %v1625_v38, %v1617_v37 }
0x1254   :  { %2419 = vtanh.f32 %v3283_v10 }
0x1259   :  { %v1774_v39 = vpop.permute.xlu1 %1773 }
0x125a   :  { %v2420_v11 = vpop.eup %2419  ;;  %v3287_v16 = vadd.f32 %v1774_v39, %v1766_v49 }
0x125b   :  { %1630 = vrot.lane.b32.xlu0 %v2420_v11, %s2708_s21 }
0x125c   :  { %2421 = vtanh.f32 %v3287_v16 }
0x1262   :  { %v2422_v50 = vpop.eup %2421 }
0x1263   :  { %1779 = vrot.lane.b32.xlu1 %v2422_v50, %s2708_s21 }
0x1281   :  { %v1931_v31 = vpop.permute.xlu2 %1930 }
0x1282   :  { %v1933_v48 = vmul.f32 %v1931_v31, %v1914_v60 }
0x1284   :  { %1955 = vrot.lane.b32.xlu2 %v1933_v48, %s2709_s3 }
0x12cd   :  { %v1631_v13 = vpop.permute.xlu0 %1630 }
0x12ce   :  { %v1633_v55 = vmul.f32 %v1631_v13, %v1614_v32 }
0x12d0   :  { %1635 = vrot.lane.b32.xlu0 %v1633_v55, %s2709_s3 }
0x12d5   :  { %v1780_v26 = vpop.permute.xlu1 %1779 }
0x12d6   :  { %v1782_v6 = vmul.f32 %v1780_v26, %v1763_v27 }
0x12d8   :  { %1806 = vrot.lane.b32.xlu1 %v1782_v6, %s2709_s3 }
0x12de   :  { %v1956_v35 = vpop.permute.xlu2 %1955 }
0x1342   :  { %v1636_v34 = vpop.permute.xlu0 %1635 }
0x1343   :  { %1639 = vst.msk [vmem:[#allocation3 + $0xa] sm:$0x3] %vm468_vm11, %v1636_v34  ;;  %2224 = vmatmul.msk.f32.vlgmr.msrb.gmra.mxu3 %vm236_vm5, %v1636_v34 }
0x134a   :  { %v1807_v22 = vpop.permute.xlu1 %1806 }
0x134b   :  { %2225 = vmatmul.msk.f32.vlgmr.msra.gmra.mxu0 %vm236_vm5, %v1807_v22  ;;  %2229 = vmatmul.msk.f32.vlgmr.msra.gmra.mxu2 %vm236_vm5, %v1807_v22 }
0x134c   :  { %2230 = vmatmul.msk.f32.vlgmr.msra.gmra.mxu3 %vm236_vm5, %v1956_v35 }
0x1353   :  { %2235 = vmatmul.msk.f32.vlgmr.msrb.gmra.mxu2 %vm236_vm5, %v2108_v4 }
0x13c6   :  { %v1802_v36 = vpop.f32.mrf.mxu3 }
0x13c8   :  { %v1827_v5 = vpop.f32.mrf.mxu0 }
0x13c9   :  { %v1828_v40 = vadd.f32 %v1827_v5, %v1802_v36 }
0x13cb   :  { %v1830_v18 = vadd.f32 %v3227_v1, %v1828_v40 }
0x13cd   :  { %2423 = vtanh.f32 %v1830_v18  ;;  %v2226_v28 = vmul.f32 -1.442695, %v1830_v18 }
0x13ce   :  { %v1951_v41 = vpop.f32.mrf.mxu2 }
0x13cf   :  { %v1976_v47 = vpop.f32.mrf.mxu3 }
0x13d0   :  { %v1977_v59 = vadd.f32 %v1976_v47, %v1951_v41 }
0x13d2   :  { %v1979_v20 = vadd.f32 %v3166_v54, %v1977_v59 }
0x13d3   :  { %v2424_v60 = vpop.eup %2423 }
0x13d4   :  { %2425 = vtanh.f32 %v1979_v20  ;;  %1853 = vrot.lane.b32.xlu0 %v2424_v60, %s2708_s21  ;;  %v2231_v0 = vmul.f32 -1.442695, %v1979_v20 }
0x13d5   :  { %2427 = vpow2.f32 %v2226_v28 }
0x13d6   :  { %v2141_v63 = vpop.f32.mrf.mxu2  ;;  %2429 = vpow2.f32 %v2231_v0 }
0x13d7   :  { %v2142_v46 = vadd.f32 %v3306_v61, %v2141_v63 }
0x13d9   :  { %2147 = vst [vmem:[#allocation18] sm:$0xff] %v2142_v46 }
0x13da   :  { %v2426_v21 = vpop.eup %2425 }
0x13db   :  { %2002 = vrot.lane.b32.xlu1 %v2426_v21, %s2708_s21  ;;  %v2428_v54 = vpop.eup %2427 }
0x13dc   :  { %v1834_v33 = vadd.f32 1.0, %v2428_v54  ;;  %v2430_v8 = vpop.eup %2429 }
0x13dd   :  { %v1983_v2 = vadd.f32 1.0, %v2430_v8 }
0x13de   :  { %2431 = vrcp.f32 %v1834_v33  ;;  %v1846_v32 = vand.u32 2147483648, %v1834_v33  ;;  %vm1840_vm1 = vweird.f32 %v1834_v33  ;;  %v1844_v51 = vand.u32 2147483647, %v1834_v33 }
0x13df   :  { %2433 = vrcp.f32 %v1983_v2  ;;  %v1995_v45 = vand.u32 2147483648, %v1983_v2  ;;  %vm1989_vm6 = vweird.f32 %v1983_v2  ;;  %v1993_v9 = vand.u32 2147483647, %v1983_v2 }
0x13e0   :  { %v1847_v23 = vor.u32 1.1754944e-38, %v1846_v32  ;;  %vm1845_vm3 = vcmp.eq.f32.partialorder %v1844_v51, 8.507059e+37 }
0x13e1   :  { %v1996_v17 = vor.u32 1.1754944e-38, %v1995_v45  ;;  %vm1994_vm8 = vcmp.eq.f32.partialorder %v1993_v9, 8.507059e+37 }
0x13e4   :  { %v2432_v12 = vpop.eup %2431 }
0x13e5   :  { %v1836_v14 = vmul.f32 %v2432_v12, %v1834_v33  ;;  %v2434_v52 = vpop.eup %2433  ;;  %vm1841_vm0 = vweird.f32 %v2432_v12 }
0x13e6   :  { %v1985_v25 = vmul.f32 %v2434_v52, %v1983_v2  ;;  %vm1842_vm2 = vmor %vm1840_vm1, %vm1841_vm0  ;;  %vm1990_vm4 = vweird.f32 %v2434_v52 }
0x13e7   :  { %v1837_v24 = vsub.f32 1.0, %v1836_v14  ;;  %vm1991_vm7 = vmor %vm1989_vm6, %vm1990_vm4 }
0x13e8   :  { %v1986_v42 = vsub.f32 1.0, %v1985_v25 }
0x13e9   :  { %v1838_v30 = vmul.f32 %v2432_v12, %v1837_v24 }
0x13ea   :  { %v1987_v56 = vmul.f32 %v2434_v52, %v1986_v42 }
0x13eb   :  { %v1839_v62 = vadd.f32 %v2432_v12, %v1838_v30 }
0x13ec   :  { %v1988_v44 = vadd.f32 %v2434_v52, %v1987_v56 }
0x13ed   :  { %v1843_v53 = vsel %vm1842_vm2, %v2432_v12, %v1839_v62 }
0x13ee   :  { %v1848_v43 = vsel %vm1845_vm3, %v1847_v23, %v1843_v53  ;;  %v1992_v15 = vsel %vm1991_vm7, %v2434_v52, %v1988_v44 }
0x13ef   :  { %v1997_v37 = vsel %vm1994_vm8, %v1996_v17, %v1992_v15  ;;  %v1851_v49 = vmul.f32 %v1848_v43, %v3283_v10 }
0x13f0   :  { %v2000_v31 = vmul.f32 %v1997_v37, %v3287_v16 }
0x1446   :  { %v1854_v29 = vpop.permute.xlu0 %1853 }
0x1447   :  { %v1856_v27 = vmul.f32 %v1854_v29, %v1848_v43 }
0x1449   :  { %1858 = vrot.lane.b32.xlu2 %v1856_v27, %s2709_s3 }
0x144d   :  { %v2003_v19 = vpop.permute.xlu1 %2002 }
0x144e   :  { %v2005_v38 = vmul.f32 %v2003_v19, %v1997_v37 }
0x1450   :  { %2007 = vrot.lane.b32.xlu0 %v2005_v38, %s2709_s3 }
0x14a3   :  { %v1859_v39 = vpop.permute.xlu2 %1858 }
0x14a4   :  { %v1861_v11 = vadd.f32 %v1859_v39, %v1851_v49 }
0x14a6   :  { %2435 = vtanh.f32 %v1861_v11 }
0x14ac   :  { %v2436_v50 = vpop.eup %2435 }
0x14ad   :  { %1864 = vrot.lane.b32.xlu1 %v2436_v50, %s2708_s21 }
0x14c2   :  { %v2008_v48 = vpop.permute.xlu0 %2007 }
0x14c3   :  { %v2010_v13 = vadd.f32 %v2008_v48, %v2000_v31 }
0x14c5   :  { %2437 = vtanh.f32 %v2010_v13 }
0x14cb   :  { %v2438_v55 = vpop.eup %2437 }
0x14cc   :  { %2013 = vrot.lane.b32.xlu2 %v2438_v55, %s2708_s21 }
0x151f   :  { %v1865_v26 = vpop.permute.xlu1 %1864 }
0x1520   :  { %v1867_v6 = vmul.f32 %v1865_v26, %v1848_v43 }
0x1522   :  { %1869 = vrot.lane.b32.xlu0 %v1867_v6, %s2709_s3 }
0x1526   :  { %v2014_v7 = vpop.permute.xlu2 %2013 }
0x1527   :  { %v2016_v10 = vmul.f32 %v2014_v7, %v1997_v37 }
0x1529   :  { %2040 = vrot.lane.b32.xlu1 %v2016_v10, %s2709_s3 }
0x1594   :  { %v1870_v57 = vpop.permute.xlu0 %1869 }
0x1595   :  { %1873 = vst.msk [vmem:[#allocation3 + $0xc] sm:$0x3] %vm468_vm11, %v1870_v57  ;;  %2232 = vmatmul.msk.f32.vlgmr.msrb.gmra.mxu0 %vm236_vm5, %v1870_v57 }
0x159b   :  { %v2041_v16 = vpop.permute.xlu1 %2040 }
0x159c   :  { %2233 = vmatmul.msk.f32.vlgmr.msra.gmra.mxu1 %vm236_vm5, %v2041_v16 }
0x1612   :  { %v2036_v58 = vpop.f32.mrf.mxu0 }
0x1619   :  { %v2061_v3 = vpop.f32.mrf.mxu1 }
0x161a   :  { %v2062_v34 = vadd.f32 %v2061_v3, %v2036_v58 }
0x161c   :  { %v2064_v22 = vadd.f32 %v3227_v1, %v2062_v34 }
0x161e   :  { %2439 = vtanh.f32 %v2064_v22  ;;  %v2234_v4 = vmul.f32 -1.442695, %v2064_v22 }
0x1620   :  { %2441 = vpow2.f32 %v2234_v4 }
0x1624   :  { %v2440_v35 = vpop.eup %2439 }
0x1625   :  { %2087 = vrot.lane.b32.xlu2 %v2440_v35, %s2708_s21 }
0x1626   :  { %v2442_v36 = vpop.eup %2441 }
0x1627   :  { %v2068_v5 = vadd.f32 1.0, %v2442_v36 }
0x1629   :  { %2443 = vrcp.f32 %v2068_v5  ;;  %v2080_v20 = vand.u32 2147483648, %v2068_v5  ;;  %vm2074_vm10 = vweird.f32 %v2068_v5  ;;  %v2078_v60 = vand.u32 2147483647, %v2068_v5 }
0x162b   :  { %v2081_v63 = vor.u32 1.1754944e-38, %v2080_v20  ;;  %vm2079_vm13 = vcmp.eq.f32.partialorder %v2078_v60, 8.507059e+37 }
0x162f   :  { %v2444_v40 = vpop.eup %2443 }
0x1630   :  { %v2070_v18 = vmul.f32 %v2444_v40, %v2068_v5  ;;  %vm2075_vm9 = vweird.f32 %v2444_v40 }
0x1631   :  { %vm2076_vm12 = vmor %vm2074_vm10, %vm2075_vm9 }
0x1632   :  { %v2071_v41 = vsub.f32 1.0, %v2070_v18 }
0x1634   :  { %v2072_v47 = vmul.f32 %v2444_v40, %v2071_v41 }
0x1636   :  { %v2073_v59 = vadd.f32 %v2444_v40, %v2072_v47 }
0x1638   :  { %v2077_v1 = vsel %vm2076_vm12, %v2444_v40, %v2073_v59 }
0x1639   :  { %v2082_v21 = vsel %vm2079_vm13, %v2081_v63, %v2077_v1 }
0x163a   :  { %v2085_v0 = vmul.f32 %v2082_v21, %v1861_v11 }
0x167f   :  { %v2088_v46 = vpop.permute.xlu2 %2087 }
0x1680   :  { %v2090_v28 = vmul.f32 %v2088_v46, %v2082_v21 }
0x1682   :  { %2092 = vrot.lane.b32.xlu0 %v2090_v28, %s2709_s3 }
0x16f4   :  { %v2093_v54 = vpop.permute.xlu0 %2092 }
0x16f5   :  { %v2095_v33 = vadd.f32 %v2093_v54, %v2085_v0 }
0x16f7   :  { %2445 = vtanh.f32 %v2095_v33 }
0x16fd   :  { %v2446_v8 = vpop.eup %2445 }
0x16fe   :  { %2098 = vrot.lane.b32.xlu1 %v2446_v8, %s2708_s21 }
0x1770   :  { %v2099_v2 = vpop.permute.xlu1 %2098 }
0x1771   :  { %v2101_v12 = vmul.f32 %v2099_v2, %v2082_v21 }
0x1773   :  { %2103 = vrot.lane.b32.xlu2 %v2101_v12, %s2709_s3 }
0x17cd   :  { %v2104_v14 = vpop.permute.xlu2 %2103 }
0x17ce   :  { %2107 = vst.msk [vmem:[#allocation3 + $0xe] sm:$0x3] %vm468_vm11, %v2104_v14 }
0x17d5   :  { %v2109_v52 = vld [vmem:[#allocation3 + $0x8] sm:$0xff] }
0x17d6   :  { %2236 = vmatmul.msk.f32.gmra.mxu2 %vm236_vm5, %v2109_v52 }
0x1859   :  { %v2144_v24 = vpop.f32.mrf.mxu2 }
0x185a   :  { %v2145_v25 = vadd.f32 %v3306_v61, %v2144_v24 }
0x185c   :  { %2148 = vst [vmem:[#allocation18 + $0x8] sm:$0xff] %v2145_v25 }
0x185d   :  { %2161 = dma.vmem_to_hbm [thread:$0]  %s2154_s28, 256, %s2156_s14, [#allocation6], %s2698_s29, %s2698_s29, %s2699_s30  }
0x185e   :  { %2695 = dma.done.wait [#allocation6], 256  }
0x185f   :  { %2696 = vsyncadd [#allocation6], 4294967040 }
0x1860   :  { %2166 = vsyncpa [#allocation5], 1 }
0x1861   :  { %2167 = vsyncpa [#allocation8], 1 }
0x1862   :  { %2168 = vsyncpa [#allocation11], 1 }
0x1863   :  { %2169 = vsyncpa [#allocation14], 1 }
0x1864   :  { %2170 = vsyncpa [#allocation17], 1 }
0x1865   :  { %2171 = vsyncpa [#allocation6], 1 }

</bundles_post_ra>
